<compile_context>
chip_gen: v7x
topology: tpu7x:2x2x1
jax: 0.10.0
libtpu: 0.0.40
codegen_flags: <defaults>
</compile_context>

<pallas_src>
import math
import functools

import jax
import jax.numpy as jnp
from jax import lax
from jax.experimental import pallas as pl
from jax.experimental.pallas import tpu as pltpu

# Matmul operand dtype (accumulation is always f32).  bf16 halves HBM/VMEM
# traffic and feeds the MXU at full rate on v5e/v6e/v7x.  Set to jnp.float32
# for bit-exact f32 reference semantics.
MATMUL_DTYPE = jnp.bfloat16

NORM_EPS = 1e-6


# ----------------------------------------------------------------------------
# In-kernel helpers
# ----------------------------------------------------------------------------

def _dot(a, b):
    return jnp.dot(a.astype(MATMUL_DTYPE), b.astype(MATMUL_DTYPE),
                   preferred_element_type=jnp.float32)


def _dot_nt(a, b):
    # a @ b.T without materializing the transpose (MXU handles trans_b).
    return lax.dot_general(
        a.astype(MATMUL_DTYPE), b.astype(MATMUL_DTYPE),
        (((1,), (1,)), ((), ())),
        preferred_element_type=jnp.float32)


def _norm(x, alpha, beta, eps):
    # Tutorial `Norm`: alpha * (x - mean) / (std + eps) + beta.
    # torch.Tensor.std defaults to the unbiased estimator (ddof=1).
    d = x.shape[-1]
    mean = jnp.mean(x, axis=-1, keepdims=True)
    diff = x - mean
    var = jnp.sum(diff * diff, axis=-1, keepdims=True) / (d - 1)
    return alpha * diff / (jnp.sqrt(var) + eps) + beta


def _mha(q2d, k2d, v2d, mask2d, heads):
    """Multi-head attention on lane-contiguous (L, D) projections.

    All heads of one batch element are computed in a single grid step; the
    head split is a static lane slice (no reshape/transpose through HBM)."""
    _, d = q2d.shape
    dk = d // heads
    scale = 1.0 / math.sqrt(dk)
    ctx = []
    for h in range(heads):                       # static unroll (heads is small)
        sl = slice(h * dk, (h + 1) * dk)
        s = _dot_nt(q2d[:, sl], k2d[:, sl]) * scale + mask2d      # (Lq, Lk)
        s = s - jnp.max(s, axis=-1, keepdims=True)
        p = jnp.exp(s)
        p = p * pl.reciprocal(jnp.sum(p, axis=-1, keepdims=True), approx=True)
        ctx.append(_dot(p, v2d[:, sl]))                           # (Lq, dk)
    return jnp.concatenate(ctx, axis=-1)                          # (Lq, D)


# ----------------------------------------------------------------------------
# Fused stack kernels (one grid step == one batch element, all layers fused)
# ----------------------------------------------------------------------------

def _encoder_stack_kernel(x_ref, mask_ref,
                          n1a_ref, n1b_ref, wqkv_ref, bqkv_ref, wo_ref, bo_ref,
                          n2a_ref, n2b_ref, w1_ref, b1_ref, w2_ref, b2_ref,
                          fna_ref, fnb_ref, o_ref, *, heads, eps, n_layers):
    x = x_ref[0]                                           # (Ls, D) f32
    mask = mask_ref[0]                                     # (Ls, Ls) additive
    d = x.shape[-1]

    # Hoist all weight loads out of the layer loop (shared-parameter layers).
    n1a, n1b = n1a_ref[...], n1b_ref[...]
    wqkv, bqkv = wqkv_ref[...], bqkv_ref[...]
    wo, bo = wo_ref[...], bo_ref[...]
    n2a, n2b = n2a_ref[...], n2b_ref[...]
    w1, b1 = w1_ref[...], b1_ref[...]
    w2, b2 = w2_ref[...], b2_ref[...]

    for _ in range(n_layers):                              # static unroll
        # --- self-attention sub-block ---
        x2 = _norm(x, n1a, n1b, eps)
        qkv = _dot(x2, wqkv) + bqkv                        # (Ls, 3D)
        q, k, v = qkv[:, :d], qkv[:, d:2 * d], qkv[:, 2 * d:]
        x = x + _dot(_mha(q, k, v, mask, heads), wo) + bo  # residual add
        # --- feed-forward sub-block ---
        x2 = _norm(x, n2a, n2b, eps)
        h = jnp.maximum(_dot(x2, w1) + b1, 0.0)            # ReLU
        x = x + _dot(h, w2) + b2                           # residual add

    o_ref[0] = _norm(x, fna_ref[...], fnb_ref[...], eps)   # Encoder.norm


def _decoder_stack_kernel(y_ref, eo_ref, smask_ref, cmask_ref,
                          n1a_ref, n1b_ref, wqkv_ref, bqkv_ref, wo1_ref, bo1_ref,
                          n2a_ref, n2b_ref, wq_ref, bq_ref, wkv_ref, bkv_ref,
                          wo2_ref, bo2_ref,
                          n3a_ref, n3b_ref, w1_ref, b1_ref, w2_ref, b2_ref,
                          fna_ref, fnb_ref, outw_ref, outb_ref, o_ref,
                          *, heads, eps, n_layers):
    y = y_ref[0]                                           # (Lt, D) f32
    eo = eo_ref[0]                                         # (Ls, D) encoder out
    smask = smask_ref[0]                                   # (Lt, Lt)
    cmask = cmask_ref[0]                                   # (Lt, Ls)
    d = y.shape[-1]

    n1a, n1b = n1a_ref[...], n1b_ref[...]
    wqkv, bqkv = wqkv_ref[...], bqkv_ref[...]
    wo1, bo1 = wo1_ref[...], bo1_ref[...]
    n2a, n2b = n2a_ref[...], n2b_ref[...]
    wq, bq = wq_ref[...], bq_ref[...]
    wkv, bkv = wkv_ref[...], bkv_ref[...]
    wo2, bo2 = wo2_ref[...], bo2_ref[...]
    n3a, n3b = n3a_ref[...], n3b_ref[...]
    w1, b1 = w1_ref[...], b1_ref[...]
    w2, b2 = w2_ref[...], b2_ref[...]

    # Cross-attention K/V of the encoder output depend only on shared weights
    # and e_outputs -> compute ONCE and reuse across all decoder layers.
    kv_x = _dot(eo, wkv) + bkv                             # (Ls, 2D)
    k_x, v_x = kv_x[:, :d], kv_x[:, d:]

    for _ in range(n_layers):                              # static unroll
        # --- masked self-attention sub-block ---
        y2 = _norm(y, n1a, n1b, eps)
        qkv = _dot(y2, wqkv) + bqkv                        # (Lt, 3D)
        q, k, v = qkv[:, :d], qkv[:, d:2 * d], qkv[:, 2 * d:]
        y = y + _dot(_mha(q, k, v, smask, heads), wo1) + bo1
        # --- cross-attention sub-block ---
        y2 = _norm(y, n2a, n2b, eps)
        q = _dot(y2, wq) + bq                              # (Lt, D)
        y = y + _dot(_mha(q, k_x, v_x, cmask, heads), wo2) + bo2
        # --- feed-forward sub-block ---
        y2 = _norm(y, n3a, n3b, eps)
        h = jnp.maximum(_dot(y2, w1) + b1, 0.0)            # ReLU
        y = y + _dot(h, w2) + b2

    # Decoder.norm fused with the final output Linear (d_model -> trg_vocab).
    y2 = _norm(y, fna_ref[...], fnb_ref[...], eps)
    o_ref[0] = _dot(y2, outw_ref[...]) + outb_ref[...]


# ----------------------------------------------------------------------------
# pallas_call wrappers
# ----------------------------------------------------------------------------

_PARALLEL_B = pltpu.CompilerParams(dimension_semantics=("parallel",))


def _rep(shape):
    """Spec for a 2-D weight that stays resident across the whole grid."""
    return pl.BlockSpec(shape, lambda b: (0, 0))


def encoder_stack(x, bias, ep, fna, fnb, *, heads, n_layers, eps=NORM_EPS):
    B, L, D = x.shape
    F = ep["ff_w1"].shape[1]
    return pl.pallas_call(
        functools.partial(_encoder_stack_kernel, heads=heads, eps=eps,
                          n_layers=n_layers),
        out_shape=jax.ShapeDtypeStruct((B, L, D), jnp.float32),
        grid=(B,),
        in_specs=[
            pl.BlockSpec((1, L, D), lambda b: (b, 0, 0)),   # x (embed + PE)
            pl.BlockSpec((1, L, L), lambda b: (b, 0, 0)),   # additive mask
            _rep((1, D)), _rep((1, D)),                     # norm_1 alpha / bias
            _rep((D, 3 * D)), _rep((1, 3 * D)),             # fused QKV weight/bias
            _rep((D, D)), _rep((1, D)),                     # out-proj weight/bias
            _rep((1, D)), _rep((1, D)),                     # norm_2 alpha / bias
            _rep((D, F)), _rep((1, F)),                     # FFN W1 / b1
            _rep((F, D)), _rep((1, D)),                     # FFN W2 / b2
            _rep((1, D)), _rep((1, D)),                     # final encoder norm
        ],
        out_specs=pl.BlockSpec((1, L, D), lambda b: (b, 0, 0)),
        compiler_params=_PARALLEL_B,
    )(x, bias,
      ep["n1_a"], ep["n1_b"], ep["attn"]["wqkv"], ep["attn"]["bqkv"],
      ep["attn"]["wo"], ep["attn"]["bo"],
      ep["n2_a"], ep["n2_b"], ep["ff_w1"], ep["ff_b1"], ep["ff_w2"], ep["ff_b2"],
      fna, fnb)


def decoder_stack(y, e_out, self_bias, cross_bias, dp, fna, fnb, out_w, out_b,
                  *, heads, n_layers, eps=NORM_EPS):
    B, Lt, D = y.shape
    Ls = e_out.shape[1]
    F = dp["ff_w1"].shape[1]
    V = out_w.shape[1]
    a1, a2 = dp["attn1"], dp["attn2"]
    return pl.pallas_call(
        functools.partial(_decoder_stack_kernel, heads=heads, eps=eps,
                          n_layers=n_layers),
        out_shape=jax.ShapeDtypeStruct((B, Lt, V), jnp.float32),
        grid=(B,),
        in_specs=[
            pl.BlockSpec((1, Lt, D), lambda b: (b, 0, 0)),   # y (embed + PE)
            pl.BlockSpec((1, Ls, D), lambda b: (b, 0, 0)),   # encoder output
            pl.BlockSpec((1, Lt, Lt), lambda b: (b, 0, 0)),  # self-attn mask
            pl.BlockSpec((1, Lt, Ls), lambda b: (b, 0, 0)),  # cross-attn mask
            _rep((1, D)), _rep((1, D)),                      # norm_1
            _rep((D, 3 * D)), _rep((1, 3 * D)),              # self-attn QKV
            _rep((D, D)), _rep((1, D)),                      # self-attn out proj
            _rep((1, D)), _rep((1, D)),                      # norm_2
            _rep((D, D)), _rep((1, D)),                      # cross-attn Q
            _rep((D, 2 * D)), _rep((1, 2 * D)),              # cross-attn fused KV
            _rep((D, D)), _rep((1, D)),                      # cross-attn out proj
            _rep((1, D)), _rep((1, D)),                      # norm_3
            _rep((D, F)), _rep((1, F)),                      # FFN W1 / b1
            _rep((F, D)), _rep((1, D)),                      # FFN W2 / b2
            _rep((1, D)), _rep((1, D)),                      # final decoder norm
            _rep((D, V)), _rep((1, V)),                      # output Linear
        ],
        out_specs=pl.BlockSpec((1, Lt, V), lambda b: (b, 0, 0)),
        compiler_params=_PARALLEL_B,
    )(y, e_out, self_bias, cross_bias,
      dp["n1_a"], dp["n1_b"], a1["wqkv"], a1["bqkv"], a1["wo"], a1["bo"],
      dp["n2_a"], dp["n2_b"], a2["wq"], a2["bq"], a2["wkv"], a2["bkv"],
      a2["wo"], a2["bo"],
      dp["n3_a"], dp["n3_b"], dp["ff_w1"], dp["ff_b1"], dp["ff_w2"], dp["ff_b2"],
      fna, fnb, out_w, out_b)


# ----------------------------------------------------------------------------
# Model glue (embedding gather, positional encoding, mask -> additive bias)
# ----------------------------------------------------------------------------

def mask_to_bias(mask, Lq, Lk):
    """mask (B, 1, Lk) or (B, Lq, Lk), 0 = masked -> additive bias (B, Lq, Lk)."""
    bias = jnp.where(mask == 0, -1e9, 0.0).astype(jnp.float32)
    return jnp.broadcast_to(bias, (mask.shape[0], Lq, Lk))


def positional_encoding(L, D):
    pos = jnp.arange(L, dtype=jnp.float32)[:, None]
    i = jnp.arange(0, D, 2, dtype=jnp.float32)[None, :]
    angle = pos / jnp.power(10000.0, i / D)
    # Interleave sin/cos -> pe[:, 0::2] = sin, pe[:, 1::2] = cos.
    return jnp.stack([jnp.sin(angle), jnp.cos(angle)], axis=-1).reshape(L, D)


def transformer_forward(params, src, trg, src_mask, trg_mask, *, d_model, heads, n):
    B, Ls = src.shape
    _, Lt = trg.shape

    # Additive masks computed once (no per-head replication, no per-layer redo).
    enc_bias = mask_to_bias(src_mask, Ls, Ls)
    self_bias = mask_to_bias(trg_mask, Lt, Lt)
    cross_bias = mask_to_bias(src_mask, Lt, Ls)

    # ----- encoder: one fused pallas_call for all N layers + final norm -----
    x = params["enc_embed"][src] * math.sqrt(d_model)
    x = x + positional_encoding(Ls, d_model)[None]
    e_out = encoder_stack(x, enc_bias, params["enc_layer"],
                          params["enc_norm_a"], params["enc_norm_b"],
                          heads=heads, n_layers=n)

    # ----- decoder: one fused pallas_call for all N layers + norm + Linear ---
    y = params["dec_embed"][trg] * math.sqrt(d_model)
    y = y + positional_encoding(Lt, d_model)[None]
    return decoder_stack(y, e_out, self_bias, cross_bias, params["dec_layer"],
                         params["dec_norm_a"], params["dec_norm_b"],
                         params["out_w"], params["out_b"],
                         heads=heads, n_layers=n)


# ----------------------------------------------------------------------------
# Deterministic parameter initialization
# ----------------------------------------------------------------------------

def _mk_w(key, shape):
    return (jax.random.normal(key, shape, jnp.float32) * 0.02).astype(MATMUL_DTYPE)


def _init_self_attn(key, d):
    kq, kk, kv, ko = jax.random.split(key, 4)
    return {
        "wqkv": jnp.concatenate([_mk_w(kq, (d, d)), _mk_w(kk, (d, d)),
                                 _mk_w(kv, (d, d))], axis=1),   # (D, 3D)
        "bqkv": jnp.zeros((1, 3 * d), jnp.float32),
        "wo": _mk_w(ko, (d, d)),
        "bo": jnp.zeros((1, d), jnp.float32),
    }


def _init_cross_attn(key, d):
    kq, kk, kv, ko = jax.random.split(key, 4)
    return {
        "wq": _mk_w(kq, (d, d)),
        "bq": jnp.zeros((1, d), jnp.float32),
        "wkv": jnp.concatenate([_mk_w(kk, (d, d)), _mk_w(kv, (d, d))], axis=1),
        "bkv": jnp.zeros((1, 2 * d), jnp.float32),
        "wo": _mk_w(ko, (d, d)),
        "bo": jnp.zeros((1, d), jnp.float32),
    }


def _norm_params(d):
    return jnp.ones((1, d), jnp.float32), jnp.zeros((1, d), jnp.float32)


def _init_enc_layer(key, d, d_ff):
    ka, k1, k2 = jax.random.split(key, 3)
    n1_a, n1_b = _norm_params(d)
    n2_a, n2_b = _norm_params(d)
    return {
        "n1_a": n1_a, "n1_b": n1_b, "n2_a": n2_a, "n2_b": n2_b,
        "attn": _init_self_attn(ka, d),
        "ff_w1": _mk_w(k1, (d, d_ff)), "ff_b1": jnp.zeros((1, d_ff), jnp.float32),
        "ff_w2": _mk_w(k2, (d_ff, d)), "ff_b2": jnp.zeros((1, d), jnp.float32),
    }


def _init_dec_layer(key, d, d_ff):
    ka1, ka2, k1, k2 = jax.random.split(key, 4)
    n1_a, n1_b = _norm_params(d)
    n2_a, n2_b = _norm_params(d)
    n3_a, n3_b = _norm_params(d)
    return {
        "n1_a": n1_a, "n1_b": n1_b, "n2_a": n2_a, "n2_b": n2_b,
        "n3_a": n3_a, "n3_b": n3_b,
        "attn1": _init_self_attn(ka1, d),
        "attn2": _init_cross_attn(ka2, d),
        "ff_w1": _mk_w(k1, (d, d_ff)), "ff_b1": jnp.zeros((1, d_ff), jnp.float32),
        "ff_w2": _mk_w(k2, (d_ff, d)), "ff_b2": jnp.zeros((1, d), jnp.float32),
    }


def init_params(key, src_vocab, trg_vocab, d_model, d_ff):
    k = jax.random.split(key, 5)
    enc_na, enc_nb = _norm_params(d_model)
    dec_na, dec_nb = _norm_params(d_model)
    return {
        "enc_embed": jax.random.normal(k[0], (src_vocab, d_model), jnp.float32) * 0.02,
        "dec_embed": jax.random.normal(k[1], (trg_vocab, d_model), jnp.float32) * 0.02,
        "enc_layer": _init_enc_layer(k[2], d_model, d_ff),
        "dec_layer": _init_dec_layer(k[3], d_model, d_ff),
        "enc_norm_a": enc_na, "enc_norm_b": enc_nb,
        "dec_norm_a": dec_na, "dec_norm_b": dec_nb,
        "out_w": _mk_w(k[4], (d_model, trg_vocab)),
        "out_b": jnp.zeros((1, trg_vocab), jnp.float32),
    }


# ----------------------------------------------------------------------------
# main
# ----------------------------------------------------------------------------

if __name__ == "__main__":
    B, Ls, Lt = 2, 8, 8
    d_model, heads, n_layers = 32, 4, 2
    src_vocab, trg_vocab = 11, 13
    d_ff = 128  # FeedForward hidden width (tutorial default is 2048; kept small)

    key = jax.random.PRNGKey(0)
    kp, ks, kt = jax.random.split(key, 3)

    params = init_params(kp, src_vocab, trg_vocab, d_model, d_ff)

    src = jax.random.randint(ks, (B, Ls), 0, src_vocab, dtype=jnp.int32)
    trg = jax.random.randint(kt, (B, Lt), 0, trg_vocab, dtype=jnp.int32)
    src_mask = jnp.ones((B, 1, Ls), jnp.float32)                       # no padding
    trg_mask = jnp.broadcast_to(
        jnp.tril(jnp.ones((Lt, Lt), jnp.float32))[None], (B, Lt, Lt)   # causal
    )

    fwd = jax.jit(
        functools.partial(
            transformer_forward, d_model=d_model, heads=heads, n=n_layers
        )
    )
    out = fwd(params, src, trg, src_mask, trg_mask)
    out = jax.block_until_ready(out)
    assert out.shape == (B, Lt, trg_vocab), out.shape
    assert jnp.all(jnp.isfinite(out))
    print("KERNEL_OK")
</pallas_src>

<mosaic_0001>
module attributes {stable_mosaic.version = 11 : i64} {
  func.func @_encoder_stack_kernel(%arg0: i32, %arg1: memref<1x8x32xf32, #tpu.memory_space<vmem>>, %arg2: memref<1x8x8xf32, #tpu.memory_space<vmem>>, %arg3: memref<1x32xf32, #tpu.memory_space<vmem>>, %arg4: memref<1x32xf32, #tpu.memory_space<vmem>>, %arg5: memref<32x96xbf16, #tpu.memory_space<vmem>>, %arg6: memref<1x96xf32, #tpu.memory_space<vmem>>, %arg7: memref<32x32xbf16, #tpu.memory_space<vmem>>, %arg8: memref<1x32xf32, #tpu.memory_space<vmem>>, %arg9: memref<1x32xf32, #tpu.memory_space<vmem>>, %arg10: memref<1x32xf32, #tpu.memory_space<vmem>>, %arg11: memref<32x128xbf16, #tpu.memory_space<vmem>>, %arg12: memref<1x128xf32, #tpu.memory_space<vmem>>, %arg13: memref<128x32xbf16, #tpu.memory_space<vmem>>, %arg14: memref<1x32xf32, #tpu.memory_space<vmem>>, %arg15: memref<1x32xf32, #tpu.memory_space<vmem>>, %arg16: memref<1x32xf32, #tpu.memory_space<vmem>>, %arg17: memref<1x8x32xf32, #tpu.memory_space<vmem>>) attributes {dimension_semantics = [#tpu.dimension_semantics<parallel>], iteration_bounds = array<i64: 2>, scalar_prefetch = 0 : i64, scratch_operands = 0 : i64, tpu.core_type = #tpu.core_type<tc>, window_params = [{transform_indices = @transform_0, window_bounds = array<i64: 1, 8, 32>}, {transform_indices = @transform_1, window_bounds = array<i64: 1, 8, 8>}, {pipeline_mode = #tpu.pipeline_mode<synchronous>, transform_indices = @transform_2, window_bounds = array<i64: 1, 32>}, {pipeline_mode = #tpu.pipeline_mode<synchronous>, transform_indices = @transform_3, window_bounds = array<i64: 1, 32>}, {pipeline_mode = #tpu.pipeline_mode<synchronous>, transform_indices = @transform_4, window_bounds = array<i64: 32, 96>}, {pipeline_mode = #tpu.pipeline_mode<synchronous>, transform_indices = @transform_5, window_bounds = array<i64: 1, 96>}, {pipeline_mode = #tpu.pipeline_mode<synchronous>, transform_indices = @transform_6, window_bounds = array<i64: 32, 32>}, {pipeline_mode = #tpu.pipeline_mode<synchronous>, transform_indices = @transform_7, window_bounds = array<i64: 1, 32>}, {pipeline_mode = #tpu.pipeline_mode<synchronous>, transform_indices = @transform_8, window_bounds = array<i64: 1, 32>}, {pipeline_mode = #tpu.pipeline_mode<synchronous>, transform_indices = @transform_9, window_bounds = array<i64: 1, 32>}, {pipeline_mode = #tpu.pipeline_mode<synchronous>, transform_indices = @transform_10, window_bounds = array<i64: 32, 128>}, {pipeline_mode = #tpu.pipeline_mode<synchronous>, transform_indices = @transform_11, window_bounds = array<i64: 1, 128>}, {pipeline_mode = #tpu.pipeline_mode<synchronous>, transform_indices = @transform_12, window_bounds = array<i64: 128, 32>}, {pipeline_mode = #tpu.pipeline_mode<synchronous>, transform_indices = @transform_13, window_bounds = array<i64: 1, 32>}, {pipeline_mode = #tpu.pipeline_mode<synchronous>, transform_indices = @transform_14, window_bounds = array<i64: 1, 32>}, {pipeline_mode = #tpu.pipeline_mode<synchronous>, transform_indices = @transform_15, window_bounds = array<i64: 1, 32>}, {transform_indices = @transform_16, window_bounds = array<i64: 1, 8, 32>}]} {
    %c0 = arith.constant 0 : index
    %c0_0 = arith.constant 0 : index
    %c0_1 = arith.constant 0 : index
    %0 = vector.load %arg1[%c0, %c0_0, %c0_1] : memref<1x8x32xf32, #tpu.memory_space<vmem>>, vector<1x8x32xf32>
    %1 = vector.shape_cast %0 : vector<1x8x32xf32> to vector<8x32xf32>
    %c0_2 = arith.constant 0 : index
    %c0_3 = arith.constant 0 : index
    %c0_4 = arith.constant 0 : index
    %2 = vector.load %arg2[%c0_2, %c0_3, %c0_4] : memref<1x8x8xf32, #tpu.memory_space<vmem>>, vector<1x8x8xf32>
    %3 = vector.shape_cast %2 : vector<1x8x8xf32> to vector<8x8xf32>
    %c0_5 = arith.constant 0 : index
    %c0_6 = arith.constant 0 : index
    %4 = vector.load %arg3[%c0_5, %c0_6] : memref<1x32xf32, #tpu.memory_space<vmem>>, vector<1x32xf32>
    %c0_7 = arith.constant 0 : index
    %c0_8 = arith.constant 0 : index
    %5 = vector.load %arg4[%c0_7, %c0_8] : memref<1x32xf32, #tpu.memory_space<vmem>>, vector<1x32xf32>
    %c0_9 = arith.constant 0 : index
    %c0_10 = arith.constant 0 : index
    %6 = vector.load %arg5[%c0_9, %c0_10] : memref<32x96xbf16, #tpu.memory_space<vmem>>, vector<32x96xbf16>
    %c0_11 = arith.constant 0 : index
    %c0_12 = arith.constant 0 : index
    %7 = vector.load %arg6[%c0_11, %c0_12] : memref<1x96xf32, #tpu.memory_space<vmem>>, vector<1x96xf32>
    %c0_13 = arith.constant 0 : index
    %c0_14 = arith.constant 0 : index
    %8 = vector.load %arg7[%c0_13, %c0_14] : memref<32x32xbf16, #tpu.memory_space<vmem>>, vector<32x32xbf16>
    %c0_15 = arith.constant 0 : index
    %c0_16 = arith.constant 0 : index
    %9 = vector.load %arg8[%c0_15, %c0_16] : memref<1x32xf32, #tpu.memory_space<vmem>>, vector<1x32xf32>
    %c0_17 = arith.constant 0 : index
    %c0_18 = arith.constant 0 : index
    %10 = vector.load %arg9[%c0_17, %c0_18] : memref<1x32xf32, #tpu.memory_space<vmem>>, vector<1x32xf32>
    %c0_19 = arith.constant 0 : index
    %c0_20 = arith.constant 0 : index
    %11 = vector.load %arg10[%c0_19, %c0_20] : memref<1x32xf32, #tpu.memory_space<vmem>>, vector<1x32xf32>
    %c0_21 = arith.constant 0 : index
    %c0_22 = arith.constant 0 : index
    %12 = vector.load %arg11[%c0_21, %c0_22] : memref<32x128xbf16, #tpu.memory_space<vmem>>, vector<32x128xbf16>
    %c0_23 = arith.constant 0 : index
    %c0_24 = arith.constant 0 : index
    %13 = vector.load %arg12[%c0_23, %c0_24] : memref<1x128xf32, #tpu.memory_space<vmem>>, vector<1x128xf32>
    %c0_25 = arith.constant 0 : index
    %c0_26 = arith.constant 0 : index
    %14 = vector.load %arg13[%c0_25, %c0_26] : memref<128x32xbf16, #tpu.memory_space<vmem>>, vector<128x32xbf16>
    %c0_27 = arith.constant 0 : index
    %c0_28 = arith.constant 0 : index
    %15 = vector.load %arg14[%c0_27, %c0_28] : memref<1x32xf32, #tpu.memory_space<vmem>>, vector<1x32xf32>
    %cst = arith.constant dense<0.000000e+00> : vector<8xf32>
    %16 = vector.multi_reduction <add>, %1, %cst [1] : vector<8x32xf32> to vector<8xf32>
    %17 = vector.shape_cast %16 : vector<8xf32> to vector<8x1xf32>
    %cst_29 = arith.constant 3.200000e+01 : f32
    %18 = vector.broadcast %cst_29 : f32 to vector<8x1xf32>
    %19 = arith.divf %17, %18 : vector<8x1xf32>
    %20 = vector.broadcast %19 : vector<8x1xf32> to vector<8x32xf32>
    %21 = arith.subf %1, %20 : vector<8x32xf32>
    %22 = arith.mulf %21, %21 : vector<8x32xf32>
    %cst_30 = arith.constant dense<0.000000e+00> : vector<8xf32>
    %23 = vector.multi_reduction <add>, %22, %cst_30 [1] : vector<8x32xf32> to vector<8xf32>
    %24 = vector.shape_cast %23 : vector<8xf32> to vector<8x1xf32>
    %cst_31 = arith.constant 3.100000e+01 : f32
    %25 = vector.broadcast %cst_31 : f32 to vector<8x1xf32>
    %26 = arith.divf %24, %25 : vector<8x1xf32>
    %27 = vector.broadcast %4 : vector<1x32xf32> to vector<8x32xf32>
    %28 = arith.mulf %27, %21 : vector<8x32xf32>
    %29 = math.sqrt %26 : vector<8x1xf32>
    %cst_32 = arith.constant 9.99999997E-7 : f32
    %30 = vector.broadcast %cst_32 : f32 to vector<8x1xf32>
    %31 = arith.addf %29, %30 : vector<8x1xf32>
    %32 = vector.broadcast %31 : vector<8x1xf32> to vector<8x32xf32>
    %33 = arith.divf %28, %32 : vector<8x32xf32>
    %34 = vector.broadcast %5 : vector<1x32xf32> to vector<8x32xf32>
    %35 = arith.addf %33, %34 : vector<8x32xf32>
    %36 = arith.truncf %35 : vector<8x32xf32> to vector<8x32xbf16>
    %cst_33 = arith.constant dense<0.000000e+00> : vector<8x96xf32>
    %37 = tpu.matmul %36, %6, %cst_33 {dimension_numbers = #tpu.dot_dimension_numbers<[1], [0], [0], [1], [0, 0, 1, 1], [], []>} : vector<8x32xbf16>, vector<32x96xbf16>, vector<8x96xf32> -> vector<8x96xf32>
    %38 = vector.broadcast %7 : vector<1x96xf32> to vector<8x96xf32>
    %39 = arith.addf %37, %38 : vector<8x96xf32>
    %40 = vector.extract_strided_slice %39 {offsets = [0, 0], sizes = [8, 32], strides = [1, 1]} : vector<8x96xf32> to vector<8x32xf32>
    %41 = vector.extract_strided_slice %39 {offsets = [0, 32], sizes = [8, 32], strides = [1, 1]} : vector<8x96xf32> to vector<8x32xf32>
    %42 = vector.extract_strided_slice %39 {offsets = [0, 64], sizes = [8, 32], strides = [1, 1]} : vector<8x96xf32> to vector<8x32xf32>
    %43 = vector.extract_strided_slice %40 {offsets = [0, 0], sizes = [8, 8], strides = [1, 1]} : vector<8x32xf32> to vector<8x8xf32>
    %44 = vector.extract_strided_slice %41 {offsets = [0, 0], sizes = [8, 8], strides = [1, 1]} : vector<8x32xf32> to vector<8x8xf32>
    %45 = arith.truncf %43 : vector<8x8xf32> to vector<8x8xbf16>
    %46 = arith.truncf %44 : vector<8x8xf32> to vector<8x8xbf16>
    %cst_34 = arith.constant dense<0.000000e+00> : vector<8x8xf32>
    %47 = tpu.matmul %45, %46, %cst_34 {dimension_numbers = #tpu.dot_dimension_numbers<[1], [1], [0], [0], [0, 0, 1, 0], [], []>} : vector<8x8xbf16>, vector<8x8xbf16>, vector<8x8xf32> -> vector<8x8xf32>
    %cst_35 = arith.constant 0.353553385 : f32
    %48 = vector.broadcast %cst_35 : f32 to vector<8x8xf32>
    %49 = arith.mulf %47, %48 : vector<8x8xf32>
    %50 = arith.addf %49, %3 : vector<8x8xf32>
    %cst_36 = arith.constant dense<0xFF800000> : vector<8xf32>
    %51 = vector.multi_reduction <maximumf>, %50, %cst_36 [1] : vector<8x8xf32> to vector<8xf32>
    %52 = vector.shape_cast %51 : vector<8xf32> to vector<8x1xf32>
    %53 = vector.broadcast %52 : vector<8x1xf32> to vector<8x8xf32>
    %54 = arith.subf %50, %53 : vector<8x8xf32>
    %55 = math.exp %54 : vector<8x8xf32>
    %cst_37 = arith.constant dense<0.000000e+00> : vector<8xf32>
    %56 = vector.multi_reduction <add>, %55, %cst_37 [1] : vector<8x8xf32> to vector<8xf32>
    %57 = vector.shape_cast %56 : vector<8xf32> to vector<8x1xf32>
    %58 = tpu.reciprocal %57 {approx = true} : vector<8x1xf32> -> vector<8x1xf32>
    %59 = vector.broadcast %58 : vector<8x1xf32> to vector<8x8xf32>
    %60 = arith.mulf %55, %59 : vector<8x8xf32>
    %61 = vector.extract_strided_slice %42 {offsets = [0, 0], sizes = [8, 8], strides = [1, 1]} : vector<8x32xf32> to vector<8x8xf32>
    %62 = arith.truncf %60 : vector<8x8xf32> to vector<8x8xbf16>
    %63 = arith.truncf %61 : vector<8x8xf32> to vector<8x8xbf16>
    %cst_38 = arith.constant dense<0.000000e+00> : vector<8x8xf32>
    %64 = tpu.matmul %62, %63, %cst_38 {dimension_numbers = #tpu.dot_dimension_numbers<[1], [0], [0], [1], [0, 0, 1, 1], [], []>} : vector<8x8xbf16>, vector<8x8xbf16>, vector<8x8xf32> -> vector<8x8xf32>
    %65 = vector.extract_strided_slice %40 {offsets = [0, 8], sizes = [8, 8], strides = [1, 1]} : vector<8x32xf32> to vector<8x8xf32>
    %66 = vector.extract_strided_slice %41 {offsets = [0, 8], sizes = [8, 8], strides = [1, 1]} : vector<8x32xf32> to vector<8x8xf32>
    %67 = arith.truncf %65 : vector<8x8xf32> to vector<8x8xbf16>
    %68 = arith.truncf %66 : vector<8x8xf32> to vector<8x8xbf16>
    %cst_39 = arith.constant dense<0.000000e+00> : vector<8x8xf32>
    %69 = tpu.matmul %67, %68, %cst_39 {dimension_numbers = #tpu.dot_dimension_numbers<[1], [1], [0], [0], [0, 0, 1, 0], [], []>} : vector<8x8xbf16>, vector<8x8xbf16>, vector<8x8xf32> -> vector<8x8xf32>
    %cst_40 = arith.constant 0.353553385 : f32
    %70 = vector.broadcast %cst_40 : f32 to vector<8x8xf32>
    %71 = arith.mulf %69, %70 : vector<8x8xf32>
    %72 = arith.addf %71, %3 : vector<8x8xf32>
    %cst_41 = arith.constant dense<0xFF800000> : vector<8xf32>
    %73 = vector.multi_reduction <maximumf>, %72, %cst_41 [1] : vector<8x8xf32> to vector<8xf32>
    %74 = vector.shape_cast %73 : vector<8xf32> to vector<8x1xf32>
    %75 = vector.broadcast %74 : vector<8x1xf32> to vector<8x8xf32>
    %76 = arith.subf %72, %75 : vector<8x8xf32>
    %77 = math.exp %76 : vector<8x8xf32>
    %cst_42 = arith.constant dense<0.000000e+00> : vector<8xf32>
    %78 = vector.multi_reduction <add>, %77, %cst_42 [1] : vector<8x8xf32> to vector<8xf32>
    %79 = vector.shape_cast %78 : vector<8xf32> to vector<8x1xf32>
    %80 = tpu.reciprocal %79 {approx = true} : vector<8x1xf32> -> vector<8x1xf32>
    %81 = vector.broadcast %80 : vector<8x1xf32> to vector<8x8xf32>
    %82 = arith.mulf %77, %81 : vector<8x8xf32>
    %83 = vector.extract_strided_slice %42 {offsets = [0, 8], sizes = [8, 8], strides = [1, 1]} : vector<8x32xf32> to vector<8x8xf32>
    %84 = arith.truncf %82 : vector<8x8xf32> to vector<8x8xbf16>
    %85 = arith.truncf %83 : vector<8x8xf32> to vector<8x8xbf16>
    %cst_43 = arith.constant dense<0.000000e+00> : vector<8x8xf32>
    %86 = tpu.matmul %84, %85, %cst_43 {dimension_numbers = #tpu.dot_dimension_numbers<[1], [0], [0], [1], [0, 0, 1, 1], [], []>} : vector<8x8xbf16>, vector<8x8xbf16>, vector<8x8xf32> -> vector<8x8xf32>
    %87 = vector.extract_strided_slice %40 {offsets = [0, 16], sizes = [8, 8], strides = [1, 1]} : vector<8x32xf32> to vector<8x8xf32>
    %88 = vector.extract_strided_slice %41 {offsets = [0, 16], sizes = [8, 8], strides = [1, 1]} : vector<8x32xf32> to vector<8x8xf32>
    %89 = arith.truncf %87 : vector<8x8xf32> to vector<8x8xbf16>
    %90 = arith.truncf %88 : vector<8x8xf32> to vector<8x8xbf16>
    %cst_44 = arith.constant dense<0.000000e+00> : vector<8x8xf32>
    %91 = tpu.matmul %89, %90, %cst_44 {dimension_numbers = #tpu.dot_dimension_numbers<[1], [1], [0], [0], [0, 0, 1, 0], [], []>} : vector<8x8xbf16>, vector<8x8xbf16>, vector<8x8xf32> -> vector<8x8xf32>
    %cst_45 = arith.constant 0.353553385 : f32
    %92 = vector.broadcast %cst_45 : f32 to vector<8x8xf32>
    %93 = arith.mulf %91, %92 : vector<8x8xf32>
    %94 = arith.addf %93, %3 : vector<8x8xf32>
    %cst_46 = arith.constant dense<0xFF800000> : vector<8xf32>
    %95 = vector.multi_reduction <maximumf>, %94, %cst_46 [1] : vector<8x8xf32> to vector<8xf32>
    %96 = vector.shape_cast %95 : vector<8xf32> to vector<8x1xf32>
    %97 = vector.broadcast %96 : vector<8x1xf32> to vector<8x8xf32>
    %98 = arith.subf %94, %97 : vector<8x8xf32>
    %99 = math.exp %98 : vector<8x8xf32>
    %cst_47 = arith.constant dense<0.000000e+00> : vector<8xf32>
    %100 = vector.multi_reduction <add>, %99, %cst_47 [1] : vector<8x8xf32> to vector<8xf32>
    %101 = vector.shape_cast %100 : vector<8xf32> to vector<8x1xf32>
    %102 = tpu.reciprocal %101 {approx = true} : vector<8x1xf32> -> vector<8x1xf32>
    %103 = vector.broadcast %102 : vector<8x1xf32> to vector<8x8xf32>
    %104 = arith.mulf %99, %103 : vector<8x8xf32>
    %105 = vector.extract_strided_slice %42 {offsets = [0, 16], sizes = [8, 8], strides = [1, 1]} : vector<8x32xf32> to vector<8x8xf32>
    %106 = arith.truncf %104 : vector<8x8xf32> to vector<8x8xbf16>
    %107 = arith.truncf %105 : vector<8x8xf32> to vector<8x8xbf16>
    %cst_48 = arith.constant dense<0.000000e+00> : vector<8x8xf32>
    %108 = tpu.matmul %106, %107, %cst_48 {dimension_numbers = #tpu.dot_dimension_numbers<[1], [0], [0], [1], [0, 0, 1, 1], [], []>} : vector<8x8xbf16>, vector<8x8xbf16>, vector<8x8xf32> -> vector<8x8xf32>
    %109 = vector.extract_strided_slice %40 {offsets = [0, 24], sizes = [8, 8], strides = [1, 1]} : vector<8x32xf32> to vector<8x8xf32>
    %110 = vector.extract_strided_slice %41 {offsets = [0, 24], sizes = [8, 8], strides = [1, 1]} : vector<8x32xf32> to vector<8x8xf32>
    %111 = arith.truncf %109 : vector<8x8xf32> to vector<8x8xbf16>
    %112 = arith.truncf %110 : vector<8x8xf32> to vector<8x8xbf16>
    %cst_49 = arith.constant dense<0.000000e+00> : vector<8x8xf32>
    %113 = tpu.matmul %111, %112, %cst_49 {dimension_numbers = #tpu.dot_dimension_numbers<[1], [1], [0], [0], [0, 0, 1, 0], [], []>} : vector<8x8xbf16>, vector<8x8xbf16>, vector<8x8xf32> -> vector<8x8xf32>
    %cst_50 = arith.constant 0.353553385 : f32
    %114 = vector.broadcast %cst_50 : f32 to vector<8x8xf32>
    %115 = arith.mulf %113, %114 : vector<8x8xf32>
    %116 = arith.addf %115, %3 : vector<8x8xf32>
    %cst_51 = arith.constant dense<0xFF800000> : vector<8xf32>
    %117 = vector.multi_reduction <maximumf>, %116, %cst_51 [1] : vector<8x8xf32> to vector<8xf32>
    %118 = vector.shape_cast %117 : vector<8xf32> to vector<8x1xf32>
    %119 = vector.broadcast %118 : vector<8x1xf32> to vector<8x8xf32>
    %120 = arith.subf %116, %119 : vector<8x8xf32>
    %121 = math.exp %120 : vector<8x8xf32>
    %cst_52 = arith.constant dense<0.000000e+00> : vector<8xf32>
    %122 = vector.multi_reduction <add>, %121, %cst_52 [1] : vector<8x8xf32> to vector<8xf32>
    %123 = vector.shape_cast %122 : vector<8xf32> to vector<8x1xf32>
    %124 = tpu.reciprocal %123 {approx = true} : vector<8x1xf32> -> vector<8x1xf32>
    %125 = vector.broadcast %124 : vector<8x1xf32> to vector<8x8xf32>
    %126 = arith.mulf %121, %125 : vector<8x8xf32>
    %127 = vector.extract_strided_slice %42 {offsets = [0, 24], sizes = [8, 8], strides = [1, 1]} : vector<8x32xf32> to vector<8x8xf32>
    %128 = arith.truncf %126 : vector<8x8xf32> to vector<8x8xbf16>
    %129 = arith.truncf %127 : vector<8x8xf32> to vector<8x8xbf16>
    %cst_53 = arith.constant dense<0.000000e+00> : vector<8x8xf32>
    %130 = tpu.matmul %128, %129, %cst_53 {dimension_numbers = #tpu.dot_dimension_numbers<[1], [0], [0], [1], [0, 0, 1, 1], [], []>} : vector<8x8xbf16>, vector<8x8xbf16>, vector<8x8xf32> -> vector<8x8xf32>
    %131 = tpu.concatenate %64, %86, %108, %130 in 1 : vector<8x8xf32>, vector<8x8xf32>, vector<8x8xf32>, vector<8x8xf32> -> vector<8x32xf32>
    %132 = arith.truncf %131 : vector<8x32xf32> to vector<8x32xbf16>
    %cst_54 = arith.constant dense<0.000000e+00> : vector<8x32xf32>
    %133 = tpu.matmul %132, %8, %cst_54 {dimension_numbers = #tpu.dot_dimension_numbers<[1], [0], [0], [1], [0, 0, 1, 1], [], []>} : vector<8x32xbf16>, vector<32x32xbf16>, vector<8x32xf32> -> vector<8x32xf32>
    %134 = arith.addf %1, %133 : vector<8x32xf32>
    %135 = vector.broadcast %9 : vector<1x32xf32> to vector<8x32xf32>
    %136 = arith.addf %134, %135 : vector<8x32xf32>
    %cst_55 = arith.constant dense<0.000000e+00> : vector<8xf32>
    %137 = vector.multi_reduction <add>, %136, %cst_55 [1] : vector<8x32xf32> to vector<8xf32>
    %138 = vector.shape_cast %137 : vector<8xf32> to vector<8x1xf32>
    %cst_56 = arith.constant 3.200000e+01 : f32
    %139 = vector.broadcast %cst_56 : f32 to vector<8x1xf32>
    %140 = arith.divf %138, %139 : vector<8x1xf32>
    %141 = vector.broadcast %140 : vector<8x1xf32> to vector<8x32xf32>
    %142 = arith.subf %136, %141 : vector<8x32xf32>
    %143 = arith.mulf %142, %142 : vector<8x32xf32>
    %cst_57 = arith.constant dense<0.000000e+00> : vector<8xf32>
    %144 = vector.multi_reduction <add>, %143, %cst_57 [1] : vector<8x32xf32> to vector<8xf32>
    %145 = vector.shape_cast %144 : vector<8xf32> to vector<8x1xf32>
    %cst_58 = arith.constant 3.100000e+01 : f32
    %146 = vector.broadcast %cst_58 : f32 to vector<8x1xf32>
    %147 = arith.divf %145, %146 : vector<8x1xf32>
    %148 = vector.broadcast %10 : vector<1x32xf32> to vector<8x32xf32>
    %149 = arith.mulf %148, %142 : vector<8x32xf32>
    %150 = math.sqrt %147 : vector<8x1xf32>
    %cst_59 = arith.constant 9.99999997E-7 : f32
    %151 = vector.broadcast %cst_59 : f32 to vector<8x1xf32>
    %152 = arith.addf %150, %151 : vector<8x1xf32>
    %153 = vector.broadcast %152 : vector<8x1xf32> to vector<8x32xf32>
    %154 = arith.divf %149, %153 : vector<8x32xf32>
    %155 = vector.broadcast %11 : vector<1x32xf32> to vector<8x32xf32>
    %156 = arith.addf %154, %155 : vector<8x32xf32>
    %157 = arith.truncf %156 : vector<8x32xf32> to vector<8x32xbf16>
    %cst_60 = arith.constant dense<0.000000e+00> : vector<8x128xf32>
    %158 = tpu.matmul %157, %12, %cst_60 {dimension_numbers = #tpu.dot_dimension_numbers<[1], [0], [0], [1], [0, 0, 1, 1], [], []>} : vector<8x32xbf16>, vector<32x128xbf16>, vector<8x128xf32> -> vector<8x128xf32>
    %159 = vector.broadcast %13 : vector<1x128xf32> to vector<8x128xf32>
    %160 = arith.addf %158, %159 : vector<8x128xf32>
    %cst_61 = arith.constant 0.000000e+00 : f32
    %161 = vector.broadcast %cst_61 : f32 to vector<8x128xf32>
    %162 = arith.maximumf %160, %161 : vector<8x128xf32>
    %163 = arith.truncf %162 : vector<8x128xf32> to vector<8x128xbf16>
    %cst_62 = arith.constant dense<0.000000e+00> : vector<8x32xf32>
    %164 = tpu.matmul %163, %14, %cst_62 {dimension_numbers = #tpu.dot_dimension_numbers<[1], [0], [0], [1], [0, 0, 1, 1], [], []>} : vector<8x128xbf16>, vector<128x32xbf16>, vector<8x32xf32> -> vector<8x32xf32>
    %165 = arith.addf %136, %164 : vector<8x32xf32>
    %166 = vector.broadcast %15 : vector<1x32xf32> to vector<8x32xf32>
    %167 = arith.addf %165, %166 : vector<8x32xf32>
    %cst_63 = arith.constant dense<0.000000e+00> : vector<8xf32>
    %168 = vector.multi_reduction <add>, %167, %cst_63 [1] : vector<8x32xf32> to vector<8xf32>
    %169 = vector.shape_cast %168 : vector<8xf32> to vector<8x1xf32>
    %cst_64 = arith.constant 3.200000e+01 : f32
    %170 = vector.broadcast %cst_64 : f32 to vector<8x1xf32>
    %171 = arith.divf %169, %170 : vector<8x1xf32>
    %172 = vector.broadcast %171 : vector<8x1xf32> to vector<8x32xf32>
    %173 = arith.subf %167, %172 : vector<8x32xf32>
    %174 = arith.mulf %173, %173 : vector<8x32xf32>
    %cst_65 = arith.constant dense<0.000000e+00> : vector<8xf32>
    %175 = vector.multi_reduction <add>, %174, %cst_65 [1] : vector<8x32xf32> to vector<8xf32>
    %176 = vector.shape_cast %175 : vector<8xf32> to vector<8x1xf32>
    %cst_66 = arith.constant 3.100000e+01 : f32
    %177 = vector.broadcast %cst_66 : f32 to vector<8x1xf32>
    %178 = arith.divf %176, %177 : vector<8x1xf32>
    %179 = vector.broadcast %4 : vector<1x32xf32> to vector<8x32xf32>
    %180 = arith.mulf %179, %173 : vector<8x32xf32>
    %181 = math.sqrt %178 : vector<8x1xf32>
    %cst_67 = arith.constant 9.99999997E-7 : f32
    %182 = vector.broadcast %cst_67 : f32 to vector<8x1xf32>
    %183 = arith.addf %181, %182 : vector<8x1xf32>
    %184 = vector.broadcast %183 : vector<8x1xf32> to vector<8x32xf32>
    %185 = arith.divf %180, %184 : vector<8x32xf32>
    %186 = vector.broadcast %5 : vector<1x32xf32> to vector<8x32xf32>
    %187 = arith.addf %185, %186 : vector<8x32xf32>
    %188 = arith.truncf %187 : vector<8x32xf32> to vector<8x32xbf16>
    %cst_68 = arith.constant dense<0.000000e+00> : vector<8x96xf32>
    %189 = tpu.matmul %188, %6, %cst_68 {dimension_numbers = #tpu.dot_dimension_numbers<[1], [0], [0], [1], [0, 0, 1, 1], [], []>} : vector<8x32xbf16>, vector<32x96xbf16>, vector<8x96xf32> -> vector<8x96xf32>
    %190 = vector.broadcast %7 : vector<1x96xf32> to vector<8x96xf32>
    %191 = arith.addf %189, %190 : vector<8x96xf32>
    %192 = vector.extract_strided_slice %191 {offsets = [0, 0], sizes = [8, 32], strides = [1, 1]} : vector<8x96xf32> to vector<8x32xf32>
    %193 = vector.extract_strided_slice %191 {offsets = [0, 32], sizes = [8, 32], strides = [1, 1]} : vector<8x96xf32> to vector<8x32xf32>
    %194 = vector.extract_strided_slice %191 {offsets = [0, 64], sizes = [8, 32], strides = [1, 1]} : vector<8x96xf32> to vector<8x32xf32>
    %195 = vector.extract_strided_slice %192 {offsets = [0, 0], sizes = [8, 8], strides = [1, 1]} : vector<8x32xf32> to vector<8x8xf32>
    %196 = vector.extract_strided_slice %193 {offsets = [0, 0], sizes = [8, 8], strides = [1, 1]} : vector<8x32xf32> to vector<8x8xf32>
    %197 = arith.truncf %195 : vector<8x8xf32> to vector<8x8xbf16>
    %198 = arith.truncf %196 : vector<8x8xf32> to vector<8x8xbf16>
    %cst_69 = arith.constant dense<0.000000e+00> : vector<8x8xf32>
    %199 = tpu.matmul %197, %198, %cst_69 {dimension_numbers = #tpu.dot_dimension_numbers<[1], [1], [0], [0], [0, 0, 1, 0], [], []>} : vector<8x8xbf16>, vector<8x8xbf16>, vector<8x8xf32> -> vector<8x8xf32>
    %cst_70 = arith.constant 0.353553385 : f32
    %200 = vector.broadcast %cst_70 : f32 to vector<8x8xf32>
    %201 = arith.mulf %199, %200 : vector<8x8xf32>
    %202 = arith.addf %201, %3 : vector<8x8xf32>
    %cst_71 = arith.constant dense<0xFF800000> : vector<8xf32>
    %203 = vector.multi_reduction <maximumf>, %202, %cst_71 [1] : vector<8x8xf32> to vector<8xf32>
    %204 = vector.shape_cast %203 : vector<8xf32> to vector<8x1xf32>
    %205 = vector.broadcast %204 : vector<8x1xf32> to vector<8x8xf32>
    %206 = arith.subf %202, %205 : vector<8x8xf32>
    %207 = math.exp %206 : vector<8x8xf32>
    %cst_72 = arith.constant dense<0.000000e+00> : vector<8xf32>
    %208 = vector.multi_reduction <add>, %207, %cst_72 [1] : vector<8x8xf32> to vector<8xf32>
    %209 = vector.shape_cast %208 : vector<8xf32> to vector<8x1xf32>
    %210 = tpu.reciprocal %209 {approx = true} : vector<8x1xf32> -> vector<8x1xf32>
    %211 = vector.broadcast %210 : vector<8x1xf32> to vector<8x8xf32>
    %212 = arith.mulf %207, %211 : vector<8x8xf32>
    %213 = vector.extract_strided_slice %194 {offsets = [0, 0], sizes = [8, 8], strides = [1, 1]} : vector<8x32xf32> to vector<8x8xf32>
    %214 = arith.truncf %212 : vector<8x8xf32> to vector<8x8xbf16>
    %215 = arith.truncf %213 : vector<8x8xf32> to vector<8x8xbf16>
    %cst_73 = arith.constant dense<0.000000e+00> : vector<8x8xf32>
    %216 = tpu.matmul %214, %215, %cst_73 {dimension_numbers = #tpu.dot_dimension_numbers<[1], [0], [0], [1], [0, 0, 1, 1], [], []>} : vector<8x8xbf16>, vector<8x8xbf16>, vector<8x8xf32> -> vector<8x8xf32>
    %217 = vector.extract_strided_slice %192 {offsets = [0, 8], sizes = [8, 8], strides = [1, 1]} : vector<8x32xf32> to vector<8x8xf32>
    %218 = vector.extract_strided_slice %193 {offsets = [0, 8], sizes = [8, 8], strides = [1, 1]} : vector<8x32xf32> to vector<8x8xf32>
    %219 = arith.truncf %217 : vector<8x8xf32> to vector<8x8xbf16>
    %220 = arith.truncf %218 : vector<8x8xf32> to vector<8x8xbf16>
    %cst_74 = arith.constant dense<0.000000e+00> : vector<8x8xf32>
    %221 = tpu.matmul %219, %220, %cst_74 {dimension_numbers = #tpu.dot_dimension_numbers<[1], [1], [0], [0], [0, 0, 1, 0], [], []>} : vector<8x8xbf16>, vector<8x8xbf16>, vector<8x8xf32> -> vector<8x8xf32>
    %cst_75 = arith.constant 0.353553385 : f32
    %222 = vector.broadcast %cst_75 : f32 to vector<8x8xf32>
    %223 = arith.mulf %221, %222 : vector<8x8xf32>
    %224 = arith.addf %223, %3 : vector<8x8xf32>
    %cst_76 = arith.constant dense<0xFF800000> : vector<8xf32>
    %225 = vector.multi_reduction <maximumf>, %224, %cst_76 [1] : vector<8x8xf32> to vector<8xf32>
    %226 = vector.shape_cast %225 : vector<8xf32> to vector<8x1xf32>
    %227 = vector.broadcast %226 : vector<8x1xf32> to vector<8x8xf32>
    %228 = arith.subf %224, %227 : vector<8x8xf32>
    %229 = math.exp %228 : vector<8x8xf32>
    %cst_77 = arith.constant dense<0.000000e+00> : vector<8xf32>
    %230 = vector.multi_reduction <add>, %229, %cst_77 [1] : vector<8x8xf32> to vector<8xf32>
    %231 = vector.shape_cast %230 : vector<8xf32> to vector<8x1xf32>
    %232 = tpu.reciprocal %231 {approx = true} : vector<8x1xf32> -> vector<8x1xf32>
    %233 = vector.broadcast %232 : vector<8x1xf32> to vector<8x8xf32>
    %234 = arith.mulf %229, %233 : vector<8x8xf32>
    %235 = vector.extract_strided_slice %194 {offsets = [0, 8], sizes = [8, 8], strides = [1, 1]} : vector<8x32xf32> to vector<8x8xf32>
    %236 = arith.truncf %234 : vector<8x8xf32> to vector<8x8xbf16>
    %237 = arith.truncf %235 : vector<8x8xf32> to vector<8x8xbf16>
    %cst_78 = arith.constant dense<0.000000e+00> : vector<8x8xf32>
    %238 = tpu.matmul %236, %237, %cst_78 {dimension_numbers = #tpu.dot_dimension_numbers<[1], [0], [0], [1], [0, 0, 1, 1], [], []>} : vector<8x8xbf16>, vector<8x8xbf16>, vector<8x8xf32> -> vector<8x8xf32>
    %239 = vector.extract_strided_slice %192 {offsets = [0, 16], sizes = [8, 8], strides = [1, 1]} : vector<8x32xf32> to vector<8x8xf32>
    %240 = vector.extract_strided_slice %193 {offsets = [0, 16], sizes = [8, 8], strides = [1, 1]} : vector<8x32xf32> to vector<8x8xf32>
    %241 = arith.truncf %239 : vector<8x8xf32> to vector<8x8xbf16>
    %242 = arith.truncf %240 : vector<8x8xf32> to vector<8x8xbf16>
    %cst_79 = arith.constant dense<0.000000e+00> : vector<8x8xf32>
    %243 = tpu.matmul %241, %242, %cst_79 {dimension_numbers = #tpu.dot_dimension_numbers<[1], [1], [0], [0], [0, 0, 1, 0], [], []>} : vector<8x8xbf16>, vector<8x8xbf16>, vector<8x8xf32> -> vector<8x8xf32>
    %cst_80 = arith.constant 0.353553385 : f32
    %244 = vector.broadcast %cst_80 : f32 to vector<8x8xf32>
    %245 = arith.mulf %243, %244 : vector<8x8xf32>
    %246 = arith.addf %245, %3 : vector<8x8xf32>
    %cst_81 = arith.constant dense<0xFF800000> : vector<8xf32>
    %247 = vector.multi_reduction <maximumf>, %246, %cst_81 [1] : vector<8x8xf32> to vector<8xf32>
    %248 = vector.shape_cast %247 : vector<8xf32> to vector<8x1xf32>
    %249 = vector.broadcast %248 : vector<8x1xf32> to vector<8x8xf32>
    %250 = arith.subf %246, %249 : vector<8x8xf32>
    %251 = math.exp %250 : vector<8x8xf32>
    %cst_82 = arith.constant dense<0.000000e+00> : vector<8xf32>
    %252 = vector.multi_reduction <add>, %251, %cst_82 [1] : vector<8x8xf32> to vector<8xf32>
    %253 = vector.shape_cast %252 : vector<8xf32> to vector<8x1xf32>
    %254 = tpu.reciprocal %253 {approx = true} : vector<8x1xf32> -> vector<8x1xf32>
    %255 = vector.broadcast %254 : vector<8x1xf32> to vector<8x8xf32>
    %256 = arith.mulf %251, %255 : vector<8x8xf32>
    %257 = vector.extract_strided_slice %194 {offsets = [0, 16], sizes = [8, 8], strides = [1, 1]} : vector<8x32xf32> to vector<8x8xf32>
    %258 = arith.truncf %256 : vector<8x8xf32> to vector<8x8xbf16>
    %259 = arith.truncf %257 : vector<8x8xf32> to vector<8x8xbf16>
    %cst_83 = arith.constant dense<0.000000e+00> : vector<8x8xf32>
    %260 = tpu.matmul %258, %259, %cst_83 {dimension_numbers = #tpu.dot_dimension_numbers<[1], [0], [0], [1], [0, 0, 1, 1], [], []>} : vector<8x8xbf16>, vector<8x8xbf16>, vector<8x8xf32> -> vector<8x8xf32>
    %261 = vector.extract_strided_slice %192 {offsets = [0, 24], sizes = [8, 8], strides = [1, 1]} : vector<8x32xf32> to vector<8x8xf32>
    %262 = vector.extract_strided_slice %193 {offsets = [0, 24], sizes = [8, 8], strides = [1, 1]} : vector<8x32xf32> to vector<8x8xf32>
    %263 = arith.truncf %261 : vector<8x8xf32> to vector<8x8xbf16>
    %264 = arith.truncf %262 : vector<8x8xf32> to vector<8x8xbf16>
    %cst_84 = arith.constant dense<0.000000e+00> : vector<8x8xf32>
    %265 = tpu.matmul %263, %264, %cst_84 {dimension_numbers = #tpu.dot_dimension_numbers<[1], [1], [0], [0], [0, 0, 1, 0], [], []>} : vector<8x8xbf16>, vector<8x8xbf16>, vector<8x8xf32> -> vector<8x8xf32>
    %cst_85 = arith.constant 0.353553385 : f32
    %266 = vector.broadcast %cst_85 : f32 to vector<8x8xf32>
    %267 = arith.mulf %265, %266 : vector<8x8xf32>
    %268 = arith.addf %267, %3 : vector<8x8xf32>
    %cst_86 = arith.constant dense<0xFF800000> : vector<8xf32>
    %269 = vector.multi_reduction <maximumf>, %268, %cst_86 [1] : vector<8x8xf32> to vector<8xf32>
    %270 = vector.shape_cast %269 : vector<8xf32> to vector<8x1xf32>
    %271 = vector.broadcast %270 : vector<8x1xf32> to vector<8x8xf32>
    %272 = arith.subf %268, %271 : vector<8x8xf32>
    %273 = math.exp %272 : vector<8x8xf32>
    %cst_87 = arith.constant dense<0.000000e+00> : vector<8xf32>
    %274 = vector.multi_reduction <add>, %273, %cst_87 [1] : vector<8x8xf32> to vector<8xf32>
    %275 = vector.shape_cast %274 : vector<8xf32> to vector<8x1xf32>
    %276 = tpu.reciprocal %275 {approx = true} : vector<8x1xf32> -> vector<8x1xf32>
    %277 = vector.broadcast %276 : vector<8x1xf32> to vector<8x8xf32>
    %278 = arith.mulf %273, %277 : vector<8x8xf32>
    %279 = vector.extract_strided_slice %194 {offsets = [0, 24], sizes = [8, 8], strides = [1, 1]} : vector<8x32xf32> to vector<8x8xf32>
    %280 = arith.truncf %278 : vector<8x8xf32> to vector<8x8xbf16>
    %281 = arith.truncf %279 : vector<8x8xf32> to vector<8x8xbf16>
    %cst_88 = arith.constant dense<0.000000e+00> : vector<8x8xf32>
    %282 = tpu.matmul %280, %281, %cst_88 {dimension_numbers = #tpu.dot_dimension_numbers<[1], [0], [0], [1], [0, 0, 1, 1], [], []>} : vector<8x8xbf16>, vector<8x8xbf16>, vector<8x8xf32> -> vector<8x8xf32>
    %283 = tpu.concatenate %216, %238, %260, %282 in 1 : vector<8x8xf32>, vector<8x8xf32>, vector<8x8xf32>, vector<8x8xf32> -> vector<8x32xf32>
    %284 = arith.truncf %283 : vector<8x32xf32> to vector<8x32xbf16>
    %cst_89 = arith.constant dense<0.000000e+00> : vector<8x32xf32>
    %285 = tpu.matmul %284, %8, %cst_89 {dimension_numbers = #tpu.dot_dimension_numbers<[1], [0], [0], [1], [0, 0, 1, 1], [], []>} : vector<8x32xbf16>, vector<32x32xbf16>, vector<8x32xf32> -> vector<8x32xf32>
    %286 = arith.addf %167, %285 : vector<8x32xf32>
    %287 = vector.broadcast %9 : vector<1x32xf32> to vector<8x32xf32>
    %288 = arith.addf %286, %287 : vector<8x32xf32>
    %cst_90 = arith.constant dense<0.000000e+00> : vector<8xf32>
    %289 = vector.multi_reduction <add>, %288, %cst_90 [1] : vector<8x32xf32> to vector<8xf32>
    %290 = vector.shape_cast %289 : vector<8xf32> to vector<8x1xf32>
    %cst_91 = arith.constant 3.200000e+01 : f32
    %291 = vector.broadcast %cst_91 : f32 to vector<8x1xf32>
    %292 = arith.divf %290, %291 : vector<8x1xf32>
    %293 = vector.broadcast %292 : vector<8x1xf32> to vector<8x32xf32>
    %294 = arith.subf %288, %293 : vector<8x32xf32>
    %295 = arith.mulf %294, %294 : vector<8x32xf32>
    %cst_92 = arith.constant dense<0.000000e+00> : vector<8xf32>
    %296 = vector.multi_reduction <add>, %295, %cst_92 [1] : vector<8x32xf32> to vector<8xf32>
    %297 = vector.shape_cast %296 : vector<8xf32> to vector<8x1xf32>
    %cst_93 = arith.constant 3.100000e+01 : f32
    %298 = vector.broadcast %cst_93 : f32 to vector<8x1xf32>
    %299 = arith.divf %297, %298 : vector<8x1xf32>
    %300 = vector.broadcast %10 : vector<1x32xf32> to vector<8x32xf32>
    %301 = arith.mulf %300, %294 : vector<8x32xf32>
    %302 = math.sqrt %299 : vector<8x1xf32>
    %cst_94 = arith.constant 9.99999997E-7 : f32
    %303 = vector.broadcast %cst_94 : f32 to vector<8x1xf32>
    %304 = arith.addf %302, %303 : vector<8x1xf32>
    %305 = vector.broadcast %304 : vector<8x1xf32> to vector<8x32xf32>
    %306 = arith.divf %301, %305 : vector<8x32xf32>
    %307 = vector.broadcast %11 : vector<1x32xf32> to vector<8x32xf32>
    %308 = arith.addf %306, %307 : vector<8x32xf32>
    %309 = arith.truncf %308 : vector<8x32xf32> to vector<8x32xbf16>
    %cst_95 = arith.constant dense<0.000000e+00> : vector<8x128xf32>
    %310 = tpu.matmul %309, %12, %cst_95 {dimension_numbers = #tpu.dot_dimension_numbers<[1], [0], [0], [1], [0, 0, 1, 1], [], []>} : vector<8x32xbf16>, vector<32x128xbf16>, vector<8x128xf32> -> vector<8x128xf32>
    %311 = vector.broadcast %13 : vector<1x128xf32> to vector<8x128xf32>
    %312 = arith.addf %310, %311 : vector<8x128xf32>
    %cst_96 = arith.constant 0.000000e+00 : f32
    %313 = vector.broadcast %cst_96 : f32 to vector<8x128xf32>
    %314 = arith.maximumf %312, %313 : vector<8x128xf32>
    %315 = arith.truncf %314 : vector<8x128xf32> to vector<8x128xbf16>
    %cst_97 = arith.constant dense<0.000000e+00> : vector<8x32xf32>
    %316 = tpu.matmul %315, %14, %cst_97 {dimension_numbers = #tpu.dot_dimension_numbers<[1], [0], [0], [1], [0, 0, 1, 1], [], []>} : vector<8x128xbf16>, vector<128x32xbf16>, vector<8x32xf32> -> vector<8x32xf32>
    %317 = arith.addf %288, %316 : vector<8x32xf32>
    %318 = vector.broadcast %15 : vector<1x32xf32> to vector<8x32xf32>
    %319 = arith.addf %317, %318 : vector<8x32xf32>
    %c0_98 = arith.constant 0 : index
    %c0_99 = arith.constant 0 : index
    %320 = vector.load %arg15[%c0_98, %c0_99] : memref<1x32xf32, #tpu.memory_space<vmem>>, vector<1x32xf32>
    %c0_100 = arith.constant 0 : index
    %c0_101 = arith.constant 0 : index
    %321 = vector.load %arg16[%c0_100, %c0_101] : memref<1x32xf32, #tpu.memory_space<vmem>>, vector<1x32xf32>
    %cst_102 = arith.constant dense<0.000000e+00> : vector<8xf32>
    %322 = vector.multi_reduction <add>, %319, %cst_102 [1] : vector<8x32xf32> to vector<8xf32>
    %323 = vector.shape_cast %322 : vector<8xf32> to vector<8x1xf32>
    %cst_103 = arith.constant 3.200000e+01 : f32
    %324 = vector.broadcast %cst_103 : f32 to vector<8x1xf32>
    %325 = arith.divf %323, %324 : vector<8x1xf32>
    %326 = vector.broadcast %325 : vector<8x1xf32> to vector<8x32xf32>
    %327 = arith.subf %319, %326 : vector<8x32xf32>
    %328 = arith.mulf %327, %327 : vector<8x32xf32>
    %cst_104 = arith.constant dense<0.000000e+00> : vector<8xf32>
    %329 = vector.multi_reduction <add>, %328, %cst_104 [1] : vector<8x32xf32> to vector<8xf32>
    %330 = vector.shape_cast %329 : vector<8xf32> to vector<8x1xf32>
    %cst_105 = arith.constant 3.100000e+01 : f32
    %331 = vector.broadcast %cst_105 : f32 to vector<8x1xf32>
    %332 = arith.divf %330, %331 : vector<8x1xf32>
    %333 = vector.broadcast %320 : vector<1x32xf32> to vector<8x32xf32>
    %334 = arith.mulf %333, %327 : vector<8x32xf32>
    %335 = math.sqrt %332 : vector<8x1xf32>
    %cst_106 = arith.constant 9.99999997E-7 : f32
    %336 = vector.broadcast %cst_106 : f32 to vector<8x1xf32>
    %337 = arith.addf %335, %336 : vector<8x1xf32>
    %338 = vector.broadcast %337 : vector<8x1xf32> to vector<8x32xf32>
    %339 = arith.divf %334, %338 : vector<8x32xf32>
    %340 = vector.broadcast %321 : vector<1x32xf32> to vector<8x32xf32>
    %341 = arith.addf %339, %340 : vector<8x32xf32>
    %c0_107 = arith.constant 0 : index
    %c0_108 = arith.constant 0 : index
    %c0_109 = arith.constant 0 : index
    %342 = vector.load %arg17[%c0_107, %c0_108, %c0_109] : memref<1x8x32xf32, #tpu.memory_space<vmem>>, vector<1x8x32xf32>
    %343 = vector.shape_cast %342 : vector<1x8x32xf32> to vector<8x32xf32>
    %344 = vector.shape_cast %341 : vector<8x32xf32> to vector<1x8x32xf32>
    tpu.vector_store %arg17[%c0_107, %c0_108, %c0_109], %344 {strides = array<i32>} : memref<1x8x32xf32, #tpu.memory_space<vmem>>, vector<1x8x32xf32>,
    return
  }
  func.func @transform_0(%arg0: i32) -> (i32, i32, i32) {
    %c0_i32 = arith.constant 0 : i32
    %c0_i32_0 = arith.constant 0 : i32
    %c0_i32_1 = arith.constant 0 : i32
    return %arg0, %c0_i32, %c0_i32_0 : i32, i32, i32
  }
  func.func @transform_1(%arg0: i32) -> (i32, i32, i32) {
    %c0_i32 = arith.constant 0 : i32
    %c0_i32_0 = arith.constant 0 : i32
    %c0_i32_1 = arith.constant 0 : i32
    return %arg0, %c0_i32, %c0_i32_0 : i32, i32, i32
  }
  func.func @transform_2(%arg0: i32) -> (i32, i32) {
    %c0_i32 = arith.constant 0 : i32
    %c0_i32_0 = arith.constant 0 : i32
    %c0_i32_1 = arith.constant 0 : i32
    return %c0_i32, %c0_i32_0 : i32, i32
  }
  func.func @transform_3(%arg0: i32) -> (i32, i32) {
    %c0_i32 = arith.constant 0 : i32
    %c0_i32_0 = arith.constant 0 : i32
    %c0_i32_1 = arith.constant 0 : i32
    return %c0_i32, %c0_i32_0 : i32, i32
  }
  func.func @transform_4(%arg0: i32) -> (i32, i32) {
    %c0_i32 = arith.constant 0 : i32
    %c0_i32_0 = arith.constant 0 : i32
    %c0_i32_1 = arith.constant 0 : i32
    return %c0_i32, %c0_i32_0 : i32, i32
  }
  func.func @transform_5(%arg0: i32) -> (i32, i32) {
    %c0_i32 = arith.constant 0 : i32
    %c0_i32_0 = arith.constant 0 : i32
    %c0_i32_1 = arith.constant 0 : i32
    return %c0_i32, %c0_i32_0 : i32, i32
  }
  func.func @transform_6(%arg0: i32) -> (i32, i32) {
    %c0_i32 = arith.constant 0 : i32
    %c0_i32_0 = arith.constant 0 : i32
    %c0_i32_1 = arith.constant 0 : i32
    return %c0_i32, %c0_i32_0 : i32, i32
  }
  func.func @transform_7(%arg0: i32) -> (i32, i32) {
    %c0_i32 = arith.constant 0 : i32
    %c0_i32_0 = arith.constant 0 : i32
    %c0_i32_1 = arith.constant 0 : i32
    return %c0_i32, %c0_i32_0 : i32, i32
  }
  func.func @transform_8(%arg0: i32) -> (i32, i32) {
    %c0_i32 = arith.constant 0 : i32
    %c0_i32_0 = arith.constant 0 : i32
    %c0_i32_1 = arith.constant 0 : i32
    return %c0_i32, %c0_i32_0 : i32, i32
  }
  func.func @transform_9(%arg0: i32) -> (i32, i32) {
    %c0_i32 = arith.constant 0 : i32
    %c0_i32_0 = arith.constant 0 : i32
    %c0_i32_1 = arith.constant 0 : i32
    return %c0_i32, %c0_i32_0 : i32, i32
  }
  func.func @transform_10(%arg0: i32) -> (i32, i32) {
    %c0_i32 = arith.constant 0 : i32
    %c0_i32_0 = arith.constant 0 : i32
    %c0_i32_1 = arith.constant 0 : i32
    return %c0_i32, %c0_i32_0 : i32, i32
  }
  func.func @transform_11(%arg0: i32) -> (i32, i32) {
    %c0_i32 = arith.constant 0 : i32
    %c0_i32_0 = arith.constant 0 : i32
    %c0_i32_1 = arith.constant 0 : i32
    return %c0_i32, %c0_i32_0 : i32, i32
  }
  func.func @transform_12(%arg0: i32) -> (i32, i32) {
    %c0_i32 = arith.constant 0 : i32
    %c0_i32_0 = arith.constant 0 : i32
    %c0_i32_1 = arith.constant 0 : i32
    return %c0_i32, %c0_i32_0 : i32, i32
  }
  func.func @transform_13(%arg0: i32) -> (i32, i32) {
    %c0_i32 = arith.constant 0 : i32
    %c0_i32_0 = arith.constant 0 : i32
    %c0_i32_1 = arith.constant 0 : i32
    return %c0_i32, %c0_i32_0 : i32, i32
  }
  func.func @transform_14(%arg0: i32) -> (i32, i32) {
    %c0_i32 = arith.constant 0 : i32
    %c0_i32_0 = arith.constant 0 : i32
    %c0_i32_1 = arith.constant 0 : i32
    return %c0_i32, %c0_i32_0 : i32, i32
  }
  func.func @transform_15(%arg0: i32) -> (i32, i32) {
    %c0_i32 = arith.constant 0 : i32
    %c0_i32_0 = arith.constant 0 : i32
    %c0_i32_1 = arith.constant 0 : i32
    return %c0_i32, %c0_i32_0 : i32, i32
  }
  func.func @transform_16(%arg0: i32) -> (i32, i32, i32) {
    %c0_i32 = arith.constant 0 : i32
    %c0_i32_0 = arith.constant 0 : i32
    %c0_i32_1 = arith.constant 0 : i32
    return %arg0, %c0_i32, %c0_i32_0 : i32, i32, i32
  }
}

module attributes {stable_mosaic.version = 11 : i64} {
  func.func @_decoder_stack_kernel(%arg0: i32, %arg1: memref<1x8x32xf32, #tpu.memory_space<vmem>>, %arg2: memref<1x8x32xf32, #tpu.memory_space<vmem>>, %arg3: memref<1x8x8xf32, #tpu.memory_space<vmem>>, %arg4: memref<1x8x8xf32, #tpu.memory_space<vmem>>, %arg5: memref<1x32xf32, #tpu.memory_space<vmem>>, %arg6: memref<1x32xf32, #tpu.memory_space<vmem>>, %arg7: memref<32x96xbf16, #tpu.memory_space<vmem>>, %arg8: memref<1x96xf32, #tpu.memory_space<vmem>>, %arg9: memref<32x32xbf16, #tpu.memory_space<vmem>>, %arg10: memref<1x32xf32, #tpu.memory_space<vmem>>, %arg11: memref<1x32xf32, #tpu.memory_space<vmem>>, %arg12: memref<1x32xf32, #tpu.memory_space<vmem>>, %arg13: memref<32x32xbf16, #tpu.memory_space<vmem>>, %arg14: memref<1x32xf32, #tpu.memory_space<vmem>>, %arg15: memref<32x64xbf16, #tpu.memory_space<vmem>>, %arg16: memref<1x64xf32, #tpu.memory_space<vmem>>, %arg17: memref<32x32xbf16, #tpu.memory_space<vmem>>, %arg18: memref<1x32xf32, #tpu.memory_space<vmem>>, %arg19: memref<1x32xf32, #tpu.memory_space<vmem>>, %arg20: memref<1x32xf32, #tpu.memory_space<vmem>>, %arg21: memref<32x128xbf16, #tpu.memory_space<vmem>>, %arg22: memref<1x128xf32, #tpu.memory_space<vmem>>, %arg23: memref<128x32xbf16, #tpu.memory_space<vmem>>, %arg24: memref<1x32xf32, #tpu.memory_space<vmem>>, %arg25: memref<1x32xf32, #tpu.memory_space<vmem>>, %arg26: memref<1x32xf32, #tpu.memory_space<vmem>>, %arg27: memref<32x13xbf16, #tpu.memory_space<vmem>>, %arg28: memref<1x13xf32, #tpu.memory_space<vmem>>, %arg29: memref<1x8x13xf32, #tpu.memory_space<vmem>>) attributes {dimension_semantics = [#tpu.dimension_semantics<parallel>], iteration_bounds = array<i64: 2>, scalar_prefetch = 0 : i64, scratch_operands = 0 : i64, tpu.core_type = #tpu.core_type<tc>, window_params = [{transform_indices = @transform_0, window_bounds = array<i64: 1, 8, 32>}, {transform_indices = @transform_1, window_bounds = array<i64: 1, 8, 32>}, {transform_indices = @transform_2, window_bounds = array<i64: 1, 8, 8>}, {transform_indices = @transform_3, window_bounds = array<i64: 1, 8, 8>}, {pipeline_mode = #tpu.pipeline_mode<synchronous>, transform_indices = @transform_4, window_bounds = array<i64: 1, 32>}, {pipeline_mode = #tpu.pipeline_mode<synchronous>, transform_indices = @transform_5, window_bounds = array<i64: 1, 32>}, {pipeline_mode = #tpu.pipeline_mode<synchronous>, transform_indices = @transform_6, window_bounds = array<i64: 32, 96>}, {pipeline_mode = #tpu.pipeline_mode<synchronous>, transform_indices = @transform_7, window_bounds = array<i64: 1, 96>}, {pipeline_mode = #tpu.pipeline_mode<synchronous>, transform_indices = @transform_8, window_bounds = array<i64: 32, 32>}, {pipeline_mode = #tpu.pipeline_mode<synchronous>, transform_indices = @transform_9, window_bounds = array<i64: 1, 32>}, {pipeline_mode = #tpu.pipeline_mode<synchronous>, transform_indices = @transform_10, window_bounds = array<i64: 1, 32>}, {pipeline_mode = #tpu.pipeline_mode<synchronous>, transform_indices = @transform_11, window_bounds = array<i64: 1, 32>}, {pipeline_mode = #tpu.pipeline_mode<synchronous>, transform_indices = @transform_12, window_bounds = array<i64: 32, 32>}, {pipeline_mode = #tpu.pipeline_mode<synchronous>, transform_indices = @transform_13, window_bounds = array<i64: 1, 32>}, {pipeline_mode = #tpu.pipeline_mode<synchronous>, transform_indices = @transform_14, window_bounds = array<i64: 32, 64>}, {pipeline_mode = #tpu.pipeline_mode<synchronous>, transform_indices = @transform_15, window_bounds = array<i64: 1, 64>}, {pipeline_mode = #tpu.pipeline_mode<synchronous>, transform_indices = @transform_16, window_bounds = array<i64: 32, 32>}, {pipeline_mode = #tpu.pipeline_mode<synchronous>, transform_indices = @transform_17, window_bounds = array<i64: 1, 32>}, {pipeline_mode = #tpu.pipeline_mode<synchronous>, transform_indices = @transform_18, window_bounds = array<i64: 1, 32>}, {pipeline_mode = #tpu.pipeline_mode<synchronous>, transform_indices = @transform_19, window_bounds = array<i64: 1, 32>}, {pipeline_mode = #tpu.pipeline_mode<synchronous>, transform_indices = @transform_20, window_bounds = array<i64: 32, 128>}, {pipeline_mode = #tpu.pipeline_mode<synchronous>, transform_indices = @transform_21, window_bounds = array<i64: 1, 128>}, {pipeline_mode = #tpu.pipeline_mode<synchronous>, transform_indices = @transform_22, window_bounds = array<i64: 128, 32>}, {pipeline_mode = #tpu.pipeline_mode<synchronous>, transform_indices = @transform_23, window_bounds = array<i64: 1, 32>}, {pipeline_mode = #tpu.pipeline_mode<synchronous>, transform_indices = @transform_24, window_bounds = array<i64: 1, 32>}, {pipeline_mode = #tpu.pipeline_mode<synchronous>, transform_indices = @transform_25, window_bounds = array<i64: 1, 32>}, {pipeline_mode = #tpu.pipeline_mode<synchronous>, transform_indices = @transform_26, window_bounds = array<i64: 32, 13>}, {pipeline_mode = #tpu.pipeline_mode<synchronous>, transform_indices = @transform_27, window_bounds = array<i64: 1, 13>}, {transform_indices = @transform_28, window_bounds = array<i64: 1, 8, 13>}]} {
    %c0 = arith.constant 0 : index
    %c0_0 = arith.constant 0 : index
    %c0_1 = arith.constant 0 : index
    %0 = vector.load %arg1[%c0, %c0_0, %c0_1] : memref<1x8x32xf32, #tpu.memory_space<vmem>>, vector<1x8x32xf32>
    %1 = vector.shape_cast %0 : vector<1x8x32xf32> to vector<8x32xf32>
    %c0_2 = arith.constant 0 : index
    %c0_3 = arith.constant 0 : index
    %c0_4 = arith.constant 0 : index
    %2 = vector.load %arg2[%c0_2, %c0_3, %c0_4] : memref<1x8x32xf32, #tpu.memory_space<vmem>>, vector<1x8x32xf32>
    %3 = vector.shape_cast %2 : vector<1x8x32xf32> to vector<8x32xf32>
    %c0_5 = arith.constant 0 : index
    %c0_6 = arith.constant 0 : index
    %c0_7 = arith.constant 0 : index
    %4 = vector.load %arg3[%c0_5, %c0_6, %c0_7] : memref<1x8x8xf32, #tpu.memory_space<vmem>>, vector<1x8x8xf32>
    %5 = vector.shape_cast %4 : vector<1x8x8xf32> to vector<8x8xf32>
    %c0_8 = arith.constant 0 : index
    %c0_9 = arith.constant 0 : index
    %c0_10 = arith.constant 0 : index
    %6 = vector.load %arg4[%c0_8, %c0_9, %c0_10] : memref<1x8x8xf32, #tpu.memory_space<vmem>>, vector<1x8x8xf32>
    %7 = vector.shape_cast %6 : vector<1x8x8xf32> to vector<8x8xf32>
    %c0_11 = arith.constant 0 : index
    %c0_12 = arith.constant 0 : index
    %8 = vector.load %arg5[%c0_11, %c0_12] : memref<1x32xf32, #tpu.memory_space<vmem>>, vector<1x32xf32>
    %c0_13 = arith.constant 0 : index
    %c0_14 = arith.constant 0 : index
    %9 = vector.load %arg6[%c0_13, %c0_14] : memref<1x32xf32, #tpu.memory_space<vmem>>, vector<1x32xf32>
    %c0_15 = arith.constant 0 : index
    %c0_16 = arith.constant 0 : index
    %10 = vector.load %arg7[%c0_15, %c0_16] : memref<32x96xbf16, #tpu.memory_space<vmem>>, vector<32x96xbf16>
    %c0_17 = arith.constant 0 : index
    %c0_18 = arith.constant 0 : index
    %11 = vector.load %arg8[%c0_17, %c0_18] : memref<1x96xf32, #tpu.memory_space<vmem>>, vector<1x96xf32>
    %c0_19 = arith.constant 0 : index
    %c0_20 = arith.constant 0 : index
    %12 = vector.load %arg9[%c0_19, %c0_20] : memref<32x32xbf16, #tpu.memory_space<vmem>>, vector<32x32xbf16>
    %c0_21 = arith.constant 0 : index
    %c0_22 = arith.constant 0 : index
    %13 = vector.load %arg10[%c0_21, %c0_22] : memref<1x32xf32, #tpu.memory_space<vmem>>, vector<1x32xf32>
    %c0_23 = arith.constant 0 : index
    %c0_24 = arith.constant 0 : index
    %14 = vector.load %arg11[%c0_23, %c0_24] : memref<1x32xf32, #tpu.memory_space<vmem>>, vector<1x32xf32>
    %c0_25 = arith.constant 0 : index
    %c0_26 = arith.constant 0 : index
    %15 = vector.load %arg12[%c0_25, %c0_26] : memref<1x32xf32, #tpu.memory_space<vmem>>, vector<1x32xf32>
    %c0_27 = arith.constant 0 : index
    %c0_28 = arith.constant 0 : index
    %16 = vector.load %arg13[%c0_27, %c0_28] : memref<32x32xbf16, #tpu.memory_space<vmem>>, vector<32x32xbf16>
    %c0_29 = arith.constant 0 : index
    %c0_30 = arith.constant 0 : index
    %17 = vector.load %arg14[%c0_29, %c0_30] : memref<1x32xf32, #tpu.memory_space<vmem>>, vector<1x32xf32>
    %c0_31 = arith.constant 0 : index
    %c0_32 = arith.constant 0 : index
    %18 = vector.load %arg15[%c0_31, %c0_32] : memref<32x64xbf16, #tpu.memory_space<vmem>>, vector<32x64xbf16>
    %c0_33 = arith.constant 0 : index
    %c0_34 = arith.constant 0 : index
    %19 = vector.load %arg16[%c0_33, %c0_34] : memref<1x64xf32, #tpu.memory_space<vmem>>, vector<1x64xf32>
    %c0_35 = arith.constant 0 : index
    %c0_36 = arith.constant 0 : index
    %20 = vector.load %arg17[%c0_35, %c0_36] : memref<32x32xbf16, #tpu.memory_space<vmem>>, vector<32x32xbf16>
    %c0_37 = arith.constant 0 : index
    %c0_38 = arith.constant 0 : index
    %21 = vector.load %arg18[%c0_37, %c0_38] : memref<1x32xf32, #tpu.memory_space<vmem>>, vector<1x32xf32>
    %c0_39 = arith.constant 0 : index
    %c0_40 = arith.constant 0 : index
    %22 = vector.load %arg19[%c0_39, %c0_40] : memref<1x32xf32, #tpu.memory_space<vmem>>, vector<1x32xf32>
    %c0_41 = arith.constant 0 : index
    %c0_42 = arith.constant 0 : index
    %23 = vector.load %arg20[%c0_41, %c0_42] : memref<1x32xf32, #tpu.memory_space<vmem>>, vector<1x32xf32>
    %c0_43 = arith.constant 0 : index
    %c0_44 = arith.constant 0 : index
    %24 = vector.load %arg21[%c0_43, %c0_44] : memref<32x128xbf16, #tpu.memory_space<vmem>>, vector<32x128xbf16>
    %c0_45 = arith.constant 0 : index
    %c0_46 = arith.constant 0 : index
    %25 = vector.load %arg22[%c0_45, %c0_46] : memref<1x128xf32, #tpu.memory_space<vmem>>, vector<1x128xf32>
    %c0_47 = arith.constant 0 : index
    %c0_48 = arith.constant 0 : index
    %26 = vector.load %arg23[%c0_47, %c0_48] : memref<128x32xbf16, #tpu.memory_space<vmem>>, vector<128x32xbf16>
    %c0_49 = arith.constant 0 : index
    %c0_50 = arith.constant 0 : index
    %27 = vector.load %arg24[%c0_49, %c0_50] : memref<1x32xf32, #tpu.memory_space<vmem>>, vector<1x32xf32>
    %28 = arith.truncf %3 : vector<8x32xf32> to vector<8x32xbf16>
    %cst = arith.constant dense<0.000000e+00> : vector<8x64xf32>
    %29 = tpu.matmul %28, %18, %cst {dimension_numbers = #tpu.dot_dimension_numbers<[1], [0], [0], [1], [0, 0, 1, 1], [], []>} : vector<8x32xbf16>, vector<32x64xbf16>, vector<8x64xf32> -> vector<8x64xf32>
    %30 = vector.broadcast %19 : vector<1x64xf32> to vector<8x64xf32>
    %31 = arith.addf %29, %30 : vector<8x64xf32>
    %32 = vector.extract_strided_slice %31 {offsets = [0, 0], sizes = [8, 32], strides = [1, 1]} : vector<8x64xf32> to vector<8x32xf32>
    %33 = vector.extract_strided_slice %31 {offsets = [0, 32], sizes = [8, 32], strides = [1, 1]} : vector<8x64xf32> to vector<8x32xf32>
    %cst_51 = arith.constant dense<0.000000e+00> : vector<8xf32>
    %34 = vector.multi_reduction <add>, %1, %cst_51 [1] : vector<8x32xf32> to vector<8xf32>
    %35 = vector.shape_cast %34 : vector<8xf32> to vector<8x1xf32>
    %cst_52 = arith.constant 3.200000e+01 : f32
    %36 = vector.broadcast %cst_52 : f32 to vector<8x1xf32>
    %37 = arith.divf %35, %36 : vector<8x1xf32>
    %38 = vector.broadcast %37 : vector<8x1xf32> to vector<8x32xf32>
    %39 = arith.subf %1, %38 : vector<8x32xf32>
    %40 = arith.mulf %39, %39 : vector<8x32xf32>
    %cst_53 = arith.constant dense<0.000000e+00> : vector<8xf32>
    %41 = vector.multi_reduction <add>, %40, %cst_53 [1] : vector<8x32xf32> to vector<8xf32>
    %42 = vector.shape_cast %41 : vector<8xf32> to vector<8x1xf32>
    %cst_54 = arith.constant 3.100000e+01 : f32
    %43 = vector.broadcast %cst_54 : f32 to vector<8x1xf32>
    %44 = arith.divf %42, %43 : vector<8x1xf32>
    %45 = vector.broadcast %8 : vector<1x32xf32> to vector<8x32xf32>
    %46 = arith.mulf %45, %39 : vector<8x32xf32>
    %47 = math.sqrt %44 : vector<8x1xf32>
    %cst_55 = arith.constant 9.99999997E-7 : f32
    %48 = vector.broadcast %cst_55 : f32 to vector<8x1xf32>
    %49 = arith.addf %47, %48 : vector<8x1xf32>
    %50 = vector.broadcast %49 : vector<8x1xf32> to vector<8x32xf32>
    %51 = arith.divf %46, %50 : vector<8x32xf32>
    %52 = vector.broadcast %9 : vector<1x32xf32> to vector<8x32xf32>
    %53 = arith.addf %51, %52 : vector<8x32xf32>
    %54 = arith.truncf %53 : vector<8x32xf32> to vector<8x32xbf16>
    %cst_56 = arith.constant dense<0.000000e+00> : vector<8x96xf32>
    %55 = tpu.matmul %54, %10, %cst_56 {dimension_numbers = #tpu.dot_dimension_numbers<[1], [0], [0], [1], [0, 0, 1, 1], [], []>} : vector<8x32xbf16>, vector<32x96xbf16>, vector<8x96xf32> -> vector<8x96xf32>
    %56 = vector.broadcast %11 : vector<1x96xf32> to vector<8x96xf32>
    %57 = arith.addf %55, %56 : vector<8x96xf32>
    %58 = vector.extract_strided_slice %57 {offsets = [0, 0], sizes = [8, 32], strides = [1, 1]} : vector<8x96xf32> to vector<8x32xf32>
    %59 = vector.extract_strided_slice %57 {offsets = [0, 32], sizes = [8, 32], strides = [1, 1]} : vector<8x96xf32> to vector<8x32xf32>
    %60 = vector.extract_strided_slice %57 {offsets = [0, 64], sizes = [8, 32], strides = [1, 1]} : vector<8x96xf32> to vector<8x32xf32>
    %61 = vector.extract_strided_slice %58 {offsets = [0, 0], sizes = [8, 8], strides = [1, 1]} : vector<8x32xf32> to vector<8x8xf32>
    %62 = vector.extract_strided_slice %59 {offsets = [0, 0], sizes = [8, 8], strides = [1, 1]} : vector<8x32xf32> to vector<8x8xf32>
    %63 = arith.truncf %61 : vector<8x8xf32> to vector<8x8xbf16>
    %64 = arith.truncf %62 : vector<8x8xf32> to vector<8x8xbf16>
    %cst_57 = arith.constant dense<0.000000e+00> : vector<8x8xf32>
    %65 = tpu.matmul %63, %64, %cst_57 {dimension_numbers = #tpu.dot_dimension_numbers<[1], [1], [0], [0], [0, 0, 1, 0], [], []>} : vector<8x8xbf16>, vector<8x8xbf16>, vector<8x8xf32> -> vector<8x8xf32>
    %cst_58 = arith.constant 0.353553385 : f32
    %66 = vector.broadcast %cst_58 : f32 to vector<8x8xf32>
    %67 = arith.mulf %65, %66 : vector<8x8xf32>
    %68 = arith.addf %67, %5 : vector<8x8xf32>
    %cst_59 = arith.constant dense<0xFF800000> : vector<8xf32>
    %69 = vector.multi_reduction <maximumf>, %68, %cst_59 [1] : vector<8x8xf32> to vector<8xf32>
    %70 = vector.shape_cast %69 : vector<8xf32> to vector<8x1xf32>
    %71 = vector.broadcast %70 : vector<8x1xf32> to vector<8x8xf32>
    %72 = arith.subf %68, %71 : vector<8x8xf32>
    %73 = math.exp %72 : vector<8x8xf32>
    %cst_60 = arith.constant dense<0.000000e+00> : vector<8xf32>
    %74 = vector.multi_reduction <add>, %73, %cst_60 [1] : vector<8x8xf32> to vector<8xf32>
    %75 = vector.shape_cast %74 : vector<8xf32> to vector<8x1xf32>
    %76 = tpu.reciprocal %75 {approx = true} : vector<8x1xf32> -> vector<8x1xf32>
    %77 = vector.broadcast %76 : vector<8x1xf32> to vector<8x8xf32>
    %78 = arith.mulf %73, %77 : vector<8x8xf32>
    %79 = vector.extract_strided_slice %60 {offsets = [0, 0], sizes = [8, 8], strides = [1, 1]} : vector<8x32xf32> to vector<8x8xf32>
    %80 = arith.truncf %78 : vector<8x8xf32> to vector<8x8xbf16>
    %81 = arith.truncf %79 : vector<8x8xf32> to vector<8x8xbf16>
    %cst_61 = arith.constant dense<0.000000e+00> : vector<8x8xf32>
    %82 = tpu.matmul %80, %81, %cst_61 {dimension_numbers = #tpu.dot_dimension_numbers<[1], [0], [0], [1], [0, 0, 1, 1], [], []>} : vector<8x8xbf16>, vector<8x8xbf16>, vector<8x8xf32> -> vector<8x8xf32>
    %83 = vector.extract_strided_slice %58 {offsets = [0, 8], sizes = [8, 8], strides = [1, 1]} : vector<8x32xf32> to vector<8x8xf32>
    %84 = vector.extract_strided_slice %59 {offsets = [0, 8], sizes = [8, 8], strides = [1, 1]} : vector<8x32xf32> to vector<8x8xf32>
    %85 = arith.truncf %83 : vector<8x8xf32> to vector<8x8xbf16>
    %86 = arith.truncf %84 : vector<8x8xf32> to vector<8x8xbf16>
    %cst_62 = arith.constant dense<0.000000e+00> : vector<8x8xf32>
    %87 = tpu.matmul %85, %86, %cst_62 {dimension_numbers = #tpu.dot_dimension_numbers<[1], [1], [0], [0], [0, 0, 1, 0], [], []>} : vector<8x8xbf16>, vector<8x8xbf16>, vector<8x8xf32> -> vector<8x8xf32>
    %cst_63 = arith.constant 0.353553385 : f32
    %88 = vector.broadcast %cst_63 : f32 to vector<8x8xf32>
    %89 = arith.mulf %87, %88 : vector<8x8xf32>
    %90 = arith.addf %89, %5 : vector<8x8xf32>
    %cst_64 = arith.constant dense<0xFF800000> : vector<8xf32>
    %91 = vector.multi_reduction <maximumf>, %90, %cst_64 [1] : vector<8x8xf32> to vector<8xf32>
    %92 = vector.shape_cast %91 : vector<8xf32> to vector<8x1xf32>
    %93 = vector.broadcast %92 : vector<8x1xf32> to vector<8x8xf32>
    %94 = arith.subf %90, %93 : vector<8x8xf32>
    %95 = math.exp %94 : vector<8x8xf32>
    %cst_65 = arith.constant dense<0.000000e+00> : vector<8xf32>
    %96 = vector.multi_reduction <add>, %95, %cst_65 [1] : vector<8x8xf32> to vector<8xf32>
    %97 = vector.shape_cast %96 : vector<8xf32> to vector<8x1xf32>
    %98 = tpu.reciprocal %97 {approx = true} : vector<8x1xf32> -> vector<8x1xf32>
    %99 = vector.broadcast %98 : vector<8x1xf32> to vector<8x8xf32>
    %100 = arith.mulf %95, %99 : vector<8x8xf32>
    %101 = vector.extract_strided_slice %60 {offsets = [0, 8], sizes = [8, 8], strides = [1, 1]} : vector<8x32xf32> to vector<8x8xf32>
    %102 = arith.truncf %100 : vector<8x8xf32> to vector<8x8xbf16>
    %103 = arith.truncf %101 : vector<8x8xf32> to vector<8x8xbf16>
    %cst_66 = arith.constant dense<0.000000e+00> : vector<8x8xf32>
    %104 = tpu.matmul %102, %103, %cst_66 {dimension_numbers = #tpu.dot_dimension_numbers<[1], [0], [0], [1], [0, 0, 1, 1], [], []>} : vector<8x8xbf16>, vector<8x8xbf16>, vector<8x8xf32> -> vector<8x8xf32>
    %105 = vector.extract_strided_slice %58 {offsets = [0, 16], sizes = [8, 8], strides = [1, 1]} : vector<8x32xf32> to vector<8x8xf32>
    %106 = vector.extract_strided_slice %59 {offsets = [0, 16], sizes = [8, 8], strides = [1, 1]} : vector<8x32xf32> to vector<8x8xf32>
    %107 = arith.truncf %105 : vector<8x8xf32> to vector<8x8xbf16>
    %108 = arith.truncf %106 : vector<8x8xf32> to vector<8x8xbf16>
    %cst_67 = arith.constant dense<0.000000e+00> : vector<8x8xf32>
    %109 = tpu.matmul %107, %108, %cst_67 {dimension_numbers = #tpu.dot_dimension_numbers<[1], [1], [0], [0], [0, 0, 1, 0], [], []>} : vector<8x8xbf16>, vector<8x8xbf16>, vector<8x8xf32> -> vector<8x8xf32>
    %cst_68 = arith.constant 0.353553385 : f32
    %110 = vector.broadcast %cst_68 : f32 to vector<8x8xf32>
    %111 = arith.mulf %109, %110 : vector<8x8xf32>
    %112 = arith.addf %111, %5 : vector<8x8xf32>
    %cst_69 = arith.constant dense<0xFF800000> : vector<8xf32>
    %113 = vector.multi_reduction <maximumf>, %112, %cst_69 [1] : vector<8x8xf32> to vector<8xf32>
    %114 = vector.shape_cast %113 : vector<8xf32> to vector<8x1xf32>
    %115 = vector.broadcast %114 : vector<8x1xf32> to vector<8x8xf32>
    %116 = arith.subf %112, %115 : vector<8x8xf32>
    %117 = math.exp %116 : vector<8x8xf32>
    %cst_70 = arith.constant dense<0.000000e+00> : vector<8xf32>
    %118 = vector.multi_reduction <add>, %117, %cst_70 [1] : vector<8x8xf32> to vector<8xf32>
    %119 = vector.shape_cast %118 : vector<8xf32> to vector<8x1xf32>
    %120 = tpu.reciprocal %119 {approx = true} : vector<8x1xf32> -> vector<8x1xf32>
    %121 = vector.broadcast %120 : vector<8x1xf32> to vector<8x8xf32>
    %122 = arith.mulf %117, %121 : vector<8x8xf32>
    %123 = vector.extract_strided_slice %60 {offsets = [0, 16], sizes = [8, 8], strides = [1, 1]} : vector<8x32xf32> to vector<8x8xf32>
    %124 = arith.truncf %122 : vector<8x8xf32> to vector<8x8xbf16>
    %125 = arith.truncf %123 : vector<8x8xf32> to vector<8x8xbf16>
    %cst_71 = arith.constant dense<0.000000e+00> : vector<8x8xf32>
    %126 = tpu.matmul %124, %125, %cst_71 {dimension_numbers = #tpu.dot_dimension_numbers<[1], [0], [0], [1], [0, 0, 1, 1], [], []>} : vector<8x8xbf16>, vector<8x8xbf16>, vector<8x8xf32> -> vector<8x8xf32>
    %127 = vector.extract_strided_slice %58 {offsets = [0, 24], sizes = [8, 8], strides = [1, 1]} : vector<8x32xf32> to vector<8x8xf32>
    %128 = vector.extract_strided_slice %59 {offsets = [0, 24], sizes = [8, 8], strides = [1, 1]} : vector<8x32xf32> to vector<8x8xf32>
    %129 = arith.truncf %127 : vector<8x8xf32> to vector<8x8xbf16>
    %130 = arith.truncf %128 : vector<8x8xf32> to vector<8x8xbf16>
    %cst_72 = arith.constant dense<0.000000e+00> : vector<8x8xf32>
    %131 = tpu.matmul %129, %130, %cst_72 {dimension_numbers = #tpu.dot_dimension_numbers<[1], [1], [0], [0], [0, 0, 1, 0], [], []>} : vector<8x8xbf16>, vector<8x8xbf16>, vector<8x8xf32> -> vector<8x8xf32>
    %cst_73 = arith.constant 0.353553385 : f32
    %132 = vector.broadcast %cst_73 : f32 to vector<8x8xf32>
    %133 = arith.mulf %131, %132 : vector<8x8xf32>
    %134 = arith.addf %133, %5 : vector<8x8xf32>
    %cst_74 = arith.constant dense<0xFF800000> : vector<8xf32>
    %135 = vector.multi_reduction <maximumf>, %134, %cst_74 [1] : vector<8x8xf32> to vector<8xf32>
    %136 = vector.shape_cast %135 : vector<8xf32> to vector<8x1xf32>
    %137 = vector.broadcast %136 : vector<8x1xf32> to vector<8x8xf32>
    %138 = arith.subf %134, %137 : vector<8x8xf32>
    %139 = math.exp %138 : vector<8x8xf32>
    %cst_75 = arith.constant dense<0.000000e+00> : vector<8xf32>
    %140 = vector.multi_reduction <add>, %139, %cst_75 [1] : vector<8x8xf32> to vector<8xf32>
    %141 = vector.shape_cast %140 : vector<8xf32> to vector<8x1xf32>
    %142 = tpu.reciprocal %141 {approx = true} : vector<8x1xf32> -> vector<8x1xf32>
    %143 = vector.broadcast %142 : vector<8x1xf32> to vector<8x8xf32>
    %144 = arith.mulf %139, %143 : vector<8x8xf32>
    %145 = vector.extract_strided_slice %60 {offsets = [0, 24], sizes = [8, 8], strides = [1, 1]} : vector<8x32xf32> to vector<8x8xf32>
    %146 = arith.truncf %144 : vector<8x8xf32> to vector<8x8xbf16>
    %147 = arith.truncf %145 : vector<8x8xf32> to vector<8x8xbf16>
    %cst_76 = arith.constant dense<0.000000e+00> : vector<8x8xf32>
    %148 = tpu.matmul %146, %147, %cst_76 {dimension_numbers = #tpu.dot_dimension_numbers<[1], [0], [0], [1], [0, 0, 1, 1], [], []>} : vector<8x8xbf16>, vector<8x8xbf16>, vector<8x8xf32> -> vector<8x8xf32>
    %149 = tpu.concatenate %82, %104, %126, %148 in 1 : vector<8x8xf32>, vector<8x8xf32>, vector<8x8xf32>, vector<8x8xf32> -> vector<8x32xf32>
    %150 = arith.truncf %149 : vector<8x32xf32> to vector<8x32xbf16>
    %cst_77 = arith.constant dense<0.000000e+00> : vector<8x32xf32>
    %151 = tpu.matmul %150, %12, %cst_77 {dimension_numbers = #tpu.dot_dimension_numbers<[1], [0], [0], [1], [0, 0, 1, 1], [], []>} : vector<8x32xbf16>, vector<32x32xbf16>, vector<8x32xf32> -> vector<8x32xf32>
    %152 = arith.addf %1, %151 : vector<8x32xf32>
    %153 = vector.broadcast %13 : vector<1x32xf32> to vector<8x32xf32>
    %154 = arith.addf %152, %153 : vector<8x32xf32>
    %cst_78 = arith.constant dense<0.000000e+00> : vector<8xf32>
    %155 = vector.multi_reduction <add>, %154, %cst_78 [1] : vector<8x32xf32> to vector<8xf32>
    %156 = vector.shape_cast %155 : vector<8xf32> to vector<8x1xf32>
    %cst_79 = arith.constant 3.200000e+01 : f32
    %157 = vector.broadcast %cst_79 : f32 to vector<8x1xf32>
    %158 = arith.divf %156, %157 : vector<8x1xf32>
    %159 = vector.broadcast %158 : vector<8x1xf32> to vector<8x32xf32>
    %160 = arith.subf %154, %159 : vector<8x32xf32>
    %161 = arith.mulf %160, %160 : vector<8x32xf32>
    %cst_80 = arith.constant dense<0.000000e+00> : vector<8xf32>
    %162 = vector.multi_reduction <add>, %161, %cst_80 [1] : vector<8x32xf32> to vector<8xf32>
    %163 = vector.shape_cast %162 : vector<8xf32> to vector<8x1xf32>
    %cst_81 = arith.constant 3.100000e+01 : f32
    %164 = vector.broadcast %cst_81 : f32 to vector<8x1xf32>
    %165 = arith.divf %163, %164 : vector<8x1xf32>
    %166 = vector.broadcast %14 : vector<1x32xf32> to vector<8x32xf32>
    %167 = arith.mulf %166, %160 : vector<8x32xf32>
    %168 = math.sqrt %165 : vector<8x1xf32>
    %cst_82 = arith.constant 9.99999997E-7 : f32
    %169 = vector.broadcast %cst_82 : f32 to vector<8x1xf32>
    %170 = arith.addf %168, %169 : vector<8x1xf32>
    %171 = vector.broadcast %170 : vector<8x1xf32> to vector<8x32xf32>
    %172 = arith.divf %167, %171 : vector<8x32xf32>
    %173 = vector.broadcast %15 : vector<1x32xf32> to vector<8x32xf32>
    %174 = arith.addf %172, %173 : vector<8x32xf32>
    %175 = arith.truncf %174 : vector<8x32xf32> to vector<8x32xbf16>
    %cst_83 = arith.constant dense<0.000000e+00> : vector<8x32xf32>
    %176 = tpu.matmul %175, %16, %cst_83 {dimension_numbers = #tpu.dot_dimension_numbers<[1], [0], [0], [1], [0, 0, 1, 1], [], []>} : vector<8x32xbf16>, vector<32x32xbf16>, vector<8x32xf32> -> vector<8x32xf32>
    %177 = vector.broadcast %17 : vector<1x32xf32> to vector<8x32xf32>
    %178 = arith.addf %176, %177 : vector<8x32xf32>
    %179 = vector.extract_strided_slice %178 {offsets = [0, 0], sizes = [8, 8], strides = [1, 1]} : vector<8x32xf32> to vector<8x8xf32>
    %180 = vector.extract_strided_slice %32 {offsets = [0, 0], sizes = [8, 8], strides = [1, 1]} : vector<8x32xf32> to vector<8x8xf32>
    %181 = arith.truncf %179 : vector<8x8xf32> to vector<8x8xbf16>
    %182 = arith.truncf %180 : vector<8x8xf32> to vector<8x8xbf16>
    %cst_84 = arith.constant dense<0.000000e+00> : vector<8x8xf32>
    %183 = tpu.matmul %181, %182, %cst_84 {dimension_numbers = #tpu.dot_dimension_numbers<[1], [1], [0], [0], [0, 0, 1, 0], [], []>} : vector<8x8xbf16>, vector<8x8xbf16>, vector<8x8xf32> -> vector<8x8xf32>
    %cst_85 = arith.constant 0.353553385 : f32
    %184 = vector.broadcast %cst_85 : f32 to vector<8x8xf32>
    %185 = arith.mulf %183, %184 : vector<8x8xf32>
    %186 = arith.addf %185, %7 : vector<8x8xf32>
    %cst_86 = arith.constant dense<0xFF800000> : vector<8xf32>
    %187 = vector.multi_reduction <maximumf>, %186, %cst_86 [1] : vector<8x8xf32> to vector<8xf32>
    %188 = vector.shape_cast %187 : vector<8xf32> to vector<8x1xf32>
    %189 = vector.broadcast %188 : vector<8x1xf32> to vector<8x8xf32>
    %190 = arith.subf %186, %189 : vector<8x8xf32>
    %191 = math.exp %190 : vector<8x8xf32>
    %cst_87 = arith.constant dense<0.000000e+00> : vector<8xf32>
    %192 = vector.multi_reduction <add>, %191, %cst_87 [1] : vector<8x8xf32> to vector<8xf32>
    %193 = vector.shape_cast %192 : vector<8xf32> to vector<8x1xf32>
    %194 = tpu.reciprocal %193 {approx = true} : vector<8x1xf32> -> vector<8x1xf32>
    %195 = vector.broadcast %194 : vector<8x1xf32> to vector<8x8xf32>
    %196 = arith.mulf %191, %195 : vector<8x8xf32>
    %197 = vector.extract_strided_slice %33 {offsets = [0, 0], sizes = [8, 8], strides = [1, 1]} : vector<8x32xf32> to vector<8x8xf32>
    %198 = arith.truncf %196 : vector<8x8xf32> to vector<8x8xbf16>
    %199 = arith.truncf %197 : vector<8x8xf32> to vector<8x8xbf16>
    %cst_88 = arith.constant dense<0.000000e+00> : vector<8x8xf32>
    %200 = tpu.matmul %198, %199, %cst_88 {dimension_numbers = #tpu.dot_dimension_numbers<[1], [0], [0], [1], [0, 0, 1, 1], [], []>} : vector<8x8xbf16>, vector<8x8xbf16>, vector<8x8xf32> -> vector<8x8xf32>
    %201 = vector.extract_strided_slice %178 {offsets = [0, 8], sizes = [8, 8], strides = [1, 1]} : vector<8x32xf32> to vector<8x8xf32>
    %202 = vector.extract_strided_slice %32 {offsets = [0, 8], sizes = [8, 8], strides = [1, 1]} : vector<8x32xf32> to vector<8x8xf32>
    %203 = arith.truncf %201 : vector<8x8xf32> to vector<8x8xbf16>
    %204 = arith.truncf %202 : vector<8x8xf32> to vector<8x8xbf16>
    %cst_89 = arith.constant dense<0.000000e+00> : vector<8x8xf32>
    %205 = tpu.matmul %203, %204, %cst_89 {dimension_numbers = #tpu.dot_dimension_numbers<[1], [1], [0], [0], [0, 0, 1, 0], [], []>} : vector<8x8xbf16>, vector<8x8xbf16>, vector<8x8xf32> -> vector<8x8xf32>
    %cst_90 = arith.constant 0.353553385 : f32
    %206 = vector.broadcast %cst_90 : f32 to vector<8x8xf32>
    %207 = arith.mulf %205, %206 : vector<8x8xf32>
    %208 = arith.addf %207, %7 : vector<8x8xf32>
    %cst_91 = arith.constant dense<0xFF800000> : vector<8xf32>
    %209 = vector.multi_reduction <maximumf>, %208, %cst_91 [1] : vector<8x8xf32> to vector<8xf32>
    %210 = vector.shape_cast %209 : vector<8xf32> to vector<8x1xf32>
    %211 = vector.broadcast %210 : vector<8x1xf32> to vector<8x8xf32>
    %212 = arith.subf %208, %211 : vector<8x8xf32>
    %213 = math.exp %212 : vector<8x8xf32>
    %cst_92 = arith.constant dense<0.000000e+00> : vector<8xf32>
    %214 = vector.multi_reduction <add>, %213, %cst_92 [1] : vector<8x8xf32> to vector<8xf32>
    %215 = vector.shape_cast %214 : vector<8xf32> to vector<8x1xf32>
    %216 = tpu.reciprocal %215 {approx = true} : vector<8x1xf32> -> vector<8x1xf32>
    %217 = vector.broadcast %216 : vector<8x1xf32> to vector<8x8xf32>
    %218 = arith.mulf %213, %217 : vector<8x8xf32>
    %219 = vector.extract_strided_slice %33 {offsets = [0, 8], sizes = [8, 8], strides = [1, 1]} : vector<8x32xf32> to vector<8x8xf32>
    %220 = arith.truncf %218 : vector<8x8xf32> to vector<8x8xbf16>
    %221 = arith.truncf %219 : vector<8x8xf32> to vector<8x8xbf16>
    %cst_93 = arith.constant dense<0.000000e+00> : vector<8x8xf32>
    %222 = tpu.matmul %220, %221, %cst_93 {dimension_numbers = #tpu.dot_dimension_numbers<[1], [0], [0], [1], [0, 0, 1, 1], [], []>} : vector<8x8xbf16>, vector<8x8xbf16>, vector<8x8xf32> -> vector<8x8xf32>
    %223 = vector.extract_strided_slice %178 {offsets = [0, 16], sizes = [8, 8], strides = [1, 1]} : vector<8x32xf32> to vector<8x8xf32>
    %224 = vector.extract_strided_slice %32 {offsets = [0, 16], sizes = [8, 8], strides = [1, 1]} : vector<8x32xf32> to vector<8x8xf32>
    %225 = arith.truncf %223 : vector<8x8xf32> to vector<8x8xbf16>
    %226 = arith.truncf %224 : vector<8x8xf32> to vector<8x8xbf16>
    %cst_94 = arith.constant dense<0.000000e+00> : vector<8x8xf32>
    %227 = tpu.matmul %225, %226, %cst_94 {dimension_numbers = #tpu.dot_dimension_numbers<[1], [1], [0], [0], [0, 0, 1, 0], [], []>} : vector<8x8xbf16>, vector<8x8xbf16>, vector<8x8xf32> -> vector<8x8xf32>
    %cst_95 = arith.constant 0.353553385 : f32
    %228 = vector.broadcast %cst_95 : f32 to vector<8x8xf32>
    %229 = arith.mulf %227, %228 : vector<8x8xf32>
    %230 = arith.addf %229, %7 : vector<8x8xf32>
    %cst_96 = arith.constant dense<0xFF800000> : vector<8xf32>
    %231 = vector.multi_reduction <maximumf>, %230, %cst_96 [1] : vector<8x8xf32> to vector<8xf32>
    %232 = vector.shape_cast %231 : vector<8xf32> to vector<8x1xf32>
    %233 = vector.broadcast %232 : vector<8x1xf32> to vector<8x8xf32>
    %234 = arith.subf %230, %233 : vector<8x8xf32>
    %235 = math.exp %234 : vector<8x8xf32>
    %cst_97 = arith.constant dense<0.000000e+00> : vector<8xf32>
    %236 = vector.multi_reduction <add>, %235, %cst_97 [1] : vector<8x8xf32> to vector<8xf32>
    %237 = vector.shape_cast %236 : vector<8xf32> to vector<8x1xf32>
    %238 = tpu.reciprocal %237 {approx = true} : vector<8x1xf32> -> vector<8x1xf32>
    %239 = vector.broadcast %238 : vector<8x1xf32> to vector<8x8xf32>
    %240 = arith.mulf %235, %239 : vector<8x8xf32>
    %241 = vector.extract_strided_slice %33 {offsets = [0, 16], sizes = [8, 8], strides = [1, 1]} : vector<8x32xf32> to vector<8x8xf32>
    %242 = arith.truncf %240 : vector<8x8xf32> to vector<8x8xbf16>
    %243 = arith.truncf %241 : vector<8x8xf32> to vector<8x8xbf16>
    %cst_98 = arith.constant dense<0.000000e+00> : vector<8x8xf32>
    %244 = tpu.matmul %242, %243, %cst_98 {dimension_numbers = #tpu.dot_dimension_numbers<[1], [0], [0], [1], [0, 0, 1, 1], [], []>} : vector<8x8xbf16>, vector<8x8xbf16>, vector<8x8xf32> -> vector<8x8xf32>
    %245 = vector.extract_strided_slice %178 {offsets = [0, 24], sizes = [8, 8], strides = [1, 1]} : vector<8x32xf32> to vector<8x8xf32>
    %246 = vector.extract_strided_slice %32 {offsets = [0, 24], sizes = [8, 8], strides = [1, 1]} : vector<8x32xf32> to vector<8x8xf32>
    %247 = arith.truncf %245 : vector<8x8xf32> to vector<8x8xbf16>
    %248 = arith.truncf %246 : vector<8x8xf32> to vector<8x8xbf16>
    %cst_99 = arith.constant dense<0.000000e+00> : vector<8x8xf32>
    %249 = tpu.matmul %247, %248, %cst_99 {dimension_numbers = #tpu.dot_dimension_numbers<[1], [1], [0], [0], [0, 0, 1, 0], [], []>} : vector<8x8xbf16>, vector<8x8xbf16>, vector<8x8xf32> -> vector<8x8xf32>
    %cst_100 = arith.constant 0.353553385 : f32
    %250 = vector.broadcast %cst_100 : f32 to vector<8x8xf32>
    %251 = arith.mulf %249, %250 : vector<8x8xf32>
    %252 = arith.addf %251, %7 : vector<8x8xf32>
    %cst_101 = arith.constant dense<0xFF800000> : vector<8xf32>
    %253 = vector.multi_reduction <maximumf>, %252, %cst_101 [1] : vector<8x8xf32> to vector<8xf32>
    %254 = vector.shape_cast %253 : vector<8xf32> to vector<8x1xf32>
    %255 = vector.broadcast %254 : vector<8x1xf32> to vector<8x8xf32>
    %256 = arith.subf %252, %255 : vector<8x8xf32>
    %257 = math.exp %256 : vector<8x8xf32>
    %cst_102 = arith.constant dense<0.000000e+00> : vector<8xf32>
    %258 = vector.multi_reduction <add>, %257, %cst_102 [1] : vector<8x8xf32> to vector<8xf32>
    %259 = vector.shape_cast %258 : vector<8xf32> to vector<8x1xf32>
    %260 = tpu.reciprocal %259 {approx = true} : vector<8x1xf32> -> vector<8x1xf32>
    %261 = vector.broadcast %260 : vector<8x1xf32> to vector<8x8xf32>
    %262 = arith.mulf %257, %261 : vector<8x8xf32>
    %263 = vector.extract_strided_slice %33 {offsets = [0, 24], sizes = [8, 8], strides = [1, 1]} : vector<8x32xf32> to vector<8x8xf32>
    %264 = arith.truncf %262 : vector<8x8xf32> to vector<8x8xbf16>
    %265 = arith.truncf %263 : vector<8x8xf32> to vector<8x8xbf16>
    %cst_103 = arith.constant dense<0.000000e+00> : vector<8x8xf32>
    %266 = tpu.matmul %264, %265, %cst_103 {dimension_numbers = #tpu.dot_dimension_numbers<[1], [0], [0], [1], [0, 0, 1, 1], [], []>} : vector<8x8xbf16>, vector<8x8xbf16>, vector<8x8xf32> -> vector<8x8xf32>
    %267 = tpu.concatenate %200, %222, %244, %266 in 1 : vector<8x8xf32>, vector<8x8xf32>, vector<8x8xf32>, vector<8x8xf32> -> vector<8x32xf32>
    %268 = arith.truncf %267 : vector<8x32xf32> to vector<8x32xbf16>
    %cst_104 = arith.constant dense<0.000000e+00> : vector<8x32xf32>
    %269 = tpu.matmul %268, %20, %cst_104 {dimension_numbers = #tpu.dot_dimension_numbers<[1], [0], [0], [1], [0, 0, 1, 1], [], []>} : vector<8x32xbf16>, vector<32x32xbf16>, vector<8x32xf32> -> vector<8x32xf32>
    %270 = arith.addf %154, %269 : vector<8x32xf32>
    %271 = vector.broadcast %21 : vector<1x32xf32> to vector<8x32xf32>
    %272 = arith.addf %270, %271 : vector<8x32xf32>
    %cst_105 = arith.constant dense<0.000000e+00> : vector<8xf32>
    %273 = vector.multi_reduction <add>, %272, %cst_105 [1] : vector<8x32xf32> to vector<8xf32>
    %274 = vector.shape_cast %273 : vector<8xf32> to vector<8x1xf32>
    %cst_106 = arith.constant 3.200000e+01 : f32
    %275 = vector.broadcast %cst_106 : f32 to vector<8x1xf32>
    %276 = arith.divf %274, %275 : vector<8x1xf32>
    %277 = vector.broadcast %276 : vector<8x1xf32> to vector<8x32xf32>
    %278 = arith.subf %272, %277 : vector<8x32xf32>
    %279 = arith.mulf %278, %278 : vector<8x32xf32>
    %cst_107 = arith.constant dense<0.000000e+00> : vector<8xf32>
    %280 = vector.multi_reduction <add>, %279, %cst_107 [1] : vector<8x32xf32> to vector<8xf32>
    %281 = vector.shape_cast %280 : vector<8xf32> to vector<8x1xf32>
    %cst_108 = arith.constant 3.100000e+01 : f32
    %282 = vector.broadcast %cst_108 : f32 to vector<8x1xf32>
    %283 = arith.divf %281, %282 : vector<8x1xf32>
    %284 = vector.broadcast %22 : vector<1x32xf32> to vector<8x32xf32>
    %285 = arith.mulf %284, %278 : vector<8x32xf32>
    %286 = math.sqrt %283 : vector<8x1xf32>
    %cst_109 = arith.constant 9.99999997E-7 : f32
    %287 = vector.broadcast %cst_109 : f32 to vector<8x1xf32>
    %288 = arith.addf %286, %287 : vector<8x1xf32>
    %289 = vector.broadcast %288 : vector<8x1xf32> to vector<8x32xf32>
    %290 = arith.divf %285, %289 : vector<8x32xf32>
    %291 = vector.broadcast %23 : vector<1x32xf32> to vector<8x32xf32>
    %292 = arith.addf %290, %291 : vector<8x32xf32>
    %293 = arith.truncf %292 : vector<8x32xf32> to vector<8x32xbf16>
    %cst_110 = arith.constant dense<0.000000e+00> : vector<8x128xf32>
    %294 = tpu.matmul %293, %24, %cst_110 {dimension_numbers = #tpu.dot_dimension_numbers<[1], [0], [0], [1], [0, 0, 1, 1], [], []>} : vector<8x32xbf16>, vector<32x128xbf16>, vector<8x128xf32> -> vector<8x128xf32>
    %295 = vector.broadcast %25 : vector<1x128xf32> to vector<8x128xf32>
    %296 = arith.addf %294, %295 : vector<8x128xf32>
    %cst_111 = arith.constant 0.000000e+00 : f32
    %297 = vector.broadcast %cst_111 : f32 to vector<8x128xf32>
    %298 = arith.maximumf %296, %297 : vector<8x128xf32>
    %299 = arith.truncf %298 : vector<8x128xf32> to vector<8x128xbf16>
    %cst_112 = arith.constant dense<0.000000e+00> : vector<8x32xf32>
    %300 = tpu.matmul %299, %26, %cst_112 {dimension_numbers = #tpu.dot_dimension_numbers<[1], [0], [0], [1], [0, 0, 1, 1], [], []>} : vector<8x128xbf16>, vector<128x32xbf16>, vector<8x32xf32> -> vector<8x32xf32>
    %301 = arith.addf %272, %300 : vector<8x32xf32>
    %302 = vector.broadcast %27 : vector<1x32xf32> to vector<8x32xf32>
    %303 = arith.addf %301, %302 : vector<8x32xf32>
    %cst_113 = arith.constant dense<0.000000e+00> : vector<8xf32>
    %304 = vector.multi_reduction <add>, %303, %cst_113 [1] : vector<8x32xf32> to vector<8xf32>
    %305 = vector.shape_cast %304 : vector<8xf32> to vector<8x1xf32>
    %cst_114 = arith.constant 3.200000e+01 : f32
    %306 = vector.broadcast %cst_114 : f32 to vector<8x1xf32>
    %307 = arith.divf %305, %306 : vector<8x1xf32>
    %308 = vector.broadcast %307 : vector<8x1xf32> to vector<8x32xf32>
    %309 = arith.subf %303, %308 : vector<8x32xf32>
    %310 = arith.mulf %309, %309 : vector<8x32xf32>
    %cst_115 = arith.constant dense<0.000000e+00> : vector<8xf32>
    %311 = vector.multi_reduction <add>, %310, %cst_115 [1] : vector<8x32xf32> to vector<8xf32>
    %312 = vector.shape_cast %311 : vector<8xf32> to vector<8x1xf32>
    %cst_116 = arith.constant 3.100000e+01 : f32
    %313 = vector.broadcast %cst_116 : f32 to vector<8x1xf32>
    %314 = arith.divf %312, %313 : vector<8x1xf32>
    %315 = vector.broadcast %8 : vector<1x32xf32> to vector<8x32xf32>
    %316 = arith.mulf %315, %309 : vector<8x32xf32>
    %317 = math.sqrt %314 : vector<8x1xf32>
    %cst_117 = arith.constant 9.99999997E-7 : f32
    %318 = vector.broadcast %cst_117 : f32 to vector<8x1xf32>
    %319 = arith.addf %317, %318 : vector<8x1xf32>
    %320 = vector.broadcast %319 : vector<8x1xf32> to vector<8x32xf32>
    %321 = arith.divf %316, %320 : vector<8x32xf32>
    %322 = vector.broadcast %9 : vector<1x32xf32> to vector<8x32xf32>
    %323 = arith.addf %321, %322 : vector<8x32xf32>
    %324 = arith.truncf %323 : vector<8x32xf32> to vector<8x32xbf16>
    %cst_118 = arith.constant dense<0.000000e+00> : vector<8x96xf32>
    %325 = tpu.matmul %324, %10, %cst_118 {dimension_numbers = #tpu.dot_dimension_numbers<[1], [0], [0], [1], [0, 0, 1, 1], [], []>} : vector<8x32xbf16>, vector<32x96xbf16>, vector<8x96xf32> -> vector<8x96xf32>
    %326 = vector.broadcast %11 : vector<1x96xf32> to vector<8x96xf32>
    %327 = arith.addf %325, %326 : vector<8x96xf32>
    %328 = vector.extract_strided_slice %327 {offsets = [0, 0], sizes = [8, 32], strides = [1, 1]} : vector<8x96xf32> to vector<8x32xf32>
    %329 = vector.extract_strided_slice %327 {offsets = [0, 32], sizes = [8, 32], strides = [1, 1]} : vector<8x96xf32> to vector<8x32xf32>
    %330 = vector.extract_strided_slice %327 {offsets = [0, 64], sizes = [8, 32], strides = [1, 1]} : vector<8x96xf32> to vector<8x32xf32>
    %331 = vector.extract_strided_slice %328 {offsets = [0, 0], sizes = [8, 8], strides = [1, 1]} : vector<8x32xf32> to vector<8x8xf32>
    %332 = vector.extract_strided_slice %329 {offsets = [0, 0], sizes = [8, 8], strides = [1, 1]} : vector<8x32xf32> to vector<8x8xf32>
    %333 = arith.truncf %331 : vector<8x8xf32> to vector<8x8xbf16>
    %334 = arith.truncf %332 : vector<8x8xf32> to vector<8x8xbf16>
    %cst_119 = arith.constant dense<0.000000e+00> : vector<8x8xf32>
    %335 = tpu.matmul %333, %334, %cst_119 {dimension_numbers = #tpu.dot_dimension_numbers<[1], [1], [0], [0], [0, 0, 1, 0], [], []>} : vector<8x8xbf16>, vector<8x8xbf16>, vector<8x8xf32> -> vector<8x8xf32>
    %cst_120 = arith.constant 0.353553385 : f32
    %336 = vector.broadcast %cst_120 : f32 to vector<8x8xf32>
    %337 = arith.mulf %335, %336 : vector<8x8xf32>
    %338 = arith.addf %337, %5 : vector<8x8xf32>
    %cst_121 = arith.constant dense<0xFF800000> : vector<8xf32>
    %339 = vector.multi_reduction <maximumf>, %338, %cst_121 [1] : vector<8x8xf32> to vector<8xf32>
    %340 = vector.shape_cast %339 : vector<8xf32> to vector<8x1xf32>
    %341 = vector.broadcast %340 : vector<8x1xf32> to vector<8x8xf32>
    %342 = arith.subf %338, %341 : vector<8x8xf32>
    %343 = math.exp %342 : vector<8x8xf32>
    %cst_122 = arith.constant dense<0.000000e+00> : vector<8xf32>
    %344 = vector.multi_reduction <add>, %343, %cst_122 [1] : vector<8x8xf32> to vector<8xf32>
    %345 = vector.shape_cast %344 : vector<8xf32> to vector<8x1xf32>
    %346 = tpu.reciprocal %345 {approx = true} : vector<8x1xf32> -> vector<8x1xf32>
    %347 = vector.broadcast %346 : vector<8x1xf32> to vector<8x8xf32>
    %348 = arith.mulf %343, %347 : vector<8x8xf32>
    %349 = vector.extract_strided_slice %330 {offsets = [0, 0], sizes = [8, 8], strides = [1, 1]} : vector<8x32xf32> to vector<8x8xf32>
    %350 = arith.truncf %348 : vector<8x8xf32> to vector<8x8xbf16>
    %351 = arith.truncf %349 : vector<8x8xf32> to vector<8x8xbf16>
    %cst_123 = arith.constant dense<0.000000e+00> : vector<8x8xf32>
    %352 = tpu.matmul %350, %351, %cst_123 {dimension_numbers = #tpu.dot_dimension_numbers<[1], [0], [0], [1], [0, 0, 1, 1], [], []>} : vector<8x8xbf16>, vector<8x8xbf16>, vector<8x8xf32> -> vector<8x8xf32>
    %353 = vector.extract_strided_slice %328 {offsets = [0, 8], sizes = [8, 8], strides = [1, 1]} : vector<8x32xf32> to vector<8x8xf32>
    %354 = vector.extract_strided_slice %329 {offsets = [0, 8], sizes = [8, 8], strides = [1, 1]} : vector<8x32xf32> to vector<8x8xf32>
    %355 = arith.truncf %353 : vector<8x8xf32> to vector<8x8xbf16>
    %356 = arith.truncf %354 : vector<8x8xf32> to vector<8x8xbf16>
    %cst_124 = arith.constant dense<0.000000e+00> : vector<8x8xf32>
    %357 = tpu.matmul %355, %356, %cst_124 {dimension_numbers = #tpu.dot_dimension_numbers<[1], [1], [0], [0], [0, 0, 1, 0], [], []>} : vector<8x8xbf16>, vector<8x8xbf16>, vector<8x8xf32> -> vector<8x8xf32>
    %cst_125 = arith.constant 0.353553385 : f32
    %358 = vector.broadcast %cst_125 : f32 to vector<8x8xf32>
    %359 = arith.mulf %357, %358 : vector<8x8xf32>
    %360 = arith.addf %359, %5 : vector<8x8xf32>
    %cst_126 = arith.constant dense<0xFF800000> : vector<8xf32>
    %361 = vector.multi_reduction <maximumf>, %360, %cst_126 [1] : vector<8x8xf32> to vector<8xf32>
    %362 = vector.shape_cast %361 : vector<8xf32> to vector<8x1xf32>
    %363 = vector.broadcast %362 : vector<8x1xf32> to vector<8x8xf32>
    %364 = arith.subf %360, %363 : vector<8x8xf32>
    %365 = math.exp %364 : vector<8x8xf32>
    %cst_127 = arith.constant dense<0.000000e+00> : vector<8xf32>
    %366 = vector.multi_reduction <add>, %365, %cst_127 [1] : vector<8x8xf32> to vector<8xf32>
    %367 = vector.shape_cast %366 : vector<8xf32> to vector<8x1xf32>
    %368 = tpu.reciprocal %367 {approx = true} : vector<8x1xf32> -> vector<8x1xf32>
    %369 = vector.broadcast %368 : vector<8x1xf32> to vector<8x8xf32>
    %370 = arith.mulf %365, %369 : vector<8x8xf32>
    %371 = vector.extract_strided_slice %330 {offsets = [0, 8], sizes = [8, 8], strides = [1, 1]} : vector<8x32xf32> to vector<8x8xf32>
    %372 = arith.truncf %370 : vector<8x8xf32> to vector<8x8xbf16>
    %373 = arith.truncf %371 : vector<8x8xf32> to vector<8x8xbf16>
    %cst_128 = arith.constant dense<0.000000e+00> : vector<8x8xf32>
    %374 = tpu.matmul %372, %373, %cst_128 {dimension_numbers = #tpu.dot_dimension_numbers<[1], [0], [0], [1], [0, 0, 1, 1], [], []>} : vector<8x8xbf16>, vector<8x8xbf16>, vector<8x8xf32> -> vector<8x8xf32>
    %375 = vector.extract_strided_slice %328 {offsets = [0, 16], sizes = [8, 8], strides = [1, 1]} : vector<8x32xf32> to vector<8x8xf32>
    %376 = vector.extract_strided_slice %329 {offsets = [0, 16], sizes = [8, 8], strides = [1, 1]} : vector<8x32xf32> to vector<8x8xf32>
    %377 = arith.truncf %375 : vector<8x8xf32> to vector<8x8xbf16>
    %378 = arith.truncf %376 : vector<8x8xf32> to vector<8x8xbf16>
    %cst_129 = arith.constant dense<0.000000e+00> : vector<8x8xf32>
    %379 = tpu.matmul %377, %378, %cst_129 {dimension_numbers = #tpu.dot_dimension_numbers<[1], [1], [0], [0], [0, 0, 1, 0], [], []>} : vector<8x8xbf16>, vector<8x8xbf16>, vector<8x8xf32> -> vector<8x8xf32>
    %cst_130 = arith.constant 0.353553385 : f32
    %380 = vector.broadcast %cst_130 : f32 to vector<8x8xf32>
    %381 = arith.mulf %379, %380 : vector<8x8xf32>
    %382 = arith.addf %381, %5 : vector<8x8xf32>
    %cst_131 = arith.constant dense<0xFF800000> : vector<8xf32>
    %383 = vector.multi_reduction <maximumf>, %382, %cst_131 [1] : vector<8x8xf32> to vector<8xf32>
    %384 = vector.shape_cast %383 : vector<8xf32> to vector<8x1xf32>
    %385 = vector.broadcast %384 : vector<8x1xf32> to vector<8x8xf32>
    %386 = arith.subf %382, %385 : vector<8x8xf32>
    %387 = math.exp %386 : vector<8x8xf32>
    %cst_132 = arith.constant dense<0.000000e+00> : vector<8xf32>
    %388 = vector.multi_reduction <add>, %387, %cst_132 [1] : vector<8x8xf32> to vector<8xf32>
    %389 = vector.shape_cast %388 : vector<8xf32> to vector<8x1xf32>
    %390 = tpu.reciprocal %389 {approx = true} : vector<8x1xf32> -> vector<8x1xf32>
    %391 = vector.broadcast %390 : vector<8x1xf32> to vector<8x8xf32>
    %392 = arith.mulf %387, %391 : vector<8x8xf32>
    %393 = vector.extract_strided_slice %330 {offsets = [0, 16], sizes = [8, 8], strides = [1, 1]} : vector<8x32xf32> to vector<8x8xf32>
    %394 = arith.truncf %392 : vector<8x8xf32> to vector<8x8xbf16>
    %395 = arith.truncf %393 : vector<8x8xf32> to vector<8x8xbf16>
    %cst_133 = arith.constant dense<0.000000e+00> : vector<8x8xf32>
    %396 = tpu.matmul %394, %395, %cst_133 {dimension_numbers = #tpu.dot_dimension_numbers<[1], [0], [0], [1], [0, 0, 1, 1], [], []>} : vector<8x8xbf16>, vector<8x8xbf16>, vector<8x8xf32> -> vector<8x8xf32>
    %397 = vector.extract_strided_slice %328 {offsets = [0, 24], sizes = [8, 8], strides = [1, 1]} : vector<8x32xf32> to vector<8x8xf32>
    %398 = vector.extract_strided_slice %329 {offsets = [0, 24], sizes = [8, 8], strides = [1, 1]} : vector<8x32xf32> to vector<8x8xf32>
    %399 = arith.truncf %397 : vector<8x8xf32> to vector<8x8xbf16>
    %400 = arith.truncf %398 : vector<8x8xf32> to vector<8x8xbf16>
    %cst_134 = arith.constant dense<0.000000e+00> : vector<8x8xf32>
    %401 = tpu.matmul %399, %400, %cst_134 {dimension_numbers = #tpu.dot_dimension_numbers<[1], [1], [0], [0], [0, 0, 1, 0], [], []>} : vector<8x8xbf16>, vector<8x8xbf16>, vector<8x8xf32> -> vector<8x8xf32>
    %cst_135 = arith.constant 0.353553385 : f32
    %402 = vector.broadcast %cst_135 : f32 to vector<8x8xf32>
    %403 = arith.mulf %401, %402 : vector<8x8xf32>
    %404 = arith.addf %403, %5 : vector<8x8xf32>
    %cst_136 = arith.constant dense<0xFF800000> : vector<8xf32>
    %405 = vector.multi_reduction <maximumf>, %404, %cst_136 [1] : vector<8x8xf32> to vector<8xf32>
    %406 = vector.shape_cast %405 : vector<8xf32> to vector<8x1xf32>
    %407 = vector.broadcast %406 : vector<8x1xf32> to vector<8x8xf32>
    %408 = arith.subf %404, %407 : vector<8x8xf32>
    %409 = math.exp %408 : vector<8x8xf32>
    %cst_137 = arith.constant dense<0.000000e+00> : vector<8xf32>
    %410 = vector.multi_reduction <add>, %409, %cst_137 [1] : vector<8x8xf32> to vector<8xf32>
    %411 = vector.shape_cast %410 : vector<8xf32> to vector<8x1xf32>
    %412 = tpu.reciprocal %411 {approx = true} : vector<8x1xf32> -> vector<8x1xf32>
    %413 = vector.broadcast %412 : vector<8x1xf32> to vector<8x8xf32>
    %414 = arith.mulf %409, %413 : vector<8x8xf32>
    %415 = vector.extract_strided_slice %330 {offsets = [0, 24], sizes = [8, 8], strides = [1, 1]} : vector<8x32xf32> to vector<8x8xf32>
    %416 = arith.truncf %414 : vector<8x8xf32> to vector<8x8xbf16>
    %417 = arith.truncf %415 : vector<8x8xf32> to vector<8x8xbf16>
    %cst_138 = arith.constant dense<0.000000e+00> : vector<8x8xf32>
    %418 = tpu.matmul %416, %417, %cst_138 {dimension_numbers = #tpu.dot_dimension_numbers<[1], [0], [0], [1], [0, 0, 1, 1], [], []>} : vector<8x8xbf16>, vector<8x8xbf16>, vector<8x8xf32> -> vector<8x8xf32>
    %419 = tpu.concatenate %352, %374, %396, %418 in 1 : vector<8x8xf32>, vector<8x8xf32>, vector<8x8xf32>, vector<8x8xf32> -> vector<8x32xf32>
    %420 = arith.truncf %419 : vector<8x32xf32> to vector<8x32xbf16>
    %cst_139 = arith.constant dense<0.000000e+00> : vector<8x32xf32>
    %421 = tpu.matmul %420, %12, %cst_139 {dimension_numbers = #tpu.dot_dimension_numbers<[1], [0], [0], [1], [0, 0, 1, 1], [], []>} : vector<8x32xbf16>, vector<32x32xbf16>, vector<8x32xf32> -> vector<8x32xf32>
    %422 = arith.addf %303, %421 : vector<8x32xf32>
    %423 = vector.broadcast %13 : vector<1x32xf32> to vector<8x32xf32>
    %424 = arith.addf %422, %423 : vector<8x32xf32>
    %cst_140 = arith.constant dense<0.000000e+00> : vector<8xf32>
    %425 = vector.multi_reduction <add>, %424, %cst_140 [1] : vector<8x32xf32> to vector<8xf32>
    %426 = vector.shape_cast %425 : vector<8xf32> to vector<8x1xf32>
    %cst_141 = arith.constant 3.200000e+01 : f32
    %427 = vector.broadcast %cst_141 : f32 to vector<8x1xf32>
    %428 = arith.divf %426, %427 : vector<8x1xf32>
    %429 = vector.broadcast %428 : vector<8x1xf32> to vector<8x32xf32>
    %430 = arith.subf %424, %429 : vector<8x32xf32>
    %431 = arith.mulf %430, %430 : vector<8x32xf32>
    %cst_142 = arith.constant dense<0.000000e+00> : vector<8xf32>
    %432 = vector.multi_reduction <add>, %431, %cst_142 [1] : vector<8x32xf32> to vector<8xf32>
    %433 = vector.shape_cast %432 : vector<8xf32> to vector<8x1xf32>
    %cst_143 = arith.constant 3.100000e+01 : f32
    %434 = vector.broadcast %cst_143 : f32 to vector<8x1xf32>
    %435 = arith.divf %433, %434 : vector<8x1xf32>
    %436 = vector.broadcast %14 : vector<1x32xf32> to vector<8x32xf32>
    %437 = arith.mulf %436, %430 : vector<8x32xf32>
    %438 = math.sqrt %435 : vector<8x1xf32>
    %cst_144 = arith.constant 9.99999997E-7 : f32
    %439 = vector.broadcast %cst_144 : f32 to vector<8x1xf32>
    %440 = arith.addf %438, %439 : vector<8x1xf32>
    %441 = vector.broadcast %440 : vector<8x1xf32> to vector<8x32xf32>
    %442 = arith.divf %437, %441 : vector<8x32xf32>
    %443 = vector.broadcast %15 : vector<1x32xf32> to vector<8x32xf32>
    %444 = arith.addf %442, %443 : vector<8x32xf32>
    %445 = arith.truncf %444 : vector<8x32xf32> to vector<8x32xbf16>
    %cst_145 = arith.constant dense<0.000000e+00> : vector<8x32xf32>
    %446 = tpu.matmul %445, %16, %cst_145 {dimension_numbers = #tpu.dot_dimension_numbers<[1], [0], [0], [1], [0, 0, 1, 1], [], []>} : vector<8x32xbf16>, vector<32x32xbf16>, vector<8x32xf32> -> vector<8x32xf32>
    %447 = vector.broadcast %17 : vector<1x32xf32> to vector<8x32xf32>
    %448 = arith.addf %446, %447 : vector<8x32xf32>
    %449 = vector.extract_strided_slice %448 {offsets = [0, 0], sizes = [8, 8], strides = [1, 1]} : vector<8x32xf32> to vector<8x8xf32>
    %450 = vector.extract_strided_slice %32 {offsets = [0, 0], sizes = [8, 8], strides = [1, 1]} : vector<8x32xf32> to vector<8x8xf32>
    %451 = arith.truncf %449 : vector<8x8xf32> to vector<8x8xbf16>
    %452 = arith.truncf %450 : vector<8x8xf32> to vector<8x8xbf16>
    %cst_146 = arith.constant dense<0.000000e+00> : vector<8x8xf32>
    %453 = tpu.matmul %451, %452, %cst_146 {dimension_numbers = #tpu.dot_dimension_numbers<[1], [1], [0], [0], [0, 0, 1, 0], [], []>} : vector<8x8xbf16>, vector<8x8xbf16>, vector<8x8xf32> -> vector<8x8xf32>
    %cst_147 = arith.constant 0.353553385 : f32
    %454 = vector.broadcast %cst_147 : f32 to vector<8x8xf32>
    %455 = arith.mulf %453, %454 : vector<8x8xf32>
    %456 = arith.addf %455, %7 : vector<8x8xf32>
    %cst_148 = arith.constant dense<0xFF800000> : vector<8xf32>
    %457 = vector.multi_reduction <maximumf>, %456, %cst_148 [1] : vector<8x8xf32> to vector<8xf32>
    %458 = vector.shape_cast %457 : vector<8xf32> to vector<8x1xf32>
    %459 = vector.broadcast %458 : vector<8x1xf32> to vector<8x8xf32>
    %460 = arith.subf %456, %459 : vector<8x8xf32>
    %461 = math.exp %460 : vector<8x8xf32>
    %cst_149 = arith.constant dense<0.000000e+00> : vector<8xf32>
    %462 = vector.multi_reduction <add>, %461, %cst_149 [1] : vector<8x8xf32> to vector<8xf32>
    %463 = vector.shape_cast %462 : vector<8xf32> to vector<8x1xf32>
    %464 = tpu.reciprocal %463 {approx = true} : vector<8x1xf32> -> vector<8x1xf32>
    %465 = vector.broadcast %464 : vector<8x1xf32> to vector<8x8xf32>
    %466 = arith.mulf %461, %465 : vector<8x8xf32>
    %467 = vector.extract_strided_slice %33 {offsets = [0, 0], sizes = [8, 8], strides = [1, 1]} : vector<8x32xf32> to vector<8x8xf32>
    %468 = arith.truncf %466 : vector<8x8xf32> to vector<8x8xbf16>
    %469 = arith.truncf %467 : vector<8x8xf32> to vector<8x8xbf16>
    %cst_150 = arith.constant dense<0.000000e+00> : vector<8x8xf32>
    %470 = tpu.matmul %468, %469, %cst_150 {dimension_numbers = #tpu.dot_dimension_numbers<[1], [0], [0], [1], [0, 0, 1, 1], [], []>} : vector<8x8xbf16>, vector<8x8xbf16>, vector<8x8xf32> -> vector<8x8xf32>
    %471 = vector.extract_strided_slice %448 {offsets = [0, 8], sizes = [8, 8], strides = [1, 1]} : vector<8x32xf32> to vector<8x8xf32>
    %472 = vector.extract_strided_slice %32 {offsets = [0, 8], sizes = [8, 8], strides = [1, 1]} : vector<8x32xf32> to vector<8x8xf32>
    %473 = arith.truncf %471 : vector<8x8xf32> to vector<8x8xbf16>
    %474 = arith.truncf %472 : vector<8x8xf32> to vector<8x8xbf16>
    %cst_151 = arith.constant dense<0.000000e+00> : vector<8x8xf32>
    %475 = tpu.matmul %473, %474, %cst_151 {dimension_numbers = #tpu.dot_dimension_numbers<[1], [1], [0], [0], [0, 0, 1, 0], [], []>} : vector<8x8xbf16>, vector<8x8xbf16>, vector<8x8xf32> -> vector<8x8xf32>
    %cst_152 = arith.constant 0.353553385 : f32
    %476 = vector.broadcast %cst_152 : f32 to vector<8x8xf32>
    %477 = arith.mulf %475, %476 : vector<8x8xf32>
    %478 = arith.addf %477, %7 : vector<8x8xf32>
    %cst_153 = arith.constant dense<0xFF800000> : vector<8xf32>
    %479 = vector.multi_reduction <maximumf>, %478, %cst_153 [1] : vector<8x8xf32> to vector<8xf32>
    %480 = vector.shape_cast %479 : vector<8xf32> to vector<8x1xf32>
    %481 = vector.broadcast %480 : vector<8x1xf32> to vector<8x8xf32>
    %482 = arith.subf %478, %481 : vector<8x8xf32>
    %483 = math.exp %482 : vector<8x8xf32>
    %cst_154 = arith.constant dense<0.000000e+00> : vector<8xf32>
    %484 = vector.multi_reduction <add>, %483, %cst_154 [1] : vector<8x8xf32> to vector<8xf32>
    %485 = vector.shape_cast %484 : vector<8xf32> to vector<8x1xf32>
    %486 = tpu.reciprocal %485 {approx = true} : vector<8x1xf32> -> vector<8x1xf32>
    %487 = vector.broadcast %486 : vector<8x1xf32> to vector<8x8xf32>
    %488 = arith.mulf %483, %487 : vector<8x8xf32>
    %489 = vector.extract_strided_slice %33 {offsets = [0, 8], sizes = [8, 8], strides = [1, 1]} : vector<8x32xf32> to vector<8x8xf32>
    %490 = arith.truncf %488 : vector<8x8xf32> to vector<8x8xbf16>
    %491 = arith.truncf %489 : vector<8x8xf32> to vector<8x8xbf16>
    %cst_155 = arith.constant dense<0.000000e+00> : vector<8x8xf32>
    %492 = tpu.matmul %490, %491, %cst_155 {dimension_numbers = #tpu.dot_dimension_numbers<[1], [0], [0], [1], [0, 0, 1, 1], [], []>} : vector<8x8xbf16>, vector<8x8xbf16>, vector<8x8xf32> -> vector<8x8xf32>
    %493 = vector.extract_strided_slice %448 {offsets = [0, 16], sizes = [8, 8], strides = [1, 1]} : vector<8x32xf32> to vector<8x8xf32>
    %494 = vector.extract_strided_slice %32 {offsets = [0, 16], sizes = [8, 8], strides = [1, 1]} : vector<8x32xf32> to vector<8x8xf32>
    %495 = arith.truncf %493 : vector<8x8xf32> to vector<8x8xbf16>
    %496 = arith.truncf %494 : vector<8x8xf32> to vector<8x8xbf16>
    %cst_156 = arith.constant dense<0.000000e+00> : vector<8x8xf32>
    %497 = tpu.matmul %495, %496, %cst_156 {dimension_numbers = #tpu.dot_dimension_numbers<[1], [1], [0], [0], [0, 0, 1, 0], [], []>} : vector<8x8xbf16>, vector<8x8xbf16>, vector<8x8xf32> -> vector<8x8xf32>
    %cst_157 = arith.constant 0.353553385 : f32
    %498 = vector.broadcast %cst_157 : f32 to vector<8x8xf32>
    %499 = arith.mulf %497, %498 : vector<8x8xf32>
    %500 = arith.addf %499, %7 : vector<8x8xf32>
    %cst_158 = arith.constant dense<0xFF800000> : vector<8xf32>
    %501 = vector.multi_reduction <maximumf>, %500, %cst_158 [1] : vector<8x8xf32> to vector<8xf32>
    %502 = vector.shape_cast %501 : vector<8xf32> to vector<8x1xf32>
    %503 = vector.broadcast %502 : vector<8x1xf32> to vector<8x8xf32>
    %504 = arith.subf %500, %503 : vector<8x8xf32>
    %505 = math.exp %504 : vector<8x8xf32>
    %cst_159 = arith.constant dense<0.000000e+00> : vector<8xf32>
    %506 = vector.multi_reduction <add>, %505, %cst_159 [1] : vector<8x8xf32> to vector<8xf32>
    %507 = vector.shape_cast %506 : vector<8xf32> to vector<8x1xf32>
    %508 = tpu.reciprocal %507 {approx = true} : vector<8x1xf32> -> vector<8x1xf32>
    %509 = vector.broadcast %508 : vector<8x1xf32> to vector<8x8xf32>
    %510 = arith.mulf %505, %509 : vector<8x8xf32>
    %511 = vector.extract_strided_slice %33 {offsets = [0, 16], sizes = [8, 8], strides = [1, 1]} : vector<8x32xf32> to vector<8x8xf32>
    %512 = arith.truncf %510 : vector<8x8xf32> to vector<8x8xbf16>
    %513 = arith.truncf %511 : vector<8x8xf32> to vector<8x8xbf16>
    %cst_160 = arith.constant dense<0.000000e+00> : vector<8x8xf32>
    %514 = tpu.matmul %512, %513, %cst_160 {dimension_numbers = #tpu.dot_dimension_numbers<[1], [0], [0], [1], [0, 0, 1, 1], [], []>} : vector<8x8xbf16>, vector<8x8xbf16>, vector<8x8xf32> -> vector<8x8xf32>
    %515 = vector.extract_strided_slice %448 {offsets = [0, 24], sizes = [8, 8], strides = [1, 1]} : vector<8x32xf32> to vector<8x8xf32>
    %516 = vector.extract_strided_slice %32 {offsets = [0, 24], sizes = [8, 8], strides = [1, 1]} : vector<8x32xf32> to vector<8x8xf32>
    %517 = arith.truncf %515 : vector<8x8xf32> to vector<8x8xbf16>
    %518 = arith.truncf %516 : vector<8x8xf32> to vector<8x8xbf16>
    %cst_161 = arith.constant dense<0.000000e+00> : vector<8x8xf32>
    %519 = tpu.matmul %517, %518, %cst_161 {dimension_numbers = #tpu.dot_dimension_numbers<[1], [1], [0], [0], [0, 0, 1, 0], [], []>} : vector<8x8xbf16>, vector<8x8xbf16>, vector<8x8xf32> -> vector<8x8xf32>
    %cst_162 = arith.constant 0.353553385 : f32
    %520 = vector.broadcast %cst_162 : f32 to vector<8x8xf32>
    %521 = arith.mulf %519, %520 : vector<8x8xf32>
    %522 = arith.addf %521, %7 : vector<8x8xf32>
    %cst_163 = arith.constant dense<0xFF800000> : vector<8xf32>
    %523 = vector.multi_reduction <maximumf>, %522, %cst_163 [1] : vector<8x8xf32> to vector<8xf32>
    %524 = vector.shape_cast %523 : vector<8xf32> to vector<8x1xf32>
    %525 = vector.broadcast %524 : vector<8x1xf32> to vector<8x8xf32>
    %526 = arith.subf %522, %525 : vector<8x8xf32>
    %527 = math.exp %526 : vector<8x8xf32>
    %cst_164 = arith.constant dense<0.000000e+00> : vector<8xf32>
    %528 = vector.multi_reduction <add>, %527, %cst_164 [1] : vector<8x8xf32> to vector<8xf32>
    %529 = vector.shape_cast %528 : vector<8xf32> to vector<8x1xf32>
    %530 = tpu.reciprocal %529 {approx = true} : vector<8x1xf32> -> vector<8x1xf32>
    %531 = vector.broadcast %530 : vector<8x1xf32> to vector<8x8xf32>
    %532 = arith.mulf %527, %531 : vector<8x8xf32>
    %533 = vector.extract_strided_slice %33 {offsets = [0, 24], sizes = [8, 8], strides = [1, 1]} : vector<8x32xf32> to vector<8x8xf32>
    %534 = arith.truncf %532 : vector<8x8xf32> to vector<8x8xbf16>
    %535 = arith.truncf %533 : vector<8x8xf32> to vector<8x8xbf16>
    %cst_165 = arith.constant dense<0.000000e+00> : vector<8x8xf32>
    %536 = tpu.matmul %534, %535, %cst_165 {dimension_numbers = #tpu.dot_dimension_numbers<[1], [0], [0], [1], [0, 0, 1, 1], [], []>} : vector<8x8xbf16>, vector<8x8xbf16>, vector<8x8xf32> -> vector<8x8xf32>
    %537 = tpu.concatenate %470, %492, %514, %536 in 1 : vector<8x8xf32>, vector<8x8xf32>, vector<8x8xf32>, vector<8x8xf32> -> vector<8x32xf32>
    %538 = arith.truncf %537 : vector<8x32xf32> to vector<8x32xbf16>
    %cst_166 = arith.constant dense<0.000000e+00> : vector<8x32xf32>
    %539 = tpu.matmul %538, %20, %cst_166 {dimension_numbers = #tpu.dot_dimension_numbers<[1], [0], [0], [1], [0, 0, 1, 1], [], []>} : vector<8x32xbf16>, vector<32x32xbf16>, vector<8x32xf32> -> vector<8x32xf32>
    %540 = arith.addf %424, %539 : vector<8x32xf32>
    %541 = vector.broadcast %21 : vector<1x32xf32> to vector<8x32xf32>
    %542 = arith.addf %540, %541 : vector<8x32xf32>
    %cst_167 = arith.constant dense<0.000000e+00> : vector<8xf32>
    %543 = vector.multi_reduction <add>, %542, %cst_167 [1] : vector<8x32xf32> to vector<8xf32>
    %544 = vector.shape_cast %543 : vector<8xf32> to vector<8x1xf32>
    %cst_168 = arith.constant 3.200000e+01 : f32
    %545 = vector.broadcast %cst_168 : f32 to vector<8x1xf32>
    %546 = arith.divf %544, %545 : vector<8x1xf32>
    %547 = vector.broadcast %546 : vector<8x1xf32> to vector<8x32xf32>
    %548 = arith.subf %542, %547 : vector<8x32xf32>
    %549 = arith.mulf %548, %548 : vector<8x32xf32>
    %cst_169 = arith.constant dense<0.000000e+00> : vector<8xf32>
    %550 = vector.multi_reduction <add>, %549, %cst_169 [1] : vector<8x32xf32> to vector<8xf32>
    %551 = vector.shape_cast %550 : vector<8xf32> to vector<8x1xf32>
    %cst_170 = arith.constant 3.100000e+01 : f32
    %552 = vector.broadcast %cst_170 : f32 to vector<8x1xf32>
    %553 = arith.divf %551, %552 : vector<8x1xf32>
    %554 = vector.broadcast %22 : vector<1x32xf32> to vector<8x32xf32>
    %555 = arith.mulf %554, %548 : vector<8x32xf32>
    %556 = math.sqrt %553 : vector<8x1xf32>
    %cst_171 = arith.constant 9.99999997E-7 : f32
    %557 = vector.broadcast %cst_171 : f32 to vector<8x1xf32>
    %558 = arith.addf %556, %557 : vector<8x1xf32>
    %559 = vector.broadcast %558 : vector<8x1xf32> to vector<8x32xf32>
    %560 = arith.divf %555, %559 : vector<8x32xf32>
    %561 = vector.broadcast %23 : vector<1x32xf32> to vector<8x32xf32>
    %562 = arith.addf %560, %561 : vector<8x32xf32>
    %563 = arith.truncf %562 : vector<8x32xf32> to vector<8x32xbf16>
    %cst_172 = arith.constant dense<0.000000e+00> : vector<8x128xf32>
    %564 = tpu.matmul %563, %24, %cst_172 {dimension_numbers = #tpu.dot_dimension_numbers<[1], [0], [0], [1], [0, 0, 1, 1], [], []>} : vector<8x32xbf16>, vector<32x128xbf16>, vector<8x128xf32> -> vector<8x128xf32>
    %565 = vector.broadcast %25 : vector<1x128xf32> to vector<8x128xf32>
    %566 = arith.addf %564, %565 : vector<8x128xf32>
    %cst_173 = arith.constant 0.000000e+00 : f32
    %567 = vector.broadcast %cst_173 : f32 to vector<8x128xf32>
    %568 = arith.maximumf %566, %567 : vector<8x128xf32>
    %569 = arith.truncf %568 : vector<8x128xf32> to vector<8x128xbf16>
    %cst_174 = arith.constant dense<0.000000e+00> : vector<8x32xf32>
    %570 = tpu.matmul %569, %26, %cst_174 {dimension_numbers = #tpu.dot_dimension_numbers<[1], [0], [0], [1], [0, 0, 1, 1], [], []>} : vector<8x128xbf16>, vector<128x32xbf16>, vector<8x32xf32> -> vector<8x32xf32>
    %571 = arith.addf %542, %570 : vector<8x32xf32>
    %572 = vector.broadcast %27 : vector<1x32xf32> to vector<8x32xf32>
    %573 = arith.addf %571, %572 : vector<8x32xf32>
    %c0_175 = arith.constant 0 : index
    %c0_176 = arith.constant 0 : index
    %574 = vector.load %arg25[%c0_175, %c0_176] : memref<1x32xf32, #tpu.memory_space<vmem>>, vector<1x32xf32>
    %c0_177 = arith.constant 0 : index
    %c0_178 = arith.constant 0 : index
    %575 = vector.load %arg26[%c0_177, %c0_178] : memref<1x32xf32, #tpu.memory_space<vmem>>, vector<1x32xf32>
    %cst_179 = arith.constant dense<0.000000e+00> : vector<8xf32>
    %576 = vector.multi_reduction <add>, %573, %cst_179 [1] : vector<8x32xf32> to vector<8xf32>
    %577 = vector.shape_cast %576 : vector<8xf32> to vector<8x1xf32>
    %cst_180 = arith.constant 3.200000e+01 : f32
    %578 = vector.broadcast %cst_180 : f32 to vector<8x1xf32>
    %579 = arith.divf %577, %578 : vector<8x1xf32>
    %580 = vector.broadcast %579 : vector<8x1xf32> to vector<8x32xf32>
    %581 = arith.subf %573, %580 : vector<8x32xf32>
    %582 = arith.mulf %581, %581 : vector<8x32xf32>
    %cst_181 = arith.constant dense<0.000000e+00> : vector<8xf32>
    %583 = vector.multi_reduction <add>, %582, %cst_181 [1] : vector<8x32xf32> to vector<8xf32>
    %584 = vector.shape_cast %583 : vector<8xf32> to vector<8x1xf32>
    %cst_182 = arith.constant 3.100000e+01 : f32
    %585 = vector.broadcast %cst_182 : f32 to vector<8x1xf32>
    %586 = arith.divf %584, %585 : vector<8x1xf32>
    %587 = vector.broadcast %574 : vector<1x32xf32> to vector<8x32xf32>
    %588 = arith.mulf %587, %581 : vector<8x32xf32>
    %589 = math.sqrt %586 : vector<8x1xf32>
    %cst_183 = arith.constant 9.99999997E-7 : f32
    %590 = vector.broadcast %cst_183 : f32 to vector<8x1xf32>
    %591 = arith.addf %589, %590 : vector<8x1xf32>
    %592 = vector.broadcast %591 : vector<8x1xf32> to vector<8x32xf32>
    %593 = arith.divf %588, %592 : vector<8x32xf32>
    %594 = vector.broadcast %575 : vector<1x32xf32> to vector<8x32xf32>
    %595 = arith.addf %593, %594 : vector<8x32xf32>
    %c0_184 = arith.constant 0 : index
    %c0_185 = arith.constant 0 : index
    %596 = vector.load %arg27[%c0_184, %c0_185] : memref<32x13xbf16, #tpu.memory_space<vmem>>, vector<32x13xbf16>
    %597 = arith.truncf %595 : vector<8x32xf32> to vector<8x32xbf16>
    %cst_186 = arith.constant dense<0.000000e+00> : vector<8x13xf32>
    %598 = tpu.matmul %597, %596, %cst_186 {dimension_numbers = #tpu.dot_dimension_numbers<[1], [0], [0], [1], [0, 0, 1, 1], [], []>} : vector<8x32xbf16>, vector<32x13xbf16>, vector<8x13xf32> -> vector<8x13xf32>
    %c0_187 = arith.constant 0 : index
    %c0_188 = arith.constant 0 : index
    %599 = vector.load %arg28[%c0_187, %c0_188] : memref<1x13xf32, #tpu.memory_space<vmem>>, vector<1x13xf32>
    %600 = vector.broadcast %599 : vector<1x13xf32> to vector<8x13xf32>
    %601 = arith.addf %598, %600 : vector<8x13xf32>
    %c0_189 = arith.constant 0 : index
    %c0_190 = arith.constant 0 : index
    %c0_191 = arith.constant 0 : index
    %602 = vector.load %arg29[%c0_189, %c0_190, %c0_191] : memref<1x8x13xf32, #tpu.memory_space<vmem>>, vector<1x8x13xf32>
    %603 = vector.shape_cast %602 : vector<1x8x13xf32> to vector<8x13xf32>
    %604 = vector.shape_cast %601 : vector<8x13xf32> to vector<1x8x13xf32>
    tpu.vector_store %arg29[%c0_189, %c0_190, %c0_191], %604 {strides = array<i32>} : memref<1x8x13xf32, #tpu.memory_space<vmem>>, vector<1x8x13xf32>,
    return
  }
  func.func @transform_0(%arg0: i32) -> (i32, i32, i32) {
    %c0_i32 = arith.constant 0 : i32
    %c0_i32_0 = arith.constant 0 : i32
    %c0_i32_1 = arith.constant 0 : i32
    return %arg0, %c0_i32, %c0_i32_0 : i32, i32, i32
  }
  func.func @transform_1(%arg0: i32) -> (i32, i32, i32) {
    %c0_i32 = arith.constant 0 : i32
    %c0_i32_0 = arith.constant 0 : i32
    %c0_i32_1 = arith.constant 0 : i32
    return %arg0, %c0_i32, %c0_i32_0 : i32, i32, i32
  }
  func.func @transform_2(%arg0: i32) -> (i32, i32, i32) {
    %c0_i32 = arith.constant 0 : i32
    %c0_i32_0 = arith.constant 0 : i32
    %c0_i32_1 = arith.constant 0 : i32
    return %arg0, %c0_i32, %c0_i32_0 : i32, i32, i32
  }
  func.func @transform_3(%arg0: i32) -> (i32, i32, i32) {
    %c0_i32 = arith.constant 0 : i32
    %c0_i32_0 = arith.constant 0 : i32
    %c0_i32_1 = arith.constant 0 : i32
    return %arg0, %c0_i32, %c0_i32_0 : i32, i32, i32
  }
  func.func @transform_4(%arg0: i32) -> (i32, i32) {
    %c0_i32 = arith.constant 0 : i32
    %c0_i32_0 = arith.constant 0 : i32
    %c0_i32_1 = arith.constant 0 : i32
    return %c0_i32, %c0_i32_0 : i32, i32
  }
  func.func @transform_5(%arg0: i32) -> (i32, i32) {
    %c0_i32 = arith.constant 0 : i32
    %c0_i32_0 = arith.constant 0 : i32
    %c0_i32_1 = arith.constant 0 : i32
    return %c0_i32, %c0_i32_0 : i32, i32
  }
  func.func @transform_6(%arg0: i32) -> (i32, i32) {
    %c0_i32 = arith.constant 0 : i32
    %c0_i32_0 = arith.constant 0 : i32
    %c0_i32_1 = arith.constant 0 : i32
    return %c0_i32, %c0_i32_0 : i32, i32
  }
  func.func @transform_7(%arg0: i32) -> (i32, i32) {
    %c0_i32 = arith.constant 0 : i32
    %c0_i32_0 = arith.constant 0 : i32
    %c0_i32_1 = arith.constant 0 : i32
    return %c0_i32, %c0_i32_0 : i32, i32
  }
  func.func @transform_8(%arg0: i32) -> (i32, i32) {
    %c0_i32 = arith.constant 0 : i32
    %c0_i32_0 = arith.constant 0 : i32
    %c0_i32_1 = arith.constant 0 : i32
    return %c0_i32, %c0_i32_0 : i32, i32
  }
  func.func @transform_9(%arg0: i32) -> (i32, i32) {
    %c0_i32 = arith.constant 0 : i32
    %c0_i32_0 = arith.constant 0 : i32
    %c0_i32_1 = arith.constant 0 : i32
    return %c0_i32, %c0_i32_0 : i32, i32
  }
  func.func @transform_10(%arg0: i32) -> (i32, i32) {
    %c0_i32 = arith.constant 0 : i32
    %c0_i32_0 = arith.constant 0 : i32
    %c0_i32_1 = arith.constant 0 : i32
    return %c0_i32, %c0_i32_0 : i32, i32
  }
  func.func @transform_11(%arg0: i32) -> (i32, i32) {
    %c0_i32 = arith.constant 0 : i32
    %c0_i32_0 = arith.constant 0 : i32
    %c0_i32_1 = arith.constant 0 : i32
    return %c0_i32, %c0_i32_0 : i32, i32
  }
  func.func @transform_12(%arg0: i32) -> (i32, i32) {
    %c0_i32 = arith.constant 0 : i32
    %c0_i32_0 = arith.constant 0 : i32
    %c0_i32_1 = arith.constant 0 : i32
    return %c0_i32, %c0_i32_0 : i32, i32
  }
  func.func @transform_13(%arg0: i32) -> (i32, i32) {
    %c0_i32 = arith.constant 0 : i32
    %c0_i32_0 = arith.constant 0 : i32
    %c0_i32_1 = arith.constant 0 : i32
    return %c0_i32, %c0_i32_0 : i32, i32
  }
  func.func @transform_14(%arg0: i32) -> (i32, i32) {
    %c0_i32 = arith.constant 0 : i32
    %c0_i32_0 = arith.constant 0 : i32
    %c0_i32_1 = arith.constant 0 : i32
    return %c0_i32, %c0_i32_0 : i32, i32
  }
  func.func @transform_15(%arg0: i32) -> (i32, i32) {
    %c0_i32 = arith.constant 0 : i32
    %c0_i32_0 = arith.constant 0 : i32
    %c0_i32_1 = arith.constant 0 : i32
    return %c0_i32, %c0_i32_0 : i32, i32
  }
  func.func @transform_16(%arg0: i32) -> (i32, i32) {
    %c0_i32 = arith.constant 0 : i32
    %c0_i32_0 = arith.constant 0 : i32
    %c0_i32_1 = arith.constant 0 : i32
    return %c0_i32, %c0_i32_0 : i32, i32
  }
  func.func @transform_17(%arg0: i32) -> (i32, i32) {
    %c0_i32 = arith.constant 0 : i32
    %c0_i32_0 = arith.constant 0 : i32
    %c0_i32_1 = arith.constant 0 : i32
    return %c0_i32, %c0_i32_0 : i32, i32
  }
  func.func @transform_18(%arg0: i32) -> (i32, i32) {
    %c0_i32 = arith.constant 0 : i32
    %c0_i32_0 = arith.constant 0 : i32
    %c0_i32_1 = arith.constant 0 : i32
    return %c0_i32, %c0_i32_0 : i32, i32
  }
  func.func @transform_19(%arg0: i32) -> (i32, i32) {
    %c0_i32 = arith.constant 0 : i32
    %c0_i32_0 = arith.constant 0 : i32
    %c0_i32_1 = arith.constant 0 : i32
    return %c0_i32, %c0_i32_0 : i32, i32
  }
  func.func @transform_20(%arg0: i32) -> (i32, i32) {
    %c0_i32 = arith.constant 0 : i32
    %c0_i32_0 = arith.constant 0 : i32
    %c0_i32_1 = arith.constant 0 : i32
    return %c0_i32, %c0_i32_0 : i32, i32
  }
  func.func @transform_21(%arg0: i32) -> (i32, i32) {
    %c0_i32 = arith.constant 0 : i32
    %c0_i32_0 = arith.constant 0 : i32
    %c0_i32_1 = arith.constant 0 : i32
    return %c0_i32, %c0_i32_0 : i32, i32
  }
  func.func @transform_22(%arg0: i32) -> (i32, i32) {
    %c0_i32 = arith.constant 0 : i32
    %c0_i32_0 = arith.constant 0 : i32
    %c0_i32_1 = arith.constant 0 : i32
    return %c0_i32, %c0_i32_0 : i32, i32
  }
  func.func @transform_23(%arg0: i32) -> (i32, i32) {
    %c0_i32 = arith.constant 0 : i32
    %c0_i32_0 = arith.constant 0 : i32
    %c0_i32_1 = arith.constant 0 : i32
    return %c0_i32, %c0_i32_0 : i32, i32
  }
  func.func @transform_24(%arg0: i32) -> (i32, i32) {
    %c0_i32 = arith.constant 0 : i32
    %c0_i32_0 = arith.constant 0 : i32
    %c0_i32_1 = arith.constant 0 : i32
    return %c0_i32, %c0_i32_0 : i32, i32
  }
  func.func @transform_25(%arg0: i32) -> (i32, i32) {
    %c0_i32 = arith.constant 0 : i32
    %c0_i32_0 = arith.constant 0 : i32
    %c0_i32_1 = arith.constant 0 : i32
    return %c0_i32, %c0_i32_0 : i32, i32
  }
  func.func @transform_26(%arg0: i32) -> (i32, i32) {
    %c0_i32 = arith.constant 0 : i32
    %c0_i32_0 = arith.constant 0 : i32
    %c0_i32_1 = arith.constant 0 : i32
    return %c0_i32, %c0_i32_0 : i32, i32
  }
  func.func @transform_27(%arg0: i32) -> (i32, i32) {
    %c0_i32 = arith.constant 0 : i32
    %c0_i32_0 = arith.constant 0 : i32
    %c0_i32_1 = arith.constant 0 : i32
    return %c0_i32, %c0_i32_0 : i32, i32
  }
  func.func @transform_28(%arg0: i32) -> (i32, i32, i32) {
    %c0_i32 = arith.constant 0 : i32
    %c0_i32_0 = arith.constant 0 : i32
    %c0_i32_1 = arith.constant 0 : i32
    return %arg0, %c0_i32, %c0_i32_0 : i32, i32, i32
  }
}

</mosaic_0001>

<bundles_post_ra>
// kernel: transformer_forward.2
= control target key start
LH: loop header
LB: loop body
LE: loop exit
PB: predicated region body
PF: predicated region fallthrough
CT: control target
= control target key end

     0   :  { %s2691_s21 = smov 0   ;;  %s3126_s0 = inlined_call_operand.vmem [shape: f32[2,8,32], index: 0, kind: input, shape index: {}]   ;;  %s3127_s1 = inlined_call_operand.vmem [shape: f32[2,8,8], index: 1, kind: input, shape index: {}]   ;;  %s3128_s2 = inlined_call_operand.vmem [shape: f32[1,32], index: 2, kind: input, shape index: {}]   ;;  %s3129_s3 = inlined_call_operand.vmem [shape: f32[1,32], index: 3, kind: input, shape index: {}]   ;;  %s3130_s4 = inlined_call_operand.vmem [shape: bf16[32,96], index: 4, kind: input, shape index: {}]   ;;  %s3131_s5 = inlined_call_operand.vmem [shape: f32[1,96], index: 5, kind: input, shape index: {}]   ;;  %s3132_s6 = inlined_call_operand.vmem [shape: bf16[32,32], index: 6, kind: input, shape index: {}]   ;;  %s3133_s7 = inlined_call_operand.vmem [shape: f32[1,32], index: 7, kind: input, shape index: {}]   ;;  %s3134_s8 = inlined_call_operand.vmem [shape: f32[1,32], index: 8, kind: input, shape index: {}]   ;;  %s3135_s9 = inlined_call_operand.vmem [shape: f32[1,32], index: 9, kind: input, shape index: {}]   ;;  %s3136_s10 = inlined_call_operand.vmem [shape: bf16[32,128], index: 10, kind: input, shape index: {}]   ;;  %s3137_s11 = inlined_call_operand.vmem [shape: f32[1,128], index: 11, kind: input, shape index: {}]   ;;  %s3138_s12 = inlined_call_operand.vmem [shape: bf16[128,32], index: 12, kind: input, shape index: {}]   ;;  %s3139_s13 = inlined_call_operand.vmem [shape: f32[1,32], index: 13, kind: input, shape index: {}]   ;;  %s3140_s14 = inlined_call_operand.vmem [shape: f32[1,32], index: 14, kind: input, shape index: {}]   ;;  %s3141_s15 = inlined_call_operand.vmem [shape: f32[1,32], index: 15, kind: input, shape index: {}]   ;;  %s3142_s16 = inlined_call_operand.vmem [shape: f32[2,8,32], index: 16, kind: output, shape index: {}]  }
   0x1   :  { %3150 = sst [smem:[#allocation2_spill]] %s3126_s0 }
   0x2 LB: > { %s2184_s22 = sadd.s32 4294967295, %s2588_s21   ;;  %p2188_p0 = scmp.ge.s32.totalorder %s2588_s21, 1  ;;  %s2588_s21 = sphi %s2691_s21, %s26_s21  }
   0x3   : > { %p470_p1 = scmp.lt.s32.totalorder %s2588_s21, 3 }
   0x5   : > { %p471_p2 = pnand %p2188_p0, %p470_p1 }
   0x6   : > { %p522_p3 = scmp.lt.s32.totalorder (!%p471_p2), %s2184_s22, 1  ;;  %vm573_vm0 = vcmask (!%p471_p2), 261120   ;;  %s3151_s26 = sld [smem:[#allocation2_spill]] (!%p471_p2)  ;;  %v2714_v7 = vld [vmem:[%s3130_s4] sm:$0xff] (!%p471_p2)   ;;  %v2590_v8 = vmov (!%p471_p2), 0.0   ;;  %vm2591_vm1 = vmmov (!%p471_p2), 0  }
   0x7   : > { %474 = sbr.rel (%p471_p2) target bundleno = 6473 (0x1949), region = 84  ;;  %2308 = vmatprep.subr.bf16.mxu1 (!%p471_p2), %v2590_v8  ;;  %2312 = vmatprep.mubr.msk.bf16.mxu1 (!%p471_p2), %vm2591_vm1, %v2590_v8  ;;  %v2723_v9 = vld [vmem:[%s3130_s4 + $0x8] sm:$0xff] (!%p471_p2)   ;;  %v2734_v18 = vld [vmem:[%s3128_s2] ss:$0 sm:$0xff] (!%p471_p2)  ;;  %s2592_s25 = smov (!%p471_p2), 64   ;;  %vm676_vm4 = vcmask (!%p471_p2), 64512  }
   0x8   : > { %2309 = vmatpush3.bf16.msra.mxu1 (!%p471_p2), %v2714_v7  ;;  %2334 = vmatprep.subr.bf16.mxu0 (!%p471_p2), %v2590_v8  ;;  %v2740_v21 = vld [vmem:[%s3129_s3] ss:$0 sm:$0xff] (!%p471_p2)  ;;  %vm742_vm5 = vcmask (!%p471_p2), 1043456   ;;  %s2594_s30 = smov (!%p471_p2), 80   ;;  %s2595_s0 = smov (!%p471_p2), 88   ;;  %vm1135_vm6 = vcmask (!%p471_p2), 130048  }
   0x9   : > { %2310 = vmatprep.subr.bf16.mxu1 (!%p471_p2), %v2590_v8  ;;  %2336 = vmatprep.mubr.msk.bf16.mxu0 (!%p471_p2), %vm2591_vm1, %v2590_v8  ;;  %v2749_v25 = vld [vmem:[%s3131_s5] ss:$0 sm:$0xff] (!%p471_p2)  ;;  %s2596_s17 = smov (!%p471_p2), 120   ;;  %s2597_s18 = smov (!%p471_p2), 112   ;;  %vm1137_vm7 = vcmask (!%p471_p2), 195584  }
   0xa   : > { %s2598_s19 = smov (!%p471_p2), 72   ;;  %s3149_s20 = smov (!%p471_p2), 104  }
   0xb   : > { %s3144_s24 = smov (!%p471_p2), 56   ;;  %s3147_s28 = smov (!%p471_p2), 16  }
   0xc   : > { %2311 = vmatpush3.bf16.msra.mxu1 (!%p471_p2), %v2723_v9 }
   0xd   : > { %2316 = vmatprep.subr.bf16.mxu1 (!%p471_p2), %v2590_v8 }
   0xe   : > { %s3160_s22 = smov (!%p522_p3, %s2184_s22), 1 }
   0xf   : > { %s2699_s23 = sshll.u32 %s3160_s22, 3  ;;  %s3145_s22 = smov 48  }
  0x10   : > { %s525_s27 = scalar_lea.vmem %s3151_s26, %s2699_s23  ;;  %s2593_s26 = smov 96  }
  0x11   : > { %v2705_v0 = vld [vmem:[%s525_s27] sm:$0xff]  ;;  %s529_s29 = scalar_lea.vmem %s3127_s1, %s2699_s23  ;;  %s3143_s27 = smov 40  }
  0x12   : > { %v574_v1 = vsel %vm573_vm0, %v2705_v0, 0.0  ;;  %v2770_v36 = vld [vmem:[%s529_s29] sm:$0xff]  ;;  %s3146_s29 = smov 24  }
  0x13   : > { %575 = vadd.xlane.f32.xlu0 %v574_v1 }
  0xa0   : > { %v576_v2 = vpop.xlane.xlu0 %575 }
  0xa1   : > { %v578_v3 = vmul.f32 0.03125, %v576_v2 }
  0xa3   : > { %v579_v4 = vsub.f32 %v2705_v0, %v578_v3 }
  0xa5   : > { %v580_v5 = vmul.f32 %v579_v4, %v579_v4  ;;  %v592_v19 = vmul.f32 %v2734_v18, %v579_v4 }
  0xa7   : > { %v581_v6 = vsel %vm573_vm0, %v580_v5, 0.0 }
  0xa8   : > { %582 = vadd.xlane.f32.xlu0 %v581_v6 }
 0x135   : > { %v583_v10 = vpop.xlane.xlu0 %582 }
 0x136   : > { %v585_v11 = vmul.f32 0.032258064, %v583_v10 }
 0x138   : > { %2530 = vrsqrt.f32 %v585_v11  ;;  %vm595_vm2 = vcmp.eq.f32.partialorder %v585_v11, inf  ;;  %v598_v14 = vand.u32 2147483648, %v585_v11  ;;  %vm597_vm3 = vcmp.eq.f32.partialorder %v585_v11, 0.0 }
 0x142   : > { %v2531_v12 = vpop.eup %2530 }
 0x143   : > { %v594_v13 = vmul.f32 %v2531_v12, %v585_v11 }
 0x145   : > { %v596_v15 = vsel %vm595_vm2, %v585_v11, %v594_v13 }
 0x146   : > { %v599_v16 = vsel %vm597_vm3, %v598_v14, %v596_v15 }
 0x147   : > { %v600_v17 = vadd.f32 1e-06, %v599_v16 }
 0x149   : > { %2532 = vrcp.f32 %v600_v17 }
 0x153   : > { %v2533_v20 = vpop.eup %2532 }
 0x154   : > { %v602_v22 = vmul.f32 %v2533_v20, %v592_v19 }
 0x156   : > { %v609_v23 = vadd.f32 %v2740_v21, %v602_v22 }
 0x158   : > { %v610_v24 = vpack.c.bf16 %v609_v23, %v609_v23 }
 0x15a   : > { %2313 = vmatmul.mubr.msk.bf16.vlgmr.msra.gmra.mrb[0].mxu1 %vm573_vm0, %v610_v24 }
 0x15b   : > { %2318 = vmatprep.mubr.msk.bf16.mxu1 %vm2591_vm1, %v2590_v8 }
 0x22d   : > { %v666_v26 = vpop.f32.mrb[0].mxu1 }
 0x22e   : > { %v667_v27 = vadd.f32 %v2749_v25, %v666_v26  ;;  %v2314_v28 = vpop.f32.mrb[1].mxu1 }
 0x22f   : > { %v669_v29 = vpop.f32.mrb[2].mxu1 }
 0x230   : > { %v2752_v30 = vpack.c.bf16 %v667_v27, %v667_v27  ;;  %v2315_v31 = vpop.f32.mrb[3].mxu1 }
 0x232   : > { %737 = vrot.lane.b32.xlu0 %v2752_v30, %s2592_s25  ;;  %674 = vrot.lane.b32.xlu1 %v2752_v30, %s2593_s26 }
 0x2a4   : > { %v675_v32 = vpop.permute.xlu1 %674  ;;  %v738_v34 = vpop.permute.xlu0 %737 }
 0x2a5   : > { %v681_v33 = vsel %vm676_vm4, %v675_v32, 0  ;;  %v744_v35 = vsel %vm742_vm5, %v738_v34, 0 }
 0x2a6   : > { %2317 = vmatpush3.bf16.xpose.msra.mxu1 %v681_v33 }
 0x2a7   : > { %2322 = vmatprep.subr.bf16.mxu1 %v2590_v8 }
 0x2ad   : > { %2319 = vmatmul.mubr.msk.bf16.vlgmr.msra.gmra.mrb[4].mxu1 %vm676_vm4, %v2752_v30 }
 0x2ae   : > { %2323 = vmatpush3.bf16.msra.mxu1 %v744_v35  ;;  %2324 = vmatprep.mubr.msk.bf16.mxu1 %vm2591_vm1, %v2590_v8 }
 0x2af   : > { %2328 = vmatprep.subr.bf16.mxu1 %v2590_v8 }
 0x380   : > { %v717_v37 = vpop.f32.mrb[4].mxu1 }
 0x381   : > { %v723_v38 = vmul.f32 0.35355338, %v717_v37  ;;  %v2320_v39 = vpop.f32.mrb[5].mxu1 }
 0x382   : > { %v720_v40 = vpop.f32.mrb[6].mxu1 }
 0x383   : > { %v2321_v41 = vpop.f32.mrb[7].mxu1  ;;  %v724_v42 = vadd.f32 %v723_v38, %v2770_v36 }
 0x385   : > { %v725_v43 = vsel %vm676_vm4, %v724_v42, -inf }
 0x386   : > { %726 = vmax.xlane.f32.xlu1 %v725_v43 }
 0x397   : > { %900 = vrot.lane.b32.xlu1 %v2752_v30, %s2594_s30 }
 0x413   : > { %v727_v44 = vpop.xlane.xlu1 %726 }
 0x414   : > { %v728_v45 = vsub.f32 %v724_v42, %v727_v44 }
 0x416   : > { %v729_v46 = vmul.f32 1.442695, %v728_v45 }
 0x417   : > { %v901_v56 = vpop.permute.xlu1 %900 }
 0x418   : > { %2534 = vpow2.f32 %v729_v46  ;;  %v906_v58 = vsel %vm676_vm4, %v901_v56, 0 }
 0x422   : > { %v2535_v47 = vpop.eup %2534 }
 0x423   : > { %v731_v48 = vsel %vm676_vm4, %v2535_v47, 0.0 }
 0x424   : > { %732 = vadd.xlane.f32.xlu0 %v731_v48 }
 0x43a   : > { %788 = vrot.lane.b32.xlu0 %v2752_v30, %s2595_s0 }
 0x43e   : > { %786 = vrot.lane.b32.xlu0 %v2752_v30, %s2596_s17 }
 0x442   : > { %898 = vrot.lane.b32.xlu0 %v2752_v30, %s2597_s18 }
 0x446   : > { %1012 = vrot.lane.b32.xlu0 %v2752_v30, %s2598_s19 }
 0x44a   : > { %1010 = vrot.lane.b32.xlu0 %v2752_v30, %s3149_s20 }
 0x4b1   : > { %v733_v49 = vpop.xlane.xlu0 %732 }
 0x4b2   : > { %2536 = vrcp.f32 %v733_v49 }
 0x4b5   : > { %v789_v51 = vpop.permute.xlu0 %788 }
 0x4b6   : > { %v794_v54 = vsel %vm676_vm4, %v789_v51, 0 }
 0x4b9   : > { %v787_v55 = vpop.permute.xlu0 %786 }
 0x4bc   : > { %v2537_v50 = vpop.eup %2536 }
 0x4bd   : > { %v735_v52 = vmul.f32 %v2537_v50, %v2535_v47  ;;  %v899_v57 = vpop.permute.xlu0 %898 }
 0x4bf   : > { %v736_v53 = vpack.c.bf16 %v735_v52, %v735_v52 }
 0x4c1   : > { %2325 = vmatmul.mubr.msk.bf16.vlgmr.msra.gmra.mrb[8].mxu1 %vm676_vm4, %v736_v53  ;;  %v1013_v59 = vpop.permute.xlu0 %1012 }
 0x4c2   : > { %2329 = vmatpush3.bf16.xpose.msra.mxu1 %v794_v54  ;;  %2330 = vmatprep.mubr.msk.bf16.mxu1 %vm2591_vm1, %v2590_v8  ;;  %v1018_v60 = vsel %vm676_vm4, %v1013_v59, 0 }
 0x4c3   : > { %2340 = vmatprep.subr.bf16.mxu1 %v2590_v8 }
 0x4c5   : > { %v1011_v61 = vpop.permute.xlu0 %1010 }
 0x4c9   : > { %2331 = vmatmul.mubr.msk.bf16.vlgmr.msra.gmra.mrb[12].mxu1 %vm676_vm4, %v787_v55 }
 0x4ca   : > { %2341 = vmatpush3.bf16.xpose.msra.mxu1 %v906_v58  ;;  %2342 = vmatprep.mubr.msk.bf16.mxu1 %vm2591_vm1, %v2590_v8 }
 0x4cb   : > { %2352 = vmatprep.subr.bf16.mxu1 %v2590_v8 }
 0x4d1   : > { %2343 = vmatmul.mubr.msk.bf16.vlgmr.msra.gmra.mrb[16].mxu1 %vm676_vm4, %v899_v57 }
 0x4d2   : > { %2353 = vmatpush3.bf16.xpose.msra.mxu1 %v1018_v60  ;;  %2354 = vmatprep.mubr.msk.bf16.mxu1 %vm2591_vm1, %v2590_v8 }
 0x4d3   : > { %2364 = vmatprep.subr.bf16.mxu1 %v2590_v8 }
 0x4d9   : > { %2355 = vmatmul.mubr.msk.bf16.vlgmr.msra.gmra.mrb[20].mxu1 %vm676_vm4, %v1011_v61 }
 0x4da   : > { %2368 = vmatprep.mubr.msk.bf16.mxu1 %vm2591_vm1, %v2590_v8 }
 0x594   : > { %v2805_v62 = vpop.f32.mrb[8].mxu1 }
 0x595   : > { %v2326_v63 = vpop.f32.mrb[9].mxu1 }
 0x596   : > { %v783_v1 = vpop.f32.mrb[10].mxu1 }
 0x597   : > { %v2327_v2 = vpop.f32.mrb[11].mxu1 }
 0x598   : > { %v2840_v2 = vld [vmem:[%s3132_s6] sm:$0xff]  }
 0x599   : > { %2365 = vmatpush3.bf16.msra.mxu1 %v2840_v2 }
 0x59a   : > { %2366 = vmatprep.subr.bf16.mxu1 %v2590_v8 }
 0x59c   : > { %v830_v3 = vpop.f32.mrb[12].mxu1 }
 0x59d   : > { %v836_v4 = vmul.f32 0.35355338, %v830_v3  ;;  %v2332_v5 = vpop.f32.mrb[13].mxu1 }
 0x59e   : > { %v833_v6 = vpop.f32.mrb[14].mxu1 }
 0x59f   : > { %v2333_v10 = vpop.f32.mrb[15].mxu1  ;;  %v837_v11 = vadd.f32 %v836_v4, %v2770_v36 }
 0x5a0   : > { %v2848_v10 = vld [vmem:[%s3132_s6 + $0x8] sm:$0xff]  }
 0x5a1   : > { %v838_v12 = vsel %vm676_vm4, %v837_v11, -inf  ;;  %2367 = vmatpush3.bf16.msra.mxu1 %v2848_v10 }
 0x5a2   : > { %839 = vmax.xlane.f32.xlu0 %v838_v12  ;;  %2380 = vmatprep.subr.bf16.mxu1 %v2590_v8 }
 0x5a4   : > { %v942_v13 = vpop.f32.mrb[16].mxu1 }
 0x5a5   : > { %v948_v14 = vmul.f32 0.35355338, %v942_v13  ;;  %v2344_v15 = vpop.f32.mrb[17].mxu1 }
 0x5a6   : > { %v945_v16 = vpop.f32.mrb[18].mxu1 }
 0x5a7   : > { %v2345_v17 = vpop.f32.mrb[19].mxu1  ;;  %v949_v19 = vadd.f32 %v948_v14, %v2770_v36 }
 0x5a9   : > { %v950_v20 = vsel %vm676_vm4, %v949_v19, -inf }
 0x5aa   : > { %951 = vmax.xlane.f32.xlu1 %v950_v20 }
 0x5ac   : > { %v1054_v22 = vpop.f32.mrb[20].mxu1 }
 0x5ad   : > { %v1060_v23 = vmul.f32 0.35355338, %v1054_v22  ;;  %v2356_v24 = vpop.f32.mrb[21].mxu1 }
 0x5ae   : > { %v1057_v26 = vpop.f32.mrb[22].mxu1 }
 0x5af   : > { %v2357_v27 = vpop.f32.mrb[23].mxu1  ;;  %v1061_v28 = vadd.f32 %v1060_v23, %v2770_v36 }
 0x5b1   : > { %v1062_v29 = vsel %vm676_vm4, %v1061_v28, -inf }
 0x5b2   : > { %1063 = vmax.xlane.f32.xlu0 %v1062_v29  ;;  %v2864_v29 = vld [vmem:[%s3133_s7] ss:$0 sm:$0xff] }
 0x5bb   : > { %962 = vrot.lane.b32.xlu1 %v2752_v30, %s3145_s22 }
 0x62f   : > { %v840_v31 = vpop.xlane.xlu0 %839 }
 0x630   : > { %v841_v32 = vsub.f32 %v837_v11, %v840_v31 }
 0x632   : > { %v842_v33 = vmul.f32 1.442695, %v841_v32 }
 0x634   : > { %2538 = vpow2.f32 %v842_v33 }
 0x637   : > { %v952_v34 = vpop.xlane.xlu1 %951 }
 0x638   : > { %v953_v35 = vsub.f32 %v949_v19, %v952_v34 }
 0x63a   : > { %v954_v37 = vmul.f32 1.442695, %v953_v35 }
 0x63b   : > { %v963_v50 = vpop.permute.xlu1 %962 }
 0x63c   : > { %2540 = vpow2.f32 %v954_v37  ;;  %v968_v56 = vsel %vm742_vm5, %v963_v50, 0 }
 0x63e   : > { %v2539_v38 = vpop.eup %2538 }
 0x63f   : > { %v1064_v39 = vpop.xlane.xlu0 %1063  ;;  %v844_v40 = vsel %vm676_vm4, %v2539_v38, 0.0 }
 0x640   : > { %v1065_v41 = vsub.f32 %v1061_v28, %v1064_v39  ;;  %845 = vadd.xlane.f32.xlu0 %v844_v40 }
 0x642   : > { %v1066_v42 = vmul.f32 1.442695, %v1065_v41 }
 0x644   : > { %2542 = vpow2.f32 %v1066_v42 }
 0x646   : > { %v2541_v43 = vpop.eup %2540 }
 0x647   : > { %v956_v44 = vsel %vm676_vm4, %v2541_v43, 0.0 }
 0x648   : > { %957 = vadd.xlane.f32.xlu0 %v956_v44  ;;  %v2891_v44 = vld [vmem:[%s3138_s12] sm:$0xff]  }
 0x64e   : > { %v2543_v45 = vpop.eup %2542 }
 0x64f   : > { %v1068_v46 = vsel %vm676_vm4, %v2543_v45, 0.0 }
 0x650   : > { %1069 = vadd.xlane.f32.xlu1 %v1068_v46  ;;  %v2904_v46 = vld [vmem:[%s3138_s12 + $0x10] sm:$0xff]  }
 0x65e   : > { %850 = vrot.lane.b32.xlu0 %v2752_v30, %s3144_s24 }
 0x661   : > { %1074 = vrot.lane.b32.xlu1 %v2752_v30, %s3143_s27  ;;  %s3148_s27 = smov 8  }
 0x6cd   : > { %v846_v47 = vpop.xlane.xlu0 %845 }
 0x6ce   : > { %2544 = vrcp.f32 %v846_v47  ;;  %v2911_v47 = vld [vmem:[%s3138_s12 + $0x18] sm:$0xff]  }
 0x6d5   : > { %v958_v48 = vpop.xlane.xlu0 %957 }
 0x6d6   : > { %2546 = vrcp.f32 %v958_v48  ;;  %v2918_v48 = vld [vmem:[%s3138_s12 + $0x20] sm:$0xff]  }
 0x6d8   : > { %v2545_v49 = vpop.eup %2544 }
 0x6d9   : > { %v851_v51 = vpop.permute.xlu0 %850  ;;  %v848_v52 = vmul.f32 %v2545_v49, %v2539_v38  ;;  %v2925_v49 = vld [vmem:[%s3138_s12 + $0x28] sm:$0xff]  }
 0x6da   : > { %v856_v53 = vsel %vm742_vm5, %v851_v51, 0 }
 0x6db   : > { %2335 = vmatpush3.bf16.msra.mxu0 %v856_v53  ;;  %v849_v54 = vpack.c.bf16 %v848_v52, %v848_v52 }
 0x6dc   : > { %2346 = vmatprep.subr.bf16.mxu0 %v2590_v8 }
 0x6dd   : > { %v1070_v55 = vpop.xlane.xlu1 %1069 }
 0x6de   : > { %2548 = vrcp.f32 %v1070_v55  ;;  %2337 = vmatmul.mubr.msk.bf16.vlgmr.msra.gmra.mrb[0].mxu0 %vm676_vm4, %v849_v54 }
 0x6df   : > { %2347 = vmatpush3.bf16.msra.mxu0 %v968_v56  ;;  %2348 = vmatprep.mubr.msk.bf16.mxu0 %vm2591_vm1, %v2590_v8 }
 0x6e0   : > { %v2547_v30 = vpop.eup %2546  ;;  %2358 = vmatprep.subr.bf16.mxu0 %v2590_v8 }
 0x6e1   : > { %v960_v57 = vmul.f32 %v2547_v30, %v2541_v43  ;;  %v1075_v58 = vpop.permute.xlu1 %1074  ;;  %v2883_v43 = vld [vmem:[%s3136_s10 + $0x8] sm:$0xff]  }
 0x6e2   : > { %v1080_v60 = vsel %vm742_vm5, %v1075_v58, 0 }
 0x6e3   : > { %v961_v59 = vpack.c.bf16 %v960_v57, %v960_v57  ;;  %v2933_v57 = vld [vmem:[%s3134_s8] ss:$0 sm:$0xff] }
 0x6e6   : > { %2349 = vmatmul.mubr.msk.bf16.vlgmr.msra.gmra.mrb[4].mxu0 %vm676_vm4, %v961_v59 }
 0x6e7   : > { %2359 = vmatpush3.bf16.msra.mxu0 %v1080_v60  ;;  %2360 = vmatprep.mubr.msk.bf16.mxu0 %vm2591_vm1, %v2590_v8  ;;  %v2939_v60 = vld [vmem:[%s3135_s9] ss:$0 sm:$0xff] }
 0x6e8   : > { %v2549_v61 = vpop.eup %2548  ;;  %2372 = vmatprep.subr.bf16.mxu0 %v2590_v8 }
 0x6e9   : > { %v1072_v63 = vmul.f32 %v2549_v61, %v2543_v45  ;;  %v2897_v45 = vld [vmem:[%s3138_s12 + $0x8] sm:$0xff]  }
 0x6eb   : > { %v1073_v1 = vpack.c.bf16 %v1072_v63, %v1072_v63 }
 0x6ee   : > { %2361 = vmatmul.mubr.msk.bf16.vlgmr.msra.gmra.mrb[8].mxu0 %vm676_vm4, %v1073_v1 }
 0x6ef   : > { %2376 = vmatprep.mubr.msk.bf16.mxu0 %vm2591_vm1, %v2590_v8 }
 0x7b1   : > { %v892_v3 = vpop.f32.mrb[0].mxu0 }
 0x7b2   : > { %1123 = vrot.lane.b32.xlu1 %v892_v3, %s3148_s27  ;;  %v2338_v4 = vpop.f32.mrb[1].mxu0  ;;  %v2952_v3 = vld [vmem:[%s3138_s12 + $0x30] sm:$0xff]  }
 0x7b3   : > { %v895_v5 = vpop.f32.mrb[2].mxu0 }
 0x7b4   : > { %v2339_v6 = vpop.f32.mrb[3].mxu0 }
 0x7b9   : > { %v1004_v11 = vpop.f32.mrb[4].mxu0 }
 0x7ba   : > { %1127 = vrot.lane.b32.xlu0 %v1004_v11, %s3147_s28  ;;  %v2350_v12 = vpop.f32.mrb[5].mxu0 }
 0x7bb   : > { %v1007_v13 = vpop.f32.mrb[6].mxu0 }
 0x7bc   : > { %v2351_v14 = vpop.f32.mrb[7].mxu0 }
 0x7c1   : > { %v1116_v15 = vpop.f32.mrb[8].mxu0 }
 0x7c2   : > { %1131 = vrot.lane.b32.xlu1 %v1116_v15, %s3146_s29  ;;  %v2362_v16 = vpop.f32.mrb[9].mxu0  ;;  %v2974_v15 = vld [vmem:[%s3139_s13] ss:$0 sm:$0xff] }
 0x7c3   : > { %v1119_v17 = vpop.f32.mrb[10].mxu0 }
 0x7c4   : > { %v2363_v19 = vpop.f32.mrb[11].mxu0 }
 0x824   : > { %v1124_v20 = vpop.permute.xlu1 %1123 }
 0x825   : > { %v1134_v23 = vsel %vm676_vm4, %v2805_v62, %v1124_v20 }
 0x82c   : > { %v1128_v22 = vpop.permute.xlu0 %1127 }
 0x82d   : > { %v1136_v24 = vsel %vm1135_vm6, %v1134_v23, %v1128_v22 }
 0x834   : > { %v1132_v26 = vpop.permute.xlu1 %1131 }
 0x835   : > { %v1138_v27 = vsel %vm1137_vm7, %v1136_v24, %v1132_v26 }
 0x836   : > { %v1139_v28 = vpack.c.bf16 %v1138_v27, %v1138_v27 }
 0x838   : > { %2369 = vmatmul.mubr.msk.bf16.vlgmr.msra.gmra.mrb[24].mxu1 %vm573_vm0, %v1139_v28 }
 0x839   : > { %2396 = vmatprep.mubr.msk.bf16.mxu1 %vm2591_vm1, %v2590_v8  ;;  %2381 = vmatpush3.bf16.msra.mxu1 %v2891_v44 }
 0x83a   : > { %2382 = vmatprep.subr.bf16.mxu1 %v2590_v8 }
 0x83d   : > { %2383 = vmatpush3.bf16.msra.mxu1 %v2897_v45 }
 0x83e   : > { %2384 = vmatprep.subr.bf16.mxu1 %v2590_v8 }
 0x841   : > { %2385 = vmatpush3.bf16.msra.mxu1 %v2904_v46 }
 0x842   : > { %2386 = vmatprep.subr.bf16.mxu1 %v2590_v8 }
 0x845   : > { %2387 = vmatpush3.bf16.msra.mxu1 %v2911_v47 }
 0x846   : > { %2388 = vmatprep.subr.bf16.mxu1 %v2590_v8 }
 0x849   : > { %2389 = vmatpush3.bf16.msra.mxu1 %v2918_v48 }
 0x84a   : > { %2390 = vmatprep.subr.bf16.mxu1 %v2590_v8 }
 0x84d   : > { %2391 = vmatpush3.bf16.msra.mxu1 %v2925_v49 }
 0x84e   : > { %2392 = vmatprep.subr.bf16.mxu1 %v2590_v8 }
 0x851   : > { %2393 = vmatpush3.bf16.msra.mxu1 %v2952_v3 }
 0x852   : > { %2394 = vmatprep.subr.bf16.mxu1 %v2590_v8 }
 0x90b   : > { %v1189_v31 = vpop.f32.mrb[24].mxu1 }
 0x90c   : > { %v1195_v32 = vadd.f32 %v1189_v31, %v2705_v0  ;;  %v2370_v62 = vpop.f32.mrb[25].mxu1  ;;  %v2877_v0 = vld [vmem:[%s3136_s10] sm:$0xff]  }
 0x90d   : > { %v1192_v33 = vpop.f32.mrb[26].mxu1  ;;  %2373 = vmatpush3.bf16.msra.mxu0 %v2877_v0 }
 0x90e   : > { %v2868_v34 = vadd.f32 %v2864_v29, %v1195_v32  ;;  %v2371_v35 = vpop.f32.mrb[27].mxu1  ;;  %2374 = vmatprep.subr.bf16.mxu0 %v2590_v8 }
 0x910   : > { %v1203_v37 = vsel %vm573_vm0, %v2868_v34, 0.0 }
 0x911   : > { %1204 = vadd.xlane.f32.xlu0 %v1203_v37  ;;  %2375 = vmatpush3.bf16.msra.mxu0 %v2883_v43 }
 0x912   : > { %2400 = vmatprep.subr.bf16.mxu0 %v2590_v8 }
 0x99e   : > { %v1205_v38 = vpop.xlane.xlu0 %1204 }
 0x99f   : > { %v1206_v39 = vmul.f32 0.03125, %v1205_v38 }
 0x9a1   : > { %v1207_v40 = vsub.f32 %v2868_v34, %v1206_v39 }
 0x9a3   : > { %v1208_v41 = vmul.f32 %v1207_v40, %v1207_v40  ;;  %v1219_v58 = vmul.f32 %v2933_v57, %v1207_v40 }
 0x9a5   : > { %v1209_v42 = vsel %vm573_vm0, %v1208_v41, 0.0 }
 0x9a6   : > { %1210 = vadd.xlane.f32.xlu1 %v1209_v42 }
 0xa33   : > { %v1211_v50 = vpop.xlane.xlu1 %1210 }
 0xa34   : > { %v1212_v51 = vmul.f32 0.032258064, %v1211_v50 }
 0xa36   : > { %2550 = vrsqrt.f32 %v1212_v51  ;;  %vm1222_vm8 = vcmp.eq.f32.partialorder %v1212_v51, inf  ;;  %v1225_v54 = vand.u32 2147483648, %v1212_v51  ;;  %vm1224_vm9 = vcmp.eq.f32.partialorder %v1212_v51, 0.0 }
 0xa40   : > { %v2551_v52 = vpop.eup %2550 }
 0xa41   : > { %v1221_v53 = vmul.f32 %v2551_v52, %v1212_v51 }
 0xa43   : > { %v1223_v55 = vsel %vm1222_vm8, %v1212_v51, %v1221_v53 }
 0xa44   : > { %v1226_v56 = vsel %vm1224_vm9, %v1225_v54, %v1223_v55 }
 0xa45   : > { %v1227_v30 = vadd.f32 1e-06, %v1226_v56 }
 0xa47   : > { %2552 = vrcp.f32 %v1227_v30 }
 0xa51   : > { %v2553_v59 = vpop.eup %2552 }
 0xa52   : > { %v1229_v61 = vmul.f32 %v2553_v59, %v1219_v58 }
 0xa54   : > { %v1236_v63 = vadd.f32 %v2939_v60, %v1229_v61 }
 0xa56   : > { %v1237_v1 = vpack.c.bf16 %v1236_v63, %v1236_v63 }
 0xa58   : > { %2377 = vmatmul.mubr.msk.bf16.vlgmr.msra.gmra.mrb[12].mxu0 %vm573_vm0, %v1237_v1 }
 0xa59   : > { %2401 = vmatpush3.bf16.msra.mxu0 %v2714_v7  ;;  %2404 = vmatprep.mubr.msk.bf16.mxu0 %vm2591_vm1, %v2590_v8  ;;  %v2959_v7 = vld [vmem:[%s3138_s12 + $0x38] sm:$0xff]  }
 0xa5a   : > { %2402 = vmatprep.subr.bf16.mxu0 %v2590_v8  ;;  %2395 = vmatpush3.bf16.msra.mxu1 %v2959_v7 }
 0xa5b   : > { %2426 = vmatprep.subr.bf16.mxu1 %v2590_v8 }
 0xa5d   : > { %2403 = vmatpush3.bf16.msra.mxu0 %v2723_v9  ;;  %v2966_v9 = vld [vmem:[%s3137_s11] ss:$0 sm:$0xff] }
 0xa5e   : > { %2408 = vmatprep.subr.bf16.mxu0 %v2590_v8 }
 0xb2b   : > { %v1293_v4 = vpop.f32.mrb[12].mxu0 }
 0xb2c   : > { %v1294_v5 = vadd.f32 %v2966_v9, %v1293_v4  ;;  %v2378_v6 = vpop.f32.mrb[13].mxu0 }
 0xb2d   : > { %v1296_v11 = vpop.f32.mrb[14].mxu0 }
 0xb2e   : > { %v1299_v12 = vmax.f32 %v1294_v5, 0.0  ;;  %v2379_v13 = vpop.f32.mrb[15].mxu0 }
 0xb30   : > { %v1300_v14 = vpack.c.bf16 %v1299_v12, %v1299_v12 }
 0xb32   : > { %2397 = vmatmul.mubr.bf16.vlgmr.msra.gmra.mrb[28].mxu1 %v1300_v14 }
 0xb33   : > { %2428 = vmatprep.mubr.msk.bf16.mxu1 %vm2591_vm1, %v2590_v8 }
 0xc05   : > { %v1383_v16 = vpop.f32.mrb[28].mxu1 }
 0xc06   : > { %v1389_v17 = vadd.f32 %v1383_v16, %v2868_v34  ;;  %v2398_v19 = vpop.f32.mrb[29].mxu1 }
 0xc07   : > { %v1386_v20 = vpop.f32.mrb[30].mxu1 }
 0xc08   : > { %v2978_v22 = vadd.f32 %v2974_v15, %v1389_v17  ;;  %v2399_v23 = vpop.f32.mrb[31].mxu1 }
 0xc0a   : > { %v1397_v24 = vsel %vm573_vm0, %v2978_v22, 0.0 }
 0xc0b   : > { %1398 = vadd.xlane.f32.xlu0 %v1397_v24 }
 0xc98   : > { %v1399_v26 = vpop.xlane.xlu0 %1398 }
 0xc99   : > { %v1400_v27 = vmul.f32 0.03125, %v1399_v26 }
 0xc9b   : > { %v1401_v28 = vsub.f32 %v2978_v22, %v1400_v27 }
 0xc9d   : > { %v1402_v31 = vmul.f32 %v1401_v28, %v1401_v28  ;;  %v1407_v41 = vmul.f32 %v2734_v18, %v1401_v28 }
 0xc9f   : > { %v1403_v32 = vsel %vm573_vm0, %v1402_v31, 0.0 }
 0xca0   : > { %1404 = vadd.xlane.f32.xlu0 %v1403_v32 }
 0xd2d   : > { %v1405_v62 = vpop.xlane.xlu0 %1404 }
 0xd2e   : > { %v1406_v33 = vmul.f32 0.032258064, %v1405_v62 }
 0xd30   : > { %2554 = vrsqrt.f32 %v1406_v33  ;;  %vm1410_vm10 = vcmp.eq.f32.partialorder %v1406_v33, inf  ;;  %v1413_v37 = vand.u32 2147483648, %v1406_v33  ;;  %vm1412_vm11 = vcmp.eq.f32.partialorder %v1406_v33, 0.0 }
 0xd3a   : > { %v2555_v34 = vpop.eup %2554 }
 0xd3b   : > { %v1409_v35 = vmul.f32 %v2555_v34, %v1406_v33 }
 0xd3d   : > { %v1411_v38 = vsel %vm1410_vm10, %v1406_v33, %v1409_v35 }
 0xd3e   : > { %v1414_v39 = vsel %vm1412_vm11, %v1413_v37, %v1411_v38 }
 0xd3f   : > { %v1415_v40 = vadd.f32 1e-06, %v1414_v39 }
 0xd41   : > { %2556 = vrcp.f32 %v1415_v40 }
 0xd4b   : > { %v2557_v42 = vpop.eup %2556 }
 0xd4c   : > { %v1417_v50 = vmul.f32 %v2557_v42, %v1407_v41 }
 0xd4e   : > { %v1418_v51 = vadd.f32 %v2740_v21, %v1417_v50 }
 0xd50   : > { %v1419_v52 = vpack.c.bf16 %v1418_v51, %v1418_v51 }
 0xd52   : > { %2405 = vmatmul.mubr.msk.bf16.vlgmr.msra.gmra.mrb[16].mxu0 %vm573_vm0, %v1419_v52 }
 0xd53   : > { %2410 = vmatprep.mubr.msk.bf16.mxu0 %vm2591_vm1, %v2590_v8 }
 0xe25   : > { %v1457_v53 = vpop.f32.mrb[16].mxu0 }
 0xe26   : > { %v1458_v54 = vadd.f32 %v2749_v25, %v1457_v53  ;;  %v2406_v55 = vpop.f32.mrb[17].mxu0 }
 0xe27   : > { %v1460_v56 = vpop.f32.mrb[18].mxu0 }
 0xe28   : > { %v2990_v30 = vpack.c.bf16 %v1458_v54, %v1458_v54  ;;  %v2407_v58 = vpop.f32.mrb[19].mxu0 }
 0xe2a   : > { %1465 = vrot.lane.b32.xlu0 %v2990_v30, %s2593_s26  ;;  %s3152_s26 = smov 104  }
 0xe2e   : > { %1577 = vrot.lane.b32.xlu0 %v2990_v30, %s2595_s0  ;;  %s3155_s0 = smov 40  }
 0xe32   : > { %1689 = vrot.lane.b32.xlu0 %v2990_v30, %s2594_s30  ;;  %s3154_s30 = smov 56  }
 0xe36   : > { %1801 = vrot.lane.b32.xlu0 %v2990_v30, %s2598_s19  ;;  %s3158_s19 = smov 24  }
 0xe9c   : > { %v1466_v18 = vpop.permute.xlu0 %1465 }
 0xe9d   : > { %v1471_v21 = vsel %vm676_vm4, %v1466_v18, 0 }
 0xe9e   : > { %2409 = vmatpush3.bf16.xpose.msra.mxu0 %v1471_v21 }
 0xe9f   : > { %2414 = vmatprep.subr.bf16.mxu0 %v2590_v8 }
 0xea0   : > { %v1578_v24 = vpop.permute.xlu0 %1577 }
 0xea1   : > { %v1583_v27 = vsel %vm676_vm4, %v1578_v24, 0 }
 0xea4   : > { %v1690_v28 = vpop.permute.xlu0 %1689 }
 0xea5   : > { %2411 = vmatmul.mubr.msk.bf16.vlgmr.msra.gmra.mrb[20].mxu0 %vm676_vm4, %v2990_v30  ;;  %v1695_v32 = vsel %vm676_vm4, %v1690_v28, 0 }
 0xea6   : > { %2416 = vmatprep.mubr.msk.bf16.mxu0 %vm2591_vm1, %v2590_v8 }
 0xea8   : > { %v1802_v62 = vpop.permute.xlu0 %1801 }
 0xea9   : > { %v1807_v34 = vsel %vm676_vm4, %v1802_v62, 0 }
 0xf78   : > { %v1507_v25 = vpop.f32.mrb[20].mxu0 }
 0xf79   : > { %v1513_v59 = vmul.f32 0.35355338, %v1507_v25  ;;  %v2412_v61 = vpop.f32.mrb[21].mxu0 }
 0xf7a   : > { %v1510_v63 = vpop.f32.mrb[22].mxu0 }
 0xf7b   : > { %v2413_v1 = vpop.f32.mrb[23].mxu0  ;;  %v1514_v4 = vadd.f32 %v1513_v59, %v2770_v36 }
 0xf7d   : > { %v1515_v5 = vsel %vm676_vm4, %v1514_v4, -inf }
 0xf7e   : > { %1516 = vmax.xlane.f32.xlu1 %v1515_v5 }
0x100b   : > { %v1517_v6 = vpop.xlane.xlu1 %1516 }
0x100c   : > { %v1518_v11 = vsub.f32 %v1514_v4, %v1517_v6 }
0x100e   : > { %v1519_v12 = vmul.f32 1.442695, %v1518_v11 }
0x1010   : > { %2558 = vpow2.f32 %v1519_v12 }
0x101a   : > { %v2559_v13 = vpop.eup %2558 }
0x101b   : > { %v1521_v14 = vsel %vm676_vm4, %v2559_v13, 0.0 }
0x101c   : > { %1522 = vadd.xlane.f32.xlu1 %v1521_v14 }
0x102d   : > { %1527 = vrot.lane.b32.xlu1 %v2990_v30, %s2592_s25  ;;  %s3153_s25 = smov 48  }
0x1031   : > { %1575 = vrot.lane.b32.xlu1 %v2990_v30, %s2596_s17  ;;  %s3156_s17 = smov 8  }
0x1035   : > { %1687 = vrot.lane.b32.xlu1 %v2990_v30, %s2597_s18  ;;  %s3157_s18 = smov 16  }
0x1039   : > { %1799 = vrot.lane.b32.xlu1 %v2990_v30, %s3152_s26  ;;  %s533_s26 = scalar_lea.vmem %s3142_s16, %s2699_s23 }
0x10a9   : > { %v1523_v16 = vpop.xlane.xlu1 %1522 }
0x10aa   : > { %2560 = vrcp.f32 %v1523_v16 }
0x10ad   : > { %v1528_v17 = vpop.permute.xlu1 %1527 }
0x10ae   : > { %v1533_v19 = vsel %vm742_vm5, %v1528_v17, 0 }
0x10af   : > { %2415 = vmatpush3.bf16.msra.mxu0 %v1533_v19 }
0x10b0   : > { %2420 = vmatprep.subr.bf16.mxu0 %v2590_v8 }
0x10b1   : > { %v1576_v31 = vpop.permute.xlu1 %1575 }
0x10b4   : > { %v2561_v20 = vpop.eup %2560 }
0x10b5   : > { %v1525_v23 = vmul.f32 %v2561_v20, %v2559_v13  ;;  %v1688_v33 = vpop.permute.xlu1 %1687 }
0x10b7   : > { %v1526_v26 = vpack.c.bf16 %v1525_v23, %v1525_v23 }
0x10b9   : > { %2417 = vmatmul.mubr.msk.bf16.vlgmr.msra.gmra.mrb[24].mxu0 %vm676_vm4, %v1526_v26  ;;  %v1800_v35 = vpop.permute.xlu1 %1799 }
0x10ba   : > { %2421 = vmatpush3.bf16.xpose.msra.mxu0 %v1583_v27  ;;  %2422 = vmatprep.mubr.msk.bf16.mxu0 %vm2591_vm1, %v2590_v8 }
0x10bb   : > { %2432 = vmatprep.subr.bf16.mxu0 %v2590_v8 }
0x10c1   : > { %2423 = vmatmul.mubr.msk.bf16.vlgmr.msra.gmra.mrb[28].mxu0 %vm676_vm4, %v1576_v31 }
0x10c2   : > { %2433 = vmatpush3.bf16.xpose.msra.mxu0 %v1695_v32  ;;  %2434 = vmatprep.mubr.msk.bf16.mxu0 %vm2591_vm1, %v2590_v8 }
0x10c3   : > { %2444 = vmatprep.subr.bf16.mxu0 %v2590_v8 }
0x10c9   : > { %2435 = vmatmul.mubr.msk.bf16.vlgmr.msra.gmra.mrb[32].mxu0 %vm676_vm4, %v1688_v33 }
0x10ca   : > { %2445 = vmatpush3.bf16.xpose.msra.mxu0 %v1807_v34  ;;  %2446 = vmatprep.mubr.msk.bf16.mxu0 %vm2591_vm1, %v2590_v8 }
0x10cb   : > { %2456 = vmatprep.subr.bf16.mxu0 %v2590_v8 }
0x10d1   : > { %2447 = vmatmul.mubr.msk.bf16.vlgmr.msra.gmra.mrb[36].mxu0 %vm676_vm4, %v1800_v35 }
0x10d2   : > { %2457 = vmatpush3.bf16.msra.mxu0 %v2840_v2  ;;  %2460 = vmatprep.mubr.msk.bf16.mxu0 %vm2591_vm1, %v2590_v8 }
0x10d3   : > { %2458 = vmatprep.subr.bf16.mxu0 %v2590_v8 }
0x10d6   : > { %2459 = vmatpush3.bf16.msra.mxu0 %v2848_v10 }
0x10d7   : > { %2472 = vmatprep.subr.bf16.mxu0 %v2590_v8 }
0x118c   : > { %v3041_v37 = vpop.f32.mrb[24].mxu0 }
0x118d   : > { %v2418_v38 = vpop.f32.mrb[25].mxu0 }
0x118e   : > { %v1572_v39 = vpop.f32.mrb[26].mxu0 }
0x118f   : > { %v2419_v40 = vpop.f32.mrb[27].mxu0 }
0x1194   : > { %v1619_v41 = vpop.f32.mrb[28].mxu0 }
0x1195   : > { %v1625_v42 = vmul.f32 0.35355338, %v1619_v41  ;;  %v2424_v50 = vpop.f32.mrb[29].mxu0 }
0x1196   : > { %v1622_v51 = vpop.f32.mrb[30].mxu0 }
0x1197   : > { %v2425_v52 = vpop.f32.mrb[31].mxu0  ;;  %v1626_v2 = vadd.f32 %v1625_v42, %v2770_v36 }
0x1199   : > { %v1627_v53 = vsel %vm676_vm4, %v1626_v2, -inf }
0x119a   : > { %1628 = vmax.xlane.f32.xlu0 %v1627_v53 }
0x119c   : > { %v1731_v54 = vpop.f32.mrb[32].mxu0 }
0x119d   : > { %v1737_v55 = vmul.f32 0.35355338, %v1731_v54  ;;  %v2436_v10 = vpop.f32.mrb[33].mxu0 }
0x119e   : > { %v1734_v56 = vpop.f32.mrb[34].mxu0 }
0x119f   : > { %v2437_v58 = vpop.f32.mrb[35].mxu0  ;;  %v1738_v18 = vadd.f32 %v1737_v55, %v2770_v36 }
0x11a1   : > { %v1739_v21 = vsel %vm676_vm4, %v1738_v18, -inf }
0x11a2   : > { %1740 = vmax.xlane.f32.xlu1 %v1739_v21 }
0x11a4   : > { %v1843_v25 = vpop.f32.mrb[36].mxu0 }
0x11a5   : > { %v1849_v59 = vmul.f32 0.35355338, %v1843_v25  ;;  %v2448_v61 = vpop.f32.mrb[37].mxu0 }
0x11a6   : > { %v1846_v63 = vpop.f32.mrb[38].mxu0 }
0x11a7   : > { %v2449_v1 = vpop.f32.mrb[39].mxu0  ;;  %v1850_v4 = vadd.f32 %v1849_v59, %v2770_v36 }
0x11a9   : > { %v1851_v5 = vsel %vm676_vm4, %v1850_v4, -inf }
0x11aa   : > { %1852 = vmax.xlane.f32.xlu0 %v1851_v5 }
0x11b3   : > { %1751 = vrot.lane.b32.xlu1 %v2990_v30, %s3153_s25 }
0x1227   : > { %v1629_v6 = vpop.xlane.xlu0 %1628 }
0x1228   : > { %v1630_v11 = vsub.f32 %v1626_v2, %v1629_v6 }
0x122a   : > { %v1631_v12 = vmul.f32 1.442695, %v1630_v11 }
0x122c   : > { %2562 = vpow2.f32 %v1631_v12 }
0x122f   : > { %v1741_v13 = vpop.xlane.xlu1 %1740 }
0x1230   : > { %v1742_v14 = vsub.f32 %v1738_v18, %v1741_v13 }
0x1232   : > { %v1743_v16 = vmul.f32 1.442695, %v1742_v14 }
0x1233   : > { %v1752_v33 = vpop.permute.xlu1 %1751 }
0x1234   : > { %2564 = vpow2.f32 %v1743_v16  ;;  %v1757_v41 = vsel %vm742_vm5, %v1752_v33, 0 }
0x1236   : > { %v2563_v17 = vpop.eup %2562 }
0x1237   : > { %v1853_v19 = vpop.xlane.xlu0 %1852  ;;  %v1633_v20 = vsel %vm676_vm4, %v2563_v17, 0.0 }
0x1238   : > { %v1854_v23 = vsub.f32 %v1850_v4, %v1853_v19  ;;  %1634 = vadd.xlane.f32.xlu0 %v1633_v20 }
0x123a   : > { %v1855_v36 = vmul.f32 1.442695, %v1854_v23 }
0x123c   : > { %2566 = vpow2.f32 %v1855_v36 }
0x123e   : > { %v2565_v24 = vpop.eup %2564 }
0x123f   : > { %v1745_v26 = vsel %vm676_vm4, %v2565_v24, 0.0 }
0x1240   : > { %1746 = vadd.xlane.f32.xlu0 %v1745_v26 }
0x1246   : > { %v2567_v27 = vpop.eup %2566 }
0x1247   : > { %v1857_v28 = vsel %vm676_vm4, %v2567_v27, 0.0 }
0x1248   : > { %1858 = vadd.xlane.f32.xlu1 %v1857_v28 }
0x1256   : > { %1639 = vrot.lane.b32.xlu0 %v2990_v30, %s3154_s30 }
0x1259   : > { %1863 = vrot.lane.b32.xlu1 %v2990_v30, %s3155_s0 }
0x12c5   : > { %v1635_v31 = vpop.xlane.xlu0 %1634 }
0x12c6   : > { %2568 = vrcp.f32 %v1635_v31 }
0x12cd   : > { %v1747_v32 = vpop.xlane.xlu0 %1746 }
0x12ce   : > { %2570 = vrcp.f32 %v1747_v32 }
0x12d0   : > { %v2569_v62 = vpop.eup %2568 }
0x12d1   : > { %v1637_v34 = vmul.f32 %v2569_v62, %v2563_v17  ;;  %v1640_v35 = vpop.permute.xlu0 %1639 }
0x12d2   : > { %v1645_v38 = vsel %vm742_vm5, %v1640_v35, 0 }
0x12d3   : > { %2427 = vmatpush3.bf16.msra.mxu1 %v1645_v38  ;;  %v1638_v39 = vpack.c.bf16 %v1637_v34, %v1637_v34 }
0x12d4   : > { %2438 = vmatprep.subr.bf16.mxu1 %v2590_v8 }
0x12d5   : > { %v1859_v40 = vpop.xlane.xlu1 %1858 }
0x12d6   : > { %2572 = vrcp.f32 %v1859_v40  ;;  %2429 = vmatmul.mubr.msk.bf16.vlgmr.msra.gmra.mrb[32].mxu1 %vm676_vm4, %v1638_v39 }
0x12d7   : > { %2439 = vmatpush3.bf16.msra.mxu1 %v1757_v41  ;;  %2440 = vmatprep.mubr.msk.bf16.mxu1 %vm2591_vm1, %v2590_v8 }
0x12d8   : > { %v2571_v30 = vpop.eup %2570  ;;  %2450 = vmatprep.subr.bf16.mxu1 %v2590_v8 }
0x12d9   : > { %v1749_v42 = vmul.f32 %v2571_v30, %v2565_v24  ;;  %v1864_v50 = vpop.permute.xlu1 %1863 }
0x12da   : > { %v1869_v52 = vsel %vm742_vm5, %v1864_v50, 0 }
0x12db   : > { %v1750_v51 = vpack.c.bf16 %v1749_v42, %v1749_v42 }
0x12de   : > { %2441 = vmatmul.mubr.msk.bf16.vlgmr.msra.gmra.mrb[36].mxu1 %vm676_vm4, %v1750_v51 }
0x12df   : > { %2451 = vmatpush3.bf16.msra.mxu1 %v1869_v52  ;;  %2452 = vmatprep.mubr.msk.bf16.mxu1 %vm2591_vm1, %v2590_v8 }
0x12e0   : > { %v2573_v2 = vpop.eup %2572  ;;  %2464 = vmatprep.subr.bf16.mxu1 %v2590_v8 }
0x12e1   : > { %v1861_v53 = vmul.f32 %v2573_v2, %v2567_v27 }
0x12e3   : > { %v1862_v54 = vpack.c.bf16 %v1861_v53, %v1861_v53 }
0x12e6   : > { %2453 = vmatmul.mubr.msk.bf16.vlgmr.msra.gmra.mrb[40].mxu1 %vm676_vm4, %v1862_v54 }
0x12e7   : > { %2465 = vmatpush3.bf16.msra.mxu1 %v2877_v0  ;;  %2468 = vmatprep.mubr.msk.bf16.mxu1 %vm2591_vm1, %v2590_v8 }
0x12e8   : > { %2466 = vmatprep.subr.bf16.mxu1 %v2590_v8 }
0x12eb   : > { %2467 = vmatpush3.bf16.msra.mxu1 %v2883_v43 }
0x13a9   : > { %v1681_v55 = vpop.f32.mrb[32].mxu1 }
0x13aa   : > { %1912 = vrot.lane.b32.xlu1 %v1681_v55, %s3156_s17  ;;  %v2430_v10 = vpop.f32.mrb[33].mxu1 }
0x13ab   : > { %v1684_v56 = vpop.f32.mrb[34].mxu1 }
0x13ac   : > { %v2431_v58 = vpop.f32.mrb[35].mxu1 }
0x13b1   : > { %v1793_v18 = vpop.f32.mrb[36].mxu1 }
0x13b2   : > { %1916 = vrot.lane.b32.xlu0 %v1793_v18, %s3157_s18  ;;  %v2442_v21 = vpop.f32.mrb[37].mxu1 }
0x13b3   : > { %v1796_v25 = vpop.f32.mrb[38].mxu1 }
0x13b4   : > { %v2443_v59 = vpop.f32.mrb[39].mxu1 }
0x13b5   : > { %v2236_v59 = vld [vmem:[%s3140_s14] ss:$0 sm:$0xff] }
0x13b9   : > { %v1905_v0 = vpop.f32.mrb[40].mxu1 }
0x13ba   : > { %1920 = vrot.lane.b32.xlu1 %v1905_v0, %s3158_s19  ;;  %v2454_v61 = vpop.f32.mrb[41].mxu1 }
0x13bb   : > { %v1908_v63 = vpop.f32.mrb[42].mxu1 }
0x13bc   : > { %v2455_v1 = vpop.f32.mrb[43].mxu1  ;;  %v2237_v63 = vld [vmem:[%s3141_s15] ss:$0 sm:$0xff] }
0x141c   : > { %v1913_v4 = vpop.permute.xlu1 %1912 }
0x141d   : > { %v1923_v5 = vsel %vm676_vm4, %v3041_v37, %v1913_v4 }
0x1424   : > { %v1917_v43 = vpop.permute.xlu0 %1916 }
0x1425   : > { %v1924_v6 = vsel %vm1135_vm6, %v1923_v5, %v1917_v43 }
0x142c   : > { %v1921_v11 = vpop.permute.xlu1 %1920 }
0x142d   : > { %v1925_v12 = vsel %vm1137_vm7, %v1924_v6, %v1921_v11 }
0x142e   : > { %v1926_v13 = vpack.c.bf16 %v1925_v12, %v1925_v12 }
0x1430   : > { %2461 = vmatmul.mubr.msk.bf16.vlgmr.msra.gmra.mrb[40].mxu0 %vm573_vm0, %v1926_v13 }
0x1431   : > { %2473 = vmatpush3.bf16.msra.mxu0 %v2891_v44  ;;  %2488 = vmatprep.mubr.msk.bf16.mxu0 %vm2591_vm1, %v2590_v8 }
0x1432   : > { %2474 = vmatprep.subr.bf16.mxu0 %v2590_v8 }
0x1435   : > { %2475 = vmatpush3.bf16.msra.mxu0 %v2897_v45 }
0x1436   : > { %2476 = vmatprep.subr.bf16.mxu0 %v2590_v8 }
0x1439   : > { %2477 = vmatpush3.bf16.msra.mxu0 %v2904_v46 }
0x143a   : > { %2478 = vmatprep.subr.bf16.mxu0 %v2590_v8 }
0x143d   : > { %2479 = vmatpush3.bf16.msra.mxu0 %v2911_v47 }
0x143e   : > { %2480 = vmatprep.subr.bf16.mxu0 %v2590_v8 }
0x1441   : > { %2481 = vmatpush3.bf16.msra.mxu0 %v2918_v48 }
0x1442   : > { %2482 = vmatprep.subr.bf16.mxu0 %v2590_v8 }
0x1445   : > { %2483 = vmatpush3.bf16.msra.mxu0 %v2925_v49 }
0x1446   : > { %2484 = vmatprep.subr.bf16.mxu0 %v2590_v8 }
0x1449   : > { %2485 = vmatpush3.bf16.msra.mxu0 %v2952_v3 }
0x144a   : > { %2486 = vmatprep.subr.bf16.mxu0 %v2590_v8 }
0x144d   : > { %2487 = vmatpush3.bf16.msra.mxu0 %v2959_v7 }
0x1503   : > { %v1964_v44 = vpop.f32.mrb[40].mxu0 }
0x1504   : > { %v1970_v45 = vadd.f32 %v1964_v44, %v2978_v22  ;;  %v2462_v46 = vpop.f32.mrb[41].mxu0 }
0x1505   : > { %v1967_v47 = vpop.f32.mrb[42].mxu0 }
0x1506   : > { %v1971_v37 = vadd.f32 %v2864_v29, %v1970_v45  ;;  %v2463_v48 = vpop.f32.mrb[43].mxu0 }
0x1508   : > { %v1972_v14 = vsel %vm573_vm0, %v1971_v37, 0.0 }
0x1509   : > { %1973 = vadd.xlane.f32.xlu0 %v1972_v14 }
0x1596   : > { %v1974_v49 = vpop.xlane.xlu0 %1973 }
0x1597   : > { %v1975_v16 = vmul.f32 0.03125, %v1974_v49 }
0x1599   : > { %v1976_v17 = vsub.f32 %v1971_v37, %v1975_v16 }
0x159b   : > { %v1977_v19 = vmul.f32 %v1976_v17, %v1976_v17  ;;  %v1982_v26 = vmul.f32 %v2933_v57, %v1976_v17 }
0x159d   : > { %v1978_v3 = vsel %vm573_vm0, %v1977_v19, 0.0 }
0x159e   : > { %1979 = vadd.xlane.f32.xlu1 %v1978_v3 }
0x162b   : > { %v1980_v8 = vpop.xlane.xlu1 %1979 }
0x162c   : > { %v1981_v7 = vmul.f32 0.032258064, %v1980_v8 }
0x162e   : > { %2574 = vrsqrt.f32 %v1981_v7  ;;  %vm1985_vm12 = vcmp.eq.f32.partialorder %v1981_v7, inf  ;;  %v1988_v23 = vand.u32 2147483648, %v1981_v7  ;;  %vm1987_vm13 = vcmp.eq.f32.partialorder %v1981_v7, 0.0 }
0x1638   : > { %v2575_v20 = vpop.eup %2574 }
0x1639   : > { %v1984_v22 = vmul.f32 %v2575_v20, %v1981_v7 }
0x163b   : > { %v1986_v36 = vsel %vm1985_vm12, %v1981_v7, %v1984_v22 }
0x163c   : > { %v1989_v29 = vsel %vm1987_vm13, %v1988_v23, %v1986_v36 }
0x163d   : > { %v1990_v24 = vadd.f32 1e-06, %v1989_v29 }
0x163f   : > { %2576 = vrcp.f32 %v1990_v24 }
0x1649   : > { %v2577_v27 = vpop.eup %2576 }
0x164a   : > { %v1992_v28 = vmul.f32 %v2577_v27, %v1982_v26 }
0x164c   : > { %v1993_v31 = vadd.f32 %v2939_v60, %v1992_v28 }
0x164e   : > { %v1994_v32 = vpack.c.bf16 %v1993_v31, %v1993_v31 }
0x1650   : > { %2469 = vmatmul.mubr.msk.bf16.vlgmr.msra.gmra.mrb[44].mxu1 %vm573_vm0, %v1994_v32 }
0x1723   : > { %v2032_v62 = vpop.f32.mrb[44].mxu1 }
0x1724   : > { %v2033_v33 = vadd.f32 %v2966_v9, %v2032_v62  ;;  %v2470_v34 = vpop.f32.mrb[45].mxu1 }
0x1725   : > { %v2035_v35 = vpop.f32.mrb[46].mxu1 }
0x1726   : > { %v2038_v38 = vmax.f32 %v2033_v33, 0.0  ;;  %v2471_v39 = vpop.f32.mrb[47].mxu1 }
0x1728   : > { %v2039_v40 = vpack.c.bf16 %v2038_v38, %v2038_v38 }
0x172a   : > { %2489 = vmatmul.mubr.bf16.vlgmr.msra.gmra.mrb[44].mxu0 %v2039_v40 }
0x17fd   : > { %v2074_v41 = vpop.f32.mrb[44].mxu0 }
0x17fe   : > { %v2080_v30 = vadd.f32 %v2074_v41, %v1971_v37  ;;  %v2490_v42 = vpop.f32.mrb[45].mxu0 }
0x17ff   : > { %v2077_v57 = vpop.f32.mrb[46].mxu0 }
0x1800   : > { %v2491_v50 = vpop.f32.mrb[47].mxu0  ;;  %v2081_v51 = vadd.f32 %v2974_v15, %v2080_v30 }
0x1802   : > { %v2084_v60 = vsel %vm573_vm0, %v2081_v51, 0.0 }
0x1803   : > { %2085 = vadd.xlane.f32.xlu0 %v2084_v60 }
0x1890   : > { %v2086_v52 = vpop.xlane.xlu0 %2085 }
0x1891   : > { %v2087_v2 = vmul.f32 0.03125, %v2086_v52 }
0x1893   : > { %v2088_v53 = vsub.f32 %v2081_v51, %v2087_v2 }
0x1895   : > { %v2089_v9 = vmul.f32 %v2088_v53, %v2088_v53  ;;  %v2100_v0 = vmul.f32 %v2236_v59, %v2088_v53 }
0x1897   : > { %v2090_v54 = vsel %vm573_vm0, %v2089_v9, 0.0 }
0x1898   : > { %2091 = vadd.xlane.f32.xlu0 %v2090_v54 }
0x1925   : > { %v2092_v55 = vpop.xlane.xlu0 %2091 }
0x1926   : > { %v2093_v10 = vmul.f32 0.032258064, %v2092_v55 }
0x1928   : > { %2578 = vrsqrt.f32 %v2093_v10  ;;  %vm2103_vm14 = vcmp.eq.f32.partialorder %v2093_v10, inf  ;;  %v2106_v18 = vand.u32 2147483648, %v2093_v10  ;;  %vm2105_vm15 = vcmp.eq.f32.partialorder %v2093_v10, 0.0 }
0x1932   : > { %v2579_v56 = vpop.eup %2578 }
0x1933   : > { %v2102_v58 = vmul.f32 %v2579_v56, %v2093_v10 }
0x1935   : > { %v2104_v21 = vsel %vm2103_vm14, %v2093_v10, %v2102_v58 }
0x1936   : > { %v2107_v15 = vsel %vm2105_vm15, %v2106_v18, %v2104_v21 }
0x1937   : > { %v2108_v25 = vadd.f32 1e-06, %v2107_v15 }
0x1939   : > { %2580 = vrcp.f32 %v2108_v25 }
0x1943   : > { %v2581_v61 = vpop.eup %2580 }
0x1944   : > { %v2110_v1 = vmul.f32 %v2581_v61, %v2100_v0 }
0x1946   : > { %v2117_v4 = vadd.f32 %v2237_v63, %v2110_v1 }
0x1948   : > { %2118 = vst.msk [vmem:[%s533_s26] sm:$0xff] %vm573_vm0, %v2117_v4 }
0x1949 PF: > { %s26_s21 = sadd.s32 1, %s2588_s21  }
0x194a   : > { %p23_p4 = scmp.ge.s32.totalorder %s26_s21, 4  }
0x194c   :  { %25 = sbr.rel (!%p23_p4) target bundleno = 2 (0x2), region = 117 }

// kernel: transformer_forward.3
= control target key start
LH: loop header
LB: loop body
LE: loop exit
PB: predicated region body
PF: predicated region fallthrough
CT: control target
= control target key end

     0   :  { %s5632_s0 = inlined_call_operand.vmem [shape: f32[2,8,32], index: 0, kind: input, shape index: {}]   ;;  %s5633_s1 = inlined_call_operand.vmem [shape: f32[2,8,32], index: 1, kind: input, shape index: {}]   ;;  %s5634_s2 = inlined_call_operand.vmem [shape: f32[2,8,8], index: 2, kind: input, shape index: {}]   ;;  %s5635_s3 = inlined_call_operand.vmem [shape: f32[2,8,8], index: 3, kind: input, shape index: {}]   ;;  %s5636_s4 = inlined_call_operand.vmem [shape: f32[1,32], index: 4, kind: input, shape index: {}]   ;;  %s5637_s5 = inlined_call_operand.vmem [shape: f32[1,32], index: 5, kind: input, shape index: {}]   ;;  %s5638_s6 = inlined_call_operand.vmem [shape: bf16[32,96], index: 6, kind: input, shape index: {}]   ;;  %s5639_s7 = inlined_call_operand.vmem [shape: f32[1,96], index: 7, kind: input, shape index: {}]   ;;  %s5640_s8 = inlined_call_operand.vmem [shape: bf16[32,32], index: 8, kind: input, shape index: {}]   ;;  %s5641_s9 = inlined_call_operand.vmem [shape: f32[1,32], index: 9, kind: input, shape index: {}]   ;;  %s5642_s10 = inlined_call_operand.vmem [shape: f32[1,32], index: 10, kind: input, shape index: {}]   ;;  %s5643_s11 = inlined_call_operand.vmem [shape: f32[1,32], index: 11, kind: input, shape index: {}]   ;;  %s5644_s12 = inlined_call_operand.vmem [shape: bf16[32,32], index: 12, kind: input, shape index: {}]   ;;  %s5645_s13 = inlined_call_operand.vmem [shape: f32[1,32], index: 13, kind: input, shape index: {}]   ;;  %s5646_s14 = inlined_call_operand.vmem [shape: bf16[32,64], index: 14, kind: input, shape index: {}]   ;;  %s5647_s15 = inlined_call_operand.vmem [shape: f32[1,64], index: 15, kind: input, shape index: {}]   ;;  %s5648_s16 = inlined_call_operand.vmem [shape: bf16[32,32], index: 16, kind: input, shape index: {}]   ;;  %s5649_s17 = inlined_call_operand.vmem [shape: f32[1,32], index: 17, kind: input, shape index: {}]   ;;  %s5650_s18 = inlined_call_operand.vmem [shape: f32[1,32], index: 18, kind: input, shape index: {}]   ;;  %s5651_s19 = inlined_call_operand.vmem [shape: f32[1,32], index: 19, kind: input, shape index: {}]   ;;  %s5652_s20 = inlined_call_operand.vmem [shape: bf16[32,128], index: 20, kind: input, shape index: {}]   ;;  %s5653_s21 = inlined_call_operand.vmem [shape: f32[1,128], index: 21, kind: input, shape index: {}]   ;;  %s5654_s22 = inlined_call_operand.vmem [shape: bf16[128,32], index: 22, kind: input, shape index: {}]   ;;  %s5655_s23 = inlined_call_operand.vmem [shape: f32[1,32], index: 23, kind: input, shape index: {}]   ;;  %s5656_s24 = inlined_call_operand.vmem [shape: f32[1,32], index: 24, kind: input, shape index: {}]   ;;  %s5657_s25 = inlined_call_operand.vmem [shape: f32[1,32], index: 25, kind: input, shape index: {}]   ;;  %s5658_s26 = inlined_call_operand.vmem [shape: bf16[32,13], index: 26, kind: input, shape index: {}]   ;;  %s5659_s27 = inlined_call_operand.vmem [shape: f32[1,13], index: 27, kind: input, shape index: {}]   ;;  %s5660_s28 = inlined_call_operand.hbm [shape: f32[2,8,13], index: 28, kind: output, shape index: {}]  }
   0x1   :  { %5709 = sst [smem:[#allocation15_spill]] %s5632_s0 }
   0x2   :  { %5710 = sst [smem:[#allocation16_spill]] %s5633_s1 }
   0x3   :  { %5711 = sst [smem:[#allocation17_spill]] %s5634_s2 }
   0x4   :  { %5712 = sst [smem:[#allocation18_spill]] %s5635_s3 }
   0x5   :  { %5713 = sst [smem:[#allocation19_spill]] %s5636_s4 }
   0x6   :  { %5714 = sst [smem:[#allocation20_spill]] %s5637_s5 }
   0x7   :  { %5715 = sst [smem:[#allocation21_spill]] %s5638_s6 }
   0x8   :  { %5716 = sst [smem:[#allocation22_spill]] %s5639_s7 }
   0x9   :  { %5717 = sst [smem:[#allocation23_spill]] %s5640_s8 }
   0xa   :  { %5718 = sst [smem:[#allocation24_spill]] %s5641_s9 }
   0xb   :  { %5719 = sst [smem:[#allocation25_spill]] %s5642_s10 }
   0xc   :  { %5720 = sst [smem:[#allocation26_spill]] %s5643_s11 }
   0xd   :  { %5721 = sst [smem:[#allocation27_spill]] %s5644_s12 }
   0xe   :  { %5722 = sst [smem:[#allocation28_spill]] %s5646_s14 }
   0xf   :  { %5723 = sst [smem:[#allocation29_spill]] %s5647_s15 }
  0x10   :  { %5724 = sst [smem:[#allocation30_spill]] %s5648_s16 }
  0x11   :  { %5725 = sst [smem:[#allocation31_spill]] %s5649_s17 }
  0x12   :  { %5726 = sst [smem:[#allocation32_spill]] %s5656_s24 }
  0x13   :  { %5727 = sst [smem:[#allocation33_spill]] %s5657_s25 }
  0x14   :  { %5728 = sst [smem:[#allocation34_spill]] %s5658_s26 }
  0x15   :  { %5729 = sst [smem:[#allocation35_spill]] %s5659_s27 }
  0x16   :  { %5730 = sst [smem:[#allocation36_spill]] %s5660_s28 }
  0x17   :  { %33 = vsyncpa [#allocation3], 0 }
  0x18   :  { %35 = vsyncpa [#allocation3 + $0x1], 0  ;;  %s4840_s8 = smov 0   ;;  %s4842_s5 = smov 0  }
  0x19   :  { %s4844_s9 = smov 0   ;;  %s4846_s30 = smov 0  }
  0x1a LB: > { %5731 = sst [smem:[#allocation5_spill]] %s4664_s8  ;;  %s4861_s3 = sadd.s32 4294967295, %s4676_s30   ;;  %s4676_s30 = sphi %s4846_s30, %s5789_s30   ;;  %s4672_s9 = sphi %s4844_s9, %s5792_s9   ;;  %s4668_s5 = sphi %s4842_s5, %s5791_s5   ;;  %s4664_s8 = sphi %s4840_s8, %s5790_s8  }
  0x1b   : > { %5732 = sst [smem:[#allocation6_spill]] %s4668_s5  ;;  %s3893_s6 = sadd.s32 4294967294, %s4676_s30  }
  0x1c   : > { %5733 = sst [smem:[#allocation7_spill]] %s4672_s9  ;;  %s4865_s10 = sadd.s32 1, %s4676_s30  }
  0x1d   : > { %5734 = sst [smem:[#allocation8_spill]] %s4676_s30  ;;  %s656_s0 = sadd.s32 1, %s4672_s9 }
  0x1e   : > { %5735 = sst [smem:[#allocation9_spill]] %s4861_s3  ;;  %s653_s11 = ssub.s32 %s4676_s30, %s4865_s10 }
  0x1f   : > { %5736 = sst [smem:[#allocation10_spill]] %s4865_s10  ;;  %p666_p0 = scmp.ne.s32.totalorder %s4672_s9, %s4668_s5 }
  0x20   : > { %p654_p1 = scmp.eq.s32.totalorder %s653_s11, 0  ;;  %p667_p2 = scmp.eq.s32.totalorder %s4861_s3, 1 }
  0x21   : > { %p672_p3 = scmp.ne.s32.totalorder %s4668_s5, %s4664_s8  ;;  %p673_p4 = scmp.eq.s32.totalorder %s3893_s6, 1 }
  0x22   : > { %s4876_s29 = scalar_select %p654_p1, %s4672_s9, %s656_s0  }
  0x23   : > { %p4878_p5 = por %p667_p2, %p666_p0  ;;  %p4882_p6 = por %p673_p4, %p672_p3 }
  0x24   : > { %5737 = sst [smem:[#allocation11_spill]] %s4876_s29  ;;  %p3896_p7 = scmp.ge.s32.totalorder %s4676_s30, 1 }
  0x25   : > { %s5738_s2 = scalar_select %p4878_p5, 1, 0 }
  0x26   : > { %s5740_s7 = scalar_select %p4882_p6, 1, 0 }
  0x27   : > { %5739 = sst [smem:[#allocation12_spill]] %s5738_s2  ;;  %p791_p8 = scmp.lt.s32.totalorder %s4676_s30, 3 }
  0x28   : > { %5741 = sst [smem:[#allocation13_spill]] %s5740_s7 }
  0x29   : > { %p792_p9 = pnand %p3896_p7, %p791_p8 }
  0x2b   : > { %795 = sbr.rel (%p792_p9) target bundleno = 9790 (0x263e), region = 132 }
  0x32   : > { %p876_p10 = scmp.lt.s32.totalorder %s4861_s3, 1  ;;  %vm969_vm0 = vcmask 261120   ;;  %s5742_s0 = sld [smem:[#allocation15_spill]]  ;;  %v4678_v8 = vmov 0.0   ;;  %vm4679_vm1 = vmmov 0   ;;  %vm1115_vm4 = vcmask 64512  }
  0x33   : > { %s5743_s14 = sld [smem:[#allocation28_spill]]  ;;  %4106 = vmatprep.subr.bf16.mxu0 %v4678_v8  ;;  %4128 = vmatprep.subr.bf16.mxu1 %v4678_v8  ;;  %s5744_s9 = sld [smem:[#allocation16_spill]]  ;;  %vm1181_vm5 = vcmask 1043456   ;;  %vm1574_vm6 = vcmask 130048   ;;  %vm1576_vm7 = vcmask 195584  }
  0x34   : > { %s877_s12 = scalar_select %p876_p10, %s4861_s3, 1  ;;  %4110 = vmatprep.mubr.msk.bf16.mxu0 %vm4679_vm1, %v4678_v8  ;;  %4130 = vmatprep.mubr.msk.bf16.mxu1 %vm4679_vm1, %v4678_v8 }
  0x35   : > { %s5745_s7 = sld [smem:[#allocation21_spill]]  ;;  %s5674_s6 = smov 120  }
  0x36   : > { %s4890_s1 = sshll.u32 %s877_s12, 3  ;;  %s5747_s12 = sld [smem:[#allocation20_spill]] }
  0x37   : > { %s5682_s29 = smov 88   ;;  %s5690_s4 = smov 112  }
  0x38   : > { %s879_s11 = scalar_lea.vmem %s5742_s0, %s4890_s1  ;;  %s5746_s0 = sld [smem:[#allocation19_spill]] }
  0x39   : > { %v4896_v0 = vld [vmem:[%s879_s11] sm:$0xff]  ;;  %v4490_v9 = vld [vmem:[%s5743_s14 + $0x8] sm:$0xff]   ;;  %s883_s10 = scalar_lea.vmem %s5744_s9, %s4890_s1  ;;  %s5680_s11 = smov 96  }
  0x3a   : > { %v1013_v1 = vsel %vm969_vm0, %v4896_v0, 0.0  ;;  %v4489_v7 = vld [vmem:[%s5743_s14] sm:$0xff]   ;;  %s5676_s9 = smov 80   ;;  %s5678_s14 = smov 72  }
  0x3b   : > { %1014 = vadd.xlane.f32.xlu0 %v1013_v1  ;;  %4107 = vmatpush3.bf16.msra.mxu0 %v4489_v7  ;;  %v894_v10 = vld [vmem:[%s883_s10] sm:$0xff]  ;;  %v4492_v13 = vld [vmem:[%s5745_s7 + $0x8] sm:$0xff]   ;;  %s5748_s10 = sld [smem:[#allocation22_spill]]  ;;  %s5751_s15 = sld [smem:[#allocation29_spill]] }
  0x3c   : > { %4108 = vmatprep.subr.bf16.mxu0 %v4678_v8  ;;  %v950_v11 = vpack.c.bf16 %v894_v10, %v894_v10  ;;  %v4491_v12 = vld [vmem:[%s5745_s7] sm:$0xff]   ;;  %s5756_s8 = sld [smem:[#allocation25_spill]]  ;;  %s5758_s28 = sld [smem:[#allocation26_spill]] }
  0x3d   : > { %v3907_v25 = vld [vmem:[%s5747_s12] ss:$0 sm:$0xff]  ;;  %s5759_s30 = smov 112   ;;  %s5760_s27 = smov 104  }
  0x3e   : > { %v3906_v22 = vld [vmem:[%s5746_s0] ss:$0 sm:$0xff]  ;;  %s5765_s2 = smov 72   ;;  %s5768_s16 = sld [smem:[#allocation30_spill]] }
  0x3f   : > { %4109 = vmatpush3.bf16.msra.mxu0 %v4490_v9  ;;  %s5769_s26 = smov 16   ;;  %s5770_s24 = smov 24  }
  0x40   : > { %4114 = vmatprep.subr.bf16.mxu0 %v4678_v8  ;;  %s5771_s17 = sld [smem:[#allocation31_spill]]  ;;  %s5784_s5 = sld [smem:[#allocation36_spill]] }
  0x41   : > { %v3908_v33 = vld [vmem:[%s5748_s10] ss:$0 sm:$0xff] }
  0x42   : > { %4111 = vmatmul.mubr.msk.bf16.vlgmr.msra.gmra.mrb[0].mxu0 %vm969_vm0, %v950_v11 }
  0x43   : > { %4115 = vmatpush3.bf16.msra.mxu0 %v4491_v12  ;;  %4118 = vmatprep.mubr.msk.bf16.mxu0 %vm4679_vm1, %v4678_v8 }
  0x44   : > { %4116 = vmatprep.subr.bf16.mxu0 %v4678_v8 }
  0x47   : > { %4117 = vmatpush3.bf16.msra.mxu0 %v4492_v13 }
  0x48   : > { %4122 = vmatprep.subr.bf16.mxu0 %v4678_v8 }
  0xc8   : > { %v1015_v2 = vpop.xlane.xlu0 %1014 }
  0xc9   : > { %v1017_v3 = vmul.f32 0.03125, %v1015_v2 }
  0xcb   : > { %v1018_v4 = vsub.f32 %v4896_v0, %v1017_v3 }
  0xcd   : > { %v1019_v5 = vmul.f32 %v1018_v4, %v1018_v4  ;;  %v1031_v23 = vmul.f32 %v3906_v22, %v1018_v4 }
  0xcf   : > { %v1020_v6 = vsel %vm969_vm0, %v1019_v5, 0.0 }
  0xd0   : > { %1021 = vadd.xlane.f32.xlu0 %v1020_v6 }
 0x115   : > { %v4940_v29 = vpop.f32.mrb[0].mxu0 }
 0x116   : > { %v4112_v30 = vpop.f32.mrb[1].mxu0 }
 0x117   : > { %v1010_v31 = vpop.f32.mrb[2].mxu0 }
 0x118   : > { %v4113_v32 = vpop.f32.mrb[3].mxu0 }
 0x15d   : > { %v1022_v14 = vpop.xlane.xlu0 %1021 }
 0x15e   : > { %v1024_v15 = vmul.f32 0.032258064, %v1022_v14 }
 0x160   : > { %4511 = vrsqrt.f32 %v1024_v15  ;;  %vm1034_vm2 = vcmp.eq.f32.partialorder %v1024_v15, inf  ;;  %v1037_v18 = vand.u32 2147483648, %v1024_v15  ;;  %vm1036_vm3 = vcmp.eq.f32.partialorder %v1024_v15, 0.0 }
 0x16a   : > { %v4512_v16 = vpop.eup %4511 }
 0x16b   : > { %v1033_v17 = vmul.f32 %v4512_v16, %v1024_v15 }
 0x16d   : > { %v1035_v19 = vsel %vm1034_vm2, %v1024_v15, %v1033_v17 }
 0x16e   : > { %v1038_v20 = vsel %vm1036_vm3, %v1037_v18, %v1035_v19 }
 0x16f   : > { %v1039_v21 = vadd.f32 1e-06, %v1038_v20 }
 0x171   : > { %4513 = vrcp.f32 %v1039_v21 }
 0x17b   : > { %v4514_v24 = vpop.eup %4513 }
 0x17c   : > { %v1041_v26 = vmul.f32 %v4514_v24, %v1031_v23 }
 0x17e   : > { %v1048_v27 = vadd.f32 %v3907_v25, %v1041_v26 }
 0x180   : > { %v1049_v28 = vpack.c.bf16 %v1048_v27, %v1048_v27 }
 0x182   : > { %4119 = vmatmul.mubr.msk.bf16.vlgmr.msra.gmra.mrb[4].mxu0 %vm969_vm0, %v1049_v28 }
 0x183   : > { %4124 = vmatprep.mubr.msk.bf16.mxu0 %vm4679_vm1, %v4678_v8 }
 0x255   : > { %v1105_v34 = vpop.f32.mrb[4].mxu0 }
 0x256   : > { %v1106_v35 = vadd.f32 %v3908_v33, %v1105_v34  ;;  %v4120_v36 = vpop.f32.mrb[5].mxu0 }
 0x257   : > { %v1108_v37 = vpop.f32.mrb[6].mxu0 }
 0x258   : > { %v4945_v38 = vpack.c.bf16 %v1106_v35, %v1106_v35  ;;  %v4121_v39 = vpop.f32.mrb[7].mxu0 }
 0x25a   : > { %1225 = vrot.lane.b32.xlu0 %v4945_v38, %s5674_s6  ;;  %1113 = vrot.lane.b32.xlu1 %v4945_v38, %s5680_s11  ;;  %s5688_s6 = smov 104   ;;  %s5749_s11 = sld [smem:[#allocation17_spill]] }
 0x25e   : > { %1227 = vrot.lane.b32.xlu1 %v4945_v38, %s5682_s29 }
 0x260   : > { %s4986_s29 = scalar_lea.vmem %s5749_s11, %s4890_s1  ;;  %s5687_s11 = smov 56  }
 0x261   : > { %v895_v51 = vld [vmem:[%s4986_s29] sm:$0xff] }
 0x262   : > { %1339 = vrot.lane.b32.xlu1 %v4945_v38, %s5676_s9  ;;  %s5685_s9 = smov 48  }
 0x266   : > { %1337 = vrot.lane.b32.xlu1 %v4945_v38, %s5690_s4  ;;  %s5757_s4 = smov %s5756_s8 }
 0x26a   : > { %1451 = vrot.lane.b32.xlu1 %v4945_v38, %s5678_s14  ;;  %s5684_s14 = smov 64  }
 0x26e   : > { %1449 = vrot.lane.b32.xlu1 %v4945_v38, %s5688_s6  ;;  %s5697_s6 = smov 8  }
 0x2cc   : > { %v1114_v40 = vpop.permute.xlu1 %1113  ;;  %v1226_v45 = vpop.permute.xlu0 %1225 }
 0x2cd   : > { %v1120_v41 = vsel %vm1115_vm4, %v1114_v40, 0 }
 0x2ce   : > { %4123 = vmatpush3.bf16.xpose.msra.mxu0 %v1120_v41 }
 0x2cf   : > { %4134 = vmatprep.subr.bf16.mxu0 %v4678_v8 }
 0x2d0   : > { %v1228_v42 = vpop.permute.xlu1 %1227 }
 0x2d1   : > { %v1233_v43 = vsel %vm1115_vm4, %v1228_v42, 0 }
 0x2d4   : > { %v1340_v44 = vpop.permute.xlu1 %1339 }
 0x2d5   : > { %4125 = vmatmul.mubr.msk.bf16.vlgmr.msra.gmra.mrb[8].mxu0 %vm1115_vm4, %v4945_v38  ;;  %v1345_v47 = vsel %vm1115_vm4, %v1340_v44, 0 }
 0x2d6   : > { %4135 = vmatpush3.bf16.xpose.msra.mxu0 %v1233_v43  ;;  %4136 = vmatprep.mubr.msk.bf16.mxu0 %vm4679_vm1, %v4678_v8 }
 0x2d7   : > { %4146 = vmatprep.subr.bf16.mxu0 %v4678_v8 }
 0x2d8   : > { %v1338_v46 = vpop.permute.xlu1 %1337 }
 0x2dc   : > { %v1452_v48 = vpop.permute.xlu1 %1451 }
 0x2dd   : > { %4137 = vmatmul.mubr.msk.bf16.vlgmr.msra.gmra.mrb[12].mxu0 %vm1115_vm4, %v1226_v45  ;;  %v1457_v49 = vsel %vm1115_vm4, %v1452_v48, 0 }
 0x2de   : > { %4147 = vmatpush3.bf16.xpose.msra.mxu0 %v1345_v47  ;;  %4148 = vmatprep.mubr.msk.bf16.mxu0 %vm4679_vm1, %v4678_v8 }
 0x2df   : > { %4158 = vmatprep.subr.bf16.mxu0 %v4678_v8 }
 0x2e0   : > { %v1450_v50 = vpop.permute.xlu1 %1449 }
 0x2e5   : > { %4149 = vmatmul.mubr.msk.bf16.vlgmr.msra.gmra.mrb[16].mxu0 %vm1115_vm4, %v1338_v46 }
 0x2e6   : > { %4159 = vmatpush3.bf16.xpose.msra.mxu0 %v1457_v49  ;;  %4160 = vmatprep.mubr.msk.bf16.mxu0 %vm4679_vm1, %v4678_v8 }
 0x2e7   : > { %4170 = vmatprep.subr.bf16.mxu0 %v4678_v8 }
 0x2ed   : > { %4161 = vmatmul.mubr.msk.bf16.vlgmr.msra.gmra.mrb[20].mxu0 %vm1115_vm4, %v1450_v50 }
 0x2ee   : > { %4174 = vmatprep.mubr.msk.bf16.mxu0 %vm4679_vm1, %v4678_v8 }
 0x3a8   : > { %v1156_v52 = vpop.f32.mrb[8].mxu0 }
 0x3a9   : > { %v1162_v53 = vmul.f32 0.35355338, %v1156_v52  ;;  %v4126_v54 = vpop.f32.mrb[9].mxu0 }
 0x3aa   : > { %v1159_v55 = vpop.f32.mrb[10].mxu0 }
 0x3ab   : > { %v4127_v56 = vpop.f32.mrb[11].mxu0  ;;  %v1163_v57 = vadd.f32 %v1162_v53, %v895_v51 }
 0x3ad   : > { %v1164_v58 = vsel %vm1115_vm4, %v1163_v57, -inf }
 0x3ae   : > { %1165 = vmax.xlane.f32.xlu1 %v1164_v58 }
 0x3b0   : > { %v1269_v59 = vpop.f32.mrb[12].mxu0 }
 0x3b1   : > { %v1275_v60 = vmul.f32 0.35355338, %v1269_v59  ;;  %v4138_v61 = vpop.f32.mrb[13].mxu0 }
 0x3b2   : > { %v1272_v62 = vpop.f32.mrb[14].mxu0 }
 0x3b3   : > { %v4139_v63 = vpop.f32.mrb[15].mxu0  ;;  %v1276_v1 = vadd.f32 %v1275_v60, %v895_v51 }
 0x3b5   : > { %v1277_v2 = vsel %vm1115_vm4, %v1276_v1, -inf }
 0x3b6   : > { %1278 = vmax.xlane.f32.xlu0 %v1277_v2 }
 0x3b8   : > { %v1381_v3 = vpop.f32.mrb[16].mxu0 }
 0x3b9   : > { %v1387_v4 = vmul.f32 0.35355338, %v1381_v3  ;;  %v4150_v5 = vpop.f32.mrb[17].mxu0 }
 0x3ba   : > { %v1384_v6 = vpop.f32.mrb[18].mxu0 }
 0x3bb   : > { %v4151_v7 = vpop.f32.mrb[19].mxu0  ;;  %v1388_v9 = vadd.f32 %v1387_v4, %v895_v51 }
 0x3bd   : > { %v1389_v10 = vsel %vm1115_vm4, %v1388_v9, -inf }
 0x3be   : > { %1390 = vmax.xlane.f32.xlu1 %v1389_v10 }
 0x3c0   : > { %v1493_v11 = vpop.f32.mrb[20].mxu0 }
 0x3c1   : > { %v1499_v12 = vmul.f32 0.35355338, %v1493_v11  ;;  %v4162_v13 = vpop.f32.mrb[21].mxu0 }
 0x3c2   : > { %v1496_v14 = vpop.f32.mrb[22].mxu0 }
 0x3c3   : > { %v4163_v15 = vpop.f32.mrb[23].mxu0  ;;  %v1500_v16 = vadd.f32 %v1499_v12, %v895_v51 }
 0x3c5   : > { %v1501_v17 = vsel %vm1115_vm4, %v1500_v16, -inf }
 0x3c6   : > { %1502 = vmax.xlane.f32.xlu0 %v1501_v17 }
 0x43b   : > { %v1166_v18 = vpop.xlane.xlu1 %1165 }
 0x43c   : > { %v1167_v19 = vsub.f32 %v1163_v57, %v1166_v18 }
 0x43e   : > { %v1168_v20 = vmul.f32 1.442695, %v1167_v19  ;;  %v3902_v19 = vld [vmem:[%s5751_s15] ss:$0 sm:$0xff]  ;;  %s5761_s15 = sld [smem:[#allocation18_spill]] }
 0x440   : > { %4515 = vpow2.f32 %v1168_v20  ;;  %v1008_v20 = vadd.f32 %v3902_v19, %v4940_v29 }
 0x443   : > { %v1279_v21 = vpop.xlane.xlu0 %1278 }
 0x444   : > { %v1280_v22 = vsub.f32 %v1276_v1, %v1279_v21 }
 0x446   : > { %v1281_v23 = vmul.f32 1.442695, %v1280_v22 }
 0x448   : > { %4517 = vpow2.f32 %v1281_v23 }
 0x44a   : > { %v4516_v24 = vpop.eup %4515 }
 0x44b   : > { %v1170_v25 = vsel %vm1115_vm4, %v4516_v24, 0.0  ;;  %v1391_v34 = vpop.xlane.xlu1 %1390 }
 0x44c   : > { %1171 = vadd.xlane.f32.xlu1 %v1170_v25  ;;  %v1392_v35 = vsub.f32 %v1388_v9, %v1391_v34 }
 0x44e   : > { %v1393_v36 = vmul.f32 1.442695, %v1392_v35 }
 0x452   : > { %v4518_v26 = vpop.eup %4517 }
 0x453   : > { %v1503_v27 = vpop.xlane.xlu0 %1502  ;;  %v1283_v28 = vsel %vm1115_vm4, %v4518_v26, 0.0 }
 0x454   : > { %v1504_v30 = vsub.f32 %v1500_v16, %v1503_v27  ;;  %1284 = vadd.xlane.f32.xlu0 %v1283_v28 }
 0x456   : > { %v1505_v31 = vmul.f32 1.442695, %v1504_v30 }
 0x458   : > { %4519 = vpow2.f32 %v1505_v31 }
 0x459   : > { %4521 = vpow2.f32 %v1393_v36 }
 0x45d   : > { %1176 = vrot.lane.b32.xlu1 %v4945_v38, %s5684_s14  ;;  %s5686_s14 = smov 40  }
 0x462   : > { %v4520_v32 = vpop.eup %4519 }
 0x463   : > { %v1507_v33 = vsel %vm1115_vm4, %v4520_v32, 0.0  ;;  %v4522_v37 = vpop.eup %4521 }
 0x464   : > { %1508 = vadd.xlane.f32.xlu0 %v1507_v33  ;;  %v1395_v39 = vsel %vm1115_vm4, %v4522_v37, 0.0 }
 0x47a   : > { %1289 = vrot.lane.b32.xlu0 %v4945_v38, %s5687_s11  ;;  %s5750_s11 = sld [smem:[#allocation23_spill]] }
 0x480   : > { %v5028_v4 = vld [vmem:[%s5750_s11] sm:$0xff]   ;;  %v5036_v10 = vld [vmem:[%s5750_s11 + $0x8] sm:$0xff]   ;;  %s5136_s11 = scalar_lea.vmem %s5761_s15, %s4890_s1  ;;  %s5763_s1 = smov 88  }
 0x481   : > { %1396 = vadd.xlane.f32.xlu1 %v1395_v39  ;;  %4171 = vmatpush3.bf16.msra.mxu0 %v5028_v4  ;;  %5762 = sst [smem:[#allocation14_spill]] %s5136_s11  ;;  %s5767_s15 = smov 8  }
 0x482   : > { %4172 = vmatprep.subr.bf16.mxu0 %v4678_v8 }
 0x485   : > { %4173 = vmatpush3.bf16.msra.mxu0 %v5036_v10 }
 0x486   : > { %4186 = vmatprep.subr.bf16.mxu0 %v4678_v8 }
 0x492   : > { %1401 = vrot.lane.b32.xlu1 %v4945_v38, %s5685_s9  ;;  %s5693_s9 = smov 24  }
 0x496   : > { %1513 = vrot.lane.b32.xlu1 %v4945_v38, %s5686_s14  ;;  %s5695_s14 = smov 16  }
 0x4d9   : > { %v1172_v40 = vpop.xlane.xlu1 %1171 }
 0x4da   : > { %4523 = vrcp.f32 %v1172_v40 }
 0x4dd   : > { %v1177_v41 = vpop.permute.xlu1 %1176 }
 0x4de   : > { %v1183_v42 = vsel %vm1181_vm5, %v1177_v41, 0 }
 0x4df   : > { %4129 = vmatpush3.bf16.msra.mxu1 %v1183_v42 }
 0x4e0   : > { %4140 = vmatprep.subr.bf16.mxu1 %v4678_v8 }
 0x4e1   : > { %v1285_v44 = vpop.xlane.xlu0 %1284 }
 0x4e2   : > { %4525 = vrcp.f32 %v1285_v44 }
 0x4e4   : > { %v4524_v43 = vpop.eup %4523 }
 0x4e5   : > { %v1174_v45 = vmul.f32 %v4524_v43, %v4516_v24  ;;  %v5047_v24 = vpack.c.bf16 %v1008_v20, %v1008_v20 }
 0x4e7   : > { %v1175_v46 = vpack.c.bf16 %v1174_v45, %v1174_v45  ;;  %v5054_v30 = vsel %vm1115_vm4, %v5047_v24, 0 }
 0x4e9   : > { %4131 = vmatmul.mubr.msk.bf16.vlgmr.msra.gmra.mrb[0].mxu1 %vm1115_vm4, %v1175_v46 }
 0x4ea   : > { %4142 = vmatprep.mubr.msk.bf16.mxu1 %vm4679_vm1, %v4678_v8 }
 0x4ec   : > { %v4526_v38 = vpop.eup %4525 }
 0x4ed   : > { %v1287_v48 = vmul.f32 %v4526_v38, %v4518_v26 }
 0x4ef   : > { %v1288_v51 = vpack.c.bf16 %v1287_v48, %v1287_v48 }
 0x4f1   : > { %v1509_v47 = vpop.xlane.xlu0 %1508 }
 0x4f5   : > { %v1290_v49 = vpop.permute.xlu0 %1289 }
 0x4f6   : > { %v1295_v50 = vsel %vm1181_vm5, %v1290_v49, 0 }
 0x4f7   : > { %4141 = vmatpush3.bf16.msra.mxu1 %v1295_v50 }
 0x4f8   : > { %4152 = vmatprep.subr.bf16.mxu1 %v4678_v8 }
 0x4fa   : > { %4143 = vmatmul.mubr.msk.bf16.vlgmr.msra.gmra.mrb[4].mxu1 %vm1115_vm4, %v1288_v51 }
 0x4fb   : > { %4154 = vmatprep.mubr.msk.bf16.mxu1 %vm4679_vm1, %v4678_v8 }
 0x50e   : > { %v1397_v52 = vpop.xlane.xlu1 %1396 }
 0x50f   : > { %4527 = vrcp.f32 %v1397_v52  ;;  %v3924_v52 = vld [vmem:[%s5756_s8] ss:$0 sm:$0xff]  ;;  %s5764_s8 = smov 96  }
 0x510   : > { %4529 = vrcp.f32 %v1509_v47 }
 0x512   : > { %v1402_v53 = vpop.permute.xlu1 %1401 }
 0x513   : > { %v1407_v54 = vsel %vm1181_vm5, %v1402_v53, 0 }
 0x514   : > { %4153 = vmatpush3.bf16.msra.mxu1 %v1407_v54 }
 0x515   : > { %4164 = vmatprep.subr.bf16.mxu1 %v4678_v8 }
 0x516   : > { %v1514_v57 = vpop.permute.xlu1 %1513 }
 0x517   : > { %v1519_v60 = vsel %vm1181_vm5, %v1514_v57, 0 }
 0x519   : > { %v4528_v55 = vpop.eup %4527 }
 0x51a   : > { %v1399_v56 = vmul.f32 %v4528_v55, %v4522_v37  ;;  %v4530_v59 = vpop.eup %4529  ;;  %v3925_v55 = vld [vmem:[%s5758_s28] ss:$0 sm:$0xff] }
 0x51b   : > { %v1511_v61 = vmul.f32 %v4530_v59, %v4520_v32  ;;  %v3926_v59 = vld [vmem:[%s5645_s13] ss:$0 sm:$0xff] }
 0x51c   : > { %v1400_v58 = vpack.c.bf16 %v1399_v56, %v1399_v56 }
 0x51d   : > { %v1512_v62 = vpack.c.bf16 %v1511_v61, %v1511_v61 }
 0x51e   : > { %4155 = vmatmul.mubr.msk.bf16.vlgmr.msra.gmra.mrb[8].mxu1 %vm1115_vm4, %v1400_v58 }
 0x51f   : > { %4165 = vmatpush3.bf16.msra.mxu1 %v1519_v60  ;;  %4166 = vmatprep.mubr.msk.bf16.mxu1 %vm4679_vm1, %v4678_v8 }
 0x520   : > { %4178 = vmatprep.subr.bf16.mxu1 %v4678_v8 }
 0x526   : > { %4167 = vmatmul.mubr.msk.bf16.vlgmr.msra.gmra.mrb[12].mxu1 %vm1115_vm4, %v1512_v62 }
 0x527   : > { %4182 = vmatprep.mubr.msk.bf16.mxu1 %vm4679_vm1, %v4678_v8 }
 0x5bc   : > { %v1219_v63 = vpop.f32.mrb[0].mxu1 }
 0x5bd   : > { %v4132_v1 = vpop.f32.mrb[1].mxu1 }
 0x5be   : > { %v1222_v2 = vpop.f32.mrb[2].mxu1 }
 0x5bf   : > { %v4133_v3 = vpop.f32.mrb[3].mxu1 }
 0x5cd   : > { %v1331_v5 = vpop.f32.mrb[4].mxu1 }
 0x5ce   : > { %1562 = vrot.lane.b32.xlu0 %v1331_v5, %s5697_s6  ;;  %v4144_v6 = vpop.f32.mrb[5].mxu1  ;;  %s5755_s6 = sld [smem:[#allocation27_spill]] }
 0x5cf   : > { %v1334_v7 = vpop.f32.mrb[6].mxu1 }
 0x5d0   : > { %v4145_v9 = vpop.f32.mrb[7].mxu1 }
 0x5d4   : > { %v5081_v44 = vld [vmem:[%s5755_s6 + $0x8] sm:$0xff]  }
 0x5f1   : > { %v1443_v11 = vpop.f32.mrb[8].mxu1 }
 0x5f2   : > { %1566 = vrot.lane.b32.xlu1 %v1443_v11, %s5695_s14  ;;  %v4156_v12 = vpop.f32.mrb[9].mxu1 }
 0x5f3   : > { %v1446_v13 = vpop.f32.mrb[10].mxu1 }
 0x5f4   : > { %v4157_v14 = vpop.f32.mrb[11].mxu1 }
 0x5f9   : > { %v1555_v15 = vpop.f32.mrb[12].mxu1 }
 0x5fa   : > { %1570 = vrot.lane.b32.xlu0 %v1555_v15, %s5693_s9  ;;  %v4168_v16 = vpop.f32.mrb[13].mxu1  ;;  %s5752_s9 = sld [smem:[#allocation24_spill]]  ;;  %v896_v15 = vld [vmem:[%s5136_s11] sm:$0xff]  ;;  %s5781_s11 = sld [smem:[#allocation33_spill]] }
 0x5fb   : > { %v1558_v17 = vpop.f32.mrb[14].mxu1 }
 0x5fc   : > { %v4169_v18 = vpop.f32.mrb[15].mxu1 }
 0x600   : > { %s5753_s14 = smov %s5752_s9  ;;  %v3923_v29 = vld [vmem:[%s5752_s9] ss:$0 sm:$0xff]  ;;  %s5754_s9 = smov 120  }
 0x640   : > { %v1563_v21 = vpop.permute.xlu0 %1562 }
 0x641   : > { %v1573_v23 = vsel %vm1115_vm4, %v1219_v63, %v1563_v21 }
 0x664   : > { %v1567_v22 = vpop.permute.xlu1 %1566 }
 0x665   : > { %v1575_v25 = vsel %vm1574_vm6, %v1573_v23, %v1567_v22 }
 0x66c   : > { %v1571_v26 = vpop.permute.xlu0 %1570 }
 0x66d   : > { %v1577_v27 = vsel %vm1576_vm7, %v1575_v25, %v1571_v26 }
 0x66e   : > { %v1578_v28 = vpack.c.bf16 %v1577_v27, %v1577_v27 }
 0x670   : > { %4175 = vmatmul.mubr.msk.bf16.vlgmr.msra.gmra.mrb[24].mxu0 %vm969_vm0, %v1578_v28 }
 0x671   : > { %4187 = vmatpush3.bf16.xpose.msra.mxu0 %v5054_v30  ;;  %4188 = vmatprep.mubr.msk.bf16.mxu0 %vm4679_vm1, %v4678_v8 }
 0x672   : > { %4198 = vmatprep.subr.bf16.mxu0 %v4678_v8 }
 0x743   : > { %v1628_v31 = vpop.f32.mrb[24].mxu0 }
 0x744   : > { %v1634_v32 = vadd.f32 %v1628_v31, %v4896_v0  ;;  %v4176_v33 = vpop.f32.mrb[25].mxu0  ;;  %v5075_v0 = vld [vmem:[%s5755_s6] sm:$0xff]   ;;  %s5766_s6 = smov 80  }
 0x745   : > { %v1631_v34 = vpop.f32.mrb[26].mxu0  ;;  %4179 = vmatpush3.bf16.msra.mxu1 %v5075_v0 }
 0x746   : > { %v5064_v35 = vadd.f32 %v3923_v29, %v1634_v32  ;;  %v4177_v36 = vpop.f32.mrb[27].mxu0  ;;  %4180 = vmatprep.subr.bf16.mxu1 %v4678_v8 }
 0x748   : > { %v1642_v37 = vsel %vm969_vm0, %v5064_v35, 0.0 }
 0x749   : > { %1643 = vadd.xlane.f32.xlu1 %v1642_v37  ;;  %4181 = vmatpush3.bf16.msra.mxu1 %v5081_v44 }
 0x74a   : > { %4192 = vmatprep.subr.bf16.mxu1 %v4678_v8 }
 0x7d6   : > { %v1644_v39 = vpop.xlane.xlu1 %1643 }
 0x7d7   : > { %v1645_v40 = vmul.f32 0.03125, %v1644_v39 }
 0x7d9   : > { %v1646_v41 = vsub.f32 %v5064_v35, %v1645_v40 }
 0x7db   : > { %v1647_v42 = vmul.f32 %v1646_v41, %v1646_v41  ;;  %v1658_v53 = vmul.f32 %v3924_v52, %v1646_v41 }
 0x7dd   : > { %v1648_v43 = vsel %vm969_vm0, %v1647_v42, 0.0 }
 0x7de   : > { %1649 = vadd.xlane.f32.xlu0 %v1648_v43 }
 0x7f4   : > { %1852 = vrot.lane.b32.xlu0 %v5047_v24, %s5754_s9 }
 0x86b   : > { %v1650_v45 = vpop.xlane.xlu0 %1649 }
 0x86c   : > { %v1651_v46 = vmul.f32 0.032258064, %v1650_v45 }
 0x86e   : > { %4531 = vrsqrt.f32 %v1651_v46  ;;  %vm1661_vm8 = vcmp.eq.f32.partialorder %v1651_v46, inf  ;;  %v1664_v48 = vand.u32 2147483648, %v1651_v46  ;;  %vm1663_vm9 = vcmp.eq.f32.partialorder %v1651_v46, 0.0 }
 0x86f   : > { %v1853_v1 = vpop.permute.xlu0 %1852 }
 0x870   : > { %v5101_v5 = vsel %vm1115_vm4, %v1853_v1, 0 }
 0x878   : > { %v4532_v38 = vpop.eup %4531 }
 0x879   : > { %v1660_v47 = vmul.f32 %v4532_v38, %v1651_v46 }
 0x87b   : > { %v1662_v49 = vsel %vm1661_vm8, %v1651_v46, %v1660_v47 }
 0x87c   : > { %v1665_v50 = vsel %vm1663_vm9, %v1664_v48, %v1662_v49 }
 0x87d   : > { %v1666_v51 = vadd.f32 1e-06, %v1665_v50 }
 0x87f   : > { %4533 = vrcp.f32 %v1666_v51 }
 0x889   : > { %v4534_v54 = vpop.eup %4533 }
 0x88a   : > { %v1668_v56 = vmul.f32 %v4534_v54, %v1658_v53 }
 0x88c   : > { %v1675_v57 = vadd.f32 %v3925_v55, %v1668_v56 }
 0x88e   : > { %v1676_v58 = vpack.c.bf16 %v1675_v57, %v1675_v57 }
 0x890   : > { %4183 = vmatmul.mubr.msk.bf16.vlgmr.msra.gmra.mrb[16].mxu1 %vm969_vm0, %v1676_v58 }
 0x891   : > { %4194 = vmatprep.mubr.msk.bf16.mxu1 %vm4679_vm1, %v4678_v8 }
 0x963   : > { %v1732_v60 = vpop.f32.mrb[16].mxu1 }
 0x964   : > { %v1733_v61 = vadd.f32 %v3926_v59, %v1732_v60  ;;  %v4184_v62 = vpop.f32.mrb[17].mxu1 }
 0x965   : > { %v1735_v63 = vpop.f32.mrb[18].mxu1 }
 0x966   : > { %v1738_v2 = vpack.c.bf16 %v1733_v61, %v1733_v61  ;;  %v4185_v3 = vpop.f32.mrb[19].mxu1 }
 0x968   : > { %1962 = vrot.lane.b32.xlu0 %v1738_v2, %s5759_s30  ;;  %1850 = vrot.lane.b32.xlu1 %v1738_v2, %s5754_s9 }
 0x969   : > { %4189 = vmatmul.mubr.msk.bf16.vlgmr.msra.gmra.mrb[28].mxu0 %vm1115_vm4, %v1738_v2 }
 0x96a   : > { %4199 = vmatpush3.bf16.xpose.msra.mxu0 %v5101_v5  ;;  %4200 = vmatprep.mubr.msk.bf16.mxu0 %vm4679_vm1, %v4678_v8 }
 0x96b   : > { %4210 = vmatprep.subr.bf16.mxu0 %v4678_v8 }
 0x96c   : > { %2074 = vrot.lane.b32.xlu0 %v1738_v2, %s5760_s27  ;;  %1964 = vrot.lane.b32.xlu1 %v5047_v24, %s5759_s30 }
 0x970   : > { %2076 = vrot.lane.b32.xlu1 %v5047_v24, %s5760_s27 }
 0x9da   : > { %v1851_v6 = vpop.permute.xlu1 %1850  ;;  %v1963_v12 = vpop.permute.xlu0 %1962 }
 0x9db   : > { %4201 = vmatmul.mubr.msk.bf16.vlgmr.msra.gmra.mrb[32].mxu0 %vm1115_vm4, %v1851_v6 }
 0x9dc   : > { %4212 = vmatprep.mubr.msk.bf16.mxu0 %vm4679_vm1, %v4678_v8 }
 0x9de   : > { %v1965_v7 = vpop.permute.xlu1 %1964  ;;  %v2075_v14 = vpop.permute.xlu0 %2074 }
 0x9df   : > { %v5117_v9 = vsel %vm1115_vm4, %v1965_v7, 0 }
 0x9e0   : > { %4211 = vmatpush3.bf16.xpose.msra.mxu0 %v5117_v9 }
 0x9e1   : > { %4222 = vmatprep.subr.bf16.mxu0 %v4678_v8 }
 0x9e2   : > { %v2077_v11 = vpop.permute.xlu1 %2076 }
 0x9e3   : > { %v5122_v13 = vsel %vm1115_vm4, %v2077_v11, 0 }
 0x9e7   : > { %4213 = vmatmul.mubr.msk.bf16.vlgmr.msra.gmra.mrb[36].mxu0 %vm1115_vm4, %v1963_v12 }
 0x9e8   : > { %4223 = vmatpush3.bf16.xpose.msra.mxu0 %v5122_v13  ;;  %4224 = vmatprep.mubr.msk.bf16.mxu0 %vm4679_vm1, %v4678_v8 }
 0x9e9   : > { %4234 = vmatprep.subr.bf16.mxu0 %v4678_v8 }
 0x9ef   : > { %4225 = vmatmul.mubr.msk.bf16.vlgmr.msra.gmra.mrb[40].mxu0 %vm1115_vm4, %v2075_v14 }
 0x9f0   : > { %4238 = vmatprep.mubr.msk.bf16.mxu0 %vm4679_vm1, %v4678_v8 }
 0xa3c   : > { %v1780_v16 = vpop.f32.mrb[28].mxu0 }
 0xa3d   : > { %v1786_v17 = vmul.f32 0.35355338, %v1780_v16  ;;  %v4190_v18 = vpop.f32.mrb[29].mxu0 }
 0xa3e   : > { %v1783_v19 = vpop.f32.mrb[30].mxu0 }
 0xa3f   : > { %v4191_v20 = vpop.f32.mrb[31].mxu0  ;;  %v1787_v21 = vadd.f32 %v1786_v17, %v896_v15 }
 0xa41   : > { %v1788_v22 = vsel %vm1115_vm4, %v1787_v21, -inf }
 0xa42   : > { %1789 = vmax.xlane.f32.xlu1 %v1788_v22 }
 0xaae   : > { %v1894_v23 = vpop.f32.mrb[32].mxu0 }
 0xaaf   : > { %v1900_v25 = vmul.f32 0.35355338, %v1894_v23  ;;  %v4202_v26 = vpop.f32.mrb[33].mxu0 }
 0xab0   : > { %v1897_v27 = vpop.f32.mrb[34].mxu0 }
 0xab1   : > { %v4203_v28 = vpop.f32.mrb[35].mxu0  ;;  %v1901_v29 = vadd.f32 %v1900_v25, %v896_v15 }
 0xab3   : > { %v1902_v31 = vsel %vm1115_vm4, %v1901_v29, -inf }
 0xab4   : > { %1903 = vmax.xlane.f32.xlu0 %v1902_v31 }
 0xaba   : > { %v2006_v32 = vpop.f32.mrb[36].mxu0 }
 0xabb   : > { %v2012_v33 = vmul.f32 0.35355338, %v2006_v32  ;;  %v4214_v34 = vpop.f32.mrb[37].mxu0 }
 0xabc   : > { %v2009_v36 = vpop.f32.mrb[38].mxu0 }
 0xabd   : > { %v4215_v37 = vpop.f32.mrb[39].mxu0  ;;  %v2013_v39 = vadd.f32 %v2012_v33, %v896_v15 }
 0xabf   : > { %v2014_v40 = vsel %vm1115_vm4, %v2013_v39, -inf }
 0xac0   : > { %2015 = vmax.xlane.f32.xlu0 %v2014_v40 }
 0xac2   : > { %v2118_v41 = vpop.f32.mrb[40].mxu0 }
 0xac3   : > { %v2124_v42 = vmul.f32 0.35355338, %v2118_v41  ;;  %v4226_v43 = vpop.f32.mrb[41].mxu0 }
 0xac4   : > { %v2121_v45 = vpop.f32.mrb[42].mxu0 }
 0xac5   : > { %v4227_v46 = vpop.f32.mrb[43].mxu0  ;;  %v2125_v38 = vadd.f32 %v2124_v42, %v896_v15 }
 0xac7   : > { %v2126_v47 = vsel %vm1115_vm4, %v2125_v38, -inf }
 0xac8   : > { %2127 = vmax.xlane.f32.xlu1 %v2126_v47  ;;  %v5198_v47 = vld [vmem:[%s5768_s16 + $0x8] sm:$0xff]  }
 0xacf   : > { %v1790_v48 = vpop.xlane.xlu1 %1789 }
 0xad0   : > { %v1791_v49 = vsub.f32 %v1787_v21, %v1790_v48 }
 0xad2   : > { %v1792_v50 = vmul.f32 1.442695, %v1791_v49 }
 0xad4   : > { %4535 = vpow2.f32 %v1792_v50 }
 0xade   : > { %v4536_v51 = vpop.eup %4535 }
 0xadf   : > { %v1794_v52 = vsel %vm1115_vm4, %v4536_v51, 0.0 }
 0xae0   : > { %1795 = vadd.xlane.f32.xlu0 %v1794_v52 }
 0xb41   : > { %v1904_v53 = vpop.xlane.xlu0 %1903 }
 0xb42   : > { %v1905_v54 = vsub.f32 %v1901_v29, %v1904_v53 }
 0xb44   : > { %v1906_v55 = vmul.f32 1.442695, %v1905_v54 }
 0xb46   : > { %4537 = vpow2.f32 %v1906_v55 }
 0xb4d   : > { %v2016_v56 = vpop.xlane.xlu0 %2015 }
 0xb4e   : > { %v2017_v57 = vsub.f32 %v2013_v39, %v2016_v56 }
 0xb50   : > { %v4538_v58 = vpop.eup %4537  ;;  %v2018_v59 = vmul.f32 1.442695, %v2017_v57 }
 0xb51   : > { %v1908_v60 = vsel %vm1115_vm4, %v4538_v58, 0.0 }
 0xb52   : > { %4539 = vpow2.f32 %v2018_v59  ;;  %1909 = vadd.xlane.f32.xlu1 %v1908_v60 }
 0xb55   : > { %v2128_v63 = vpop.xlane.xlu1 %2127 }
 0xb56   : > { %v2129_v1 = vsub.f32 %v2125_v38, %v2128_v63  ;;  %v5191_v38 = vld [vmem:[%s5768_s16] sm:$0xff]   ;;  %s5780_s16 = sld [smem:[#allocation32_spill]] }
 0xb57   : > { %4235 = vmatpush3.bf16.msra.mxu0 %v5191_v38  ;;  %v5213_v63 = vld [vmem:[%s5771_s17] ss:$0 sm:$0xff]  ;;  %s5785_s17 = smov %s5784_s5 }
 0xb58   : > { %v2130_v2 = vmul.f32 1.442695, %v2129_v1  ;;  %4236 = vmatprep.subr.bf16.mxu0 %v4678_v8 }
 0xb5a   : > { %4541 = vpow2.f32 %v2130_v2 }
 0xb5b   : > { %4237 = vmatpush3.bf16.msra.mxu0 %v5198_v47 }
 0xb5c   : > { %v4540_v61 = vpop.eup %4539  ;;  %4250 = vmatprep.subr.bf16.mxu0 %v4678_v8 }
 0xb5d   : > { %v2020_v62 = vsel %vm1115_vm4, %v4540_v61, 0.0 }
 0xb5e   : > { %2021 = vadd.xlane.f32.xlu0 %v2020_v62 }
 0xb63   : > { %1914 = vrot.lane.b32.xlu1 %v5047_v24, %s5763_s1 }
 0xb64   : > { %v4542_v3 = vpop.eup %4541 }
 0xb65   : > { %v2132_v6 = vsel %vm1115_vm4, %v4542_v3, 0.0 }
 0xb6d   : > { %v1796_v7 = vpop.xlane.xlu0 %1795 }
 0xb6e   : > { %4543 = vrcp.f32 %v1796_v7 }
 0xb74   : > { %1801 = vrot.lane.b32.xlu0 %v5047_v24, %s5764_s8 }
 0xb78   : > { %2138 = vrot.lane.b32.xlu0 %v5047_v24, %s5765_s2  ;;  %v4544_v12 = vpop.eup %4543 }
 0xb79   : > { %v1798_v15 = vmul.f32 %v4544_v12, %v4536_v51 }
 0xb7b   : > { %v1799_v19 = vpack.c.bf16 %v1798_v15, %v1798_v15 }
 0xb87   : > { %2133 = vadd.xlane.f32.xlu1 %v2132_v6 }
 0xb98   : > { %2026 = vrot.lane.b32.xlu1 %v5047_v24, %s5766_s6 }
 0xbdf   : > { %v1910_v11 = vpop.xlane.xlu1 %1909 }
 0xbe0   : > { %4545 = vrcp.f32 %v1910_v11 }
 0xbe3   : > { %v1915_v18 = vpop.permute.xlu1 %1914 }
 0xbe4   : > { %v5161_v24 = vsel %vm1181_vm5, %v1915_v18, 0 }
 0xbea   : > { %v4546_v20 = vpop.eup %4545 }
 0xbeb   : > { %v2022_v14 = vpop.xlane.xlu0 %2021  ;;  %v1912_v21 = vmul.f32 %v4546_v20, %v4538_v58  ;;  %v5232_v20 = vld [vmem:[%s5652_s20 + $0x8] sm:$0xff]  }
 0xbec   : > { %4547 = vrcp.f32 %v2022_v14 }
 0xbed   : > { %v1913_v22 = vpack.c.bf16 %v1912_v21, %v1912_v21  ;;  %v5240_v21 = vld [vmem:[%s5654_s22] sm:$0xff]  }
 0xbef   : > { %v1802_v16 = vpop.permute.xlu0 %1801 }
 0xbf0   : > { %v5156_v17 = vsel %vm1181_vm5, %v1802_v16, 0 }
 0xbf1   : > { %4193 = vmatpush3.bf16.msra.mxu1 %v5156_v17 }
 0xbf2   : > { %4204 = vmatprep.subr.bf16.mxu1 %v4678_v8 }
 0xbf3   : > { %v2139_v29 = vpop.permute.xlu0 %2138 }
 0xbf4   : > { %4195 = vmatmul.mubr.msk.bf16.vlgmr.msra.gmra.mrb[20].mxu1 %vm1115_vm4, %v1799_v19  ;;  %v5177_v32 = vsel %vm1181_vm5, %v2139_v29, 0 }
 0xbf5   : > { %4205 = vmatpush3.bf16.msra.mxu1 %v5161_v24  ;;  %4206 = vmatprep.mubr.msk.bf16.mxu1 %vm4679_vm1, %v4678_v8 }
 0xbf6   : > { %4216 = vmatprep.subr.bf16.mxu1 %v4678_v8  ;;  %v4548_v23 = vpop.eup %4547 }
 0xbf7   : > { %v2024_v26 = vmul.f32 %v4548_v23, %v4540_v61  ;;  %v5253_v23 = vld [vmem:[%s5654_s22 + $0x10] sm:$0xff]  }
 0xbf9   : > { %v2025_v31 = vpack.c.bf16 %v2024_v26, %v2024_v26  ;;  %v5267_v26 = vld [vmem:[%s5654_s22 + $0x20] sm:$0xff]  }
 0xbfc   : > { %4207 = vmatmul.mubr.msk.bf16.vlgmr.msra.gmra.mrb[24].mxu1 %vm1115_vm4, %v1913_v22  ;;  %v5246_v22 = vld [vmem:[%s5654_s22 + $0x8] sm:$0xff]  }
 0xbfd   : > { %4218 = vmatprep.mubr.msk.bf16.mxu1 %vm4679_vm1, %v4678_v8 }
 0xc14   : > { %v2134_v25 = vpop.xlane.xlu1 %2133 }
 0xc15   : > { %4549 = vrcp.f32 %v2134_v25  ;;  %v5260_v25 = vld [vmem:[%s5654_s22 + $0x18] sm:$0xff]  }
 0xc18   : > { %v2027_v27 = vpop.permute.xlu1 %2026 }
 0xc19   : > { %v5172_v28 = vsel %vm1181_vm5, %v2027_v27, 0  ;;  %v5274_v27 = vld [vmem:[%s5654_s22 + $0x28] sm:$0xff]  }
 0xc1a   : > { %4217 = vmatpush3.bf16.msra.mxu1 %v5172_v28 }
 0xc1b   : > { %4228 = vmatprep.subr.bf16.mxu1 %v4678_v8 }
 0xc1d   : > { %4219 = vmatmul.mubr.msk.bf16.vlgmr.msra.gmra.mrb[28].mxu1 %vm1115_vm4, %v2025_v31 }
 0xc1e   : > { %4229 = vmatpush3.bf16.msra.mxu1 %v5177_v32  ;;  %4230 = vmatprep.mubr.msk.bf16.mxu1 %vm4679_vm1, %v4678_v8 }
 0xc1f   : > { %v4550_v33 = vpop.eup %4549  ;;  %4242 = vmatprep.subr.bf16.mxu1 %v4678_v8 }
 0xc20   : > { %v2136_v34 = vmul.f32 %v4550_v33, %v4542_v3 }
 0xc22   : > { %v2137_v36 = vpack.c.bf16 %v2136_v34, %v2136_v34 }
 0xc25   : > { %4231 = vmatmul.mubr.msk.bf16.vlgmr.msra.gmra.mrb[32].mxu1 %vm1115_vm4, %v2137_v36 }
 0xc26   : > { %4246 = vmatprep.mubr.msk.bf16.mxu1 %vm4679_vm1, %v4678_v8 }
 0xcc7   : > { %v1843_v37 = vpop.f32.mrb[20].mxu1 }
 0xcc8   : > { %v4196_v39 = vpop.f32.mrb[21].mxu1 }
 0xcc9   : > { %v1846_v40 = vpop.f32.mrb[22].mxu1 }
 0xcca   : > { %v4197_v41 = vpop.f32.mrb[23].mxu1 }
 0xccb   : > { %v5282_v41 = vld [vmem:[%s5650_s18] ss:$0 sm:$0xff] }
 0xccf   : > { %v1956_v42 = vpop.f32.mrb[24].mxu1 }
 0xcd0   : > { %2187 = vrot.lane.b32.xlu1 %v1956_v42, %s5767_s15  ;;  %v4208_v43 = vpop.f32.mrb[25].mxu1 }
 0xcd1   : > { %v1959_v45 = vpop.f32.mrb[26].mxu1 }
 0xcd2   : > { %v4209_v46 = vpop.f32.mrb[27].mxu1  ;;  %v5288_v45 = vld [vmem:[%s5651_s19] ss:$0 sm:$0xff] }
 0xcf0   : > { %v2068_v48 = vpop.f32.mrb[28].mxu1 }
 0xcf1   : > { %2191 = vrot.lane.b32.xlu0 %v2068_v48, %s5769_s26  ;;  %v4220_v49 = vpop.f32.mrb[29].mxu1 }
 0xcf2   : > { %v2071_v50 = vpop.f32.mrb[30].mxu1 }
 0xcf3   : > { %v4221_v51 = vpop.f32.mrb[31].mxu1  ;;  %v4603_v50 = vld [vmem:[%s5745_s7] sm:$0xff]  }
 0xcf4   : > { %v4604_v51 = vld [vmem:[%s5745_s7 + $0x8] sm:$0xff]  }
 0xcf8   : > { %v2180_v52 = vpop.f32.mrb[32].mxu1 }
 0xcf9   : > { %2195 = vrot.lane.b32.xlu1 %v2180_v52, %s5770_s24  ;;  %v4232_v53 = vpop.f32.mrb[33].mxu1  ;;  %v5305_v52 = vld [vmem:[%s5654_s22 + $0x30] sm:$0xff]  }
 0xcfa   : > { %v2183_v54 = vpop.f32.mrb[34].mxu1  ;;  %v5312_v53 = vld [vmem:[%s5654_s22 + $0x38] sm:$0xff]  }
 0xcfb   : > { %v4233_v55 = vpop.f32.mrb[35].mxu1  ;;  %v5319_v54 = vld [vmem:[%s5653_s21] ss:$0 sm:$0xff] }
 0xd42   : > { %v2188_v56 = vpop.permute.xlu1 %2187 }
 0xd43   : > { %v2198_v58 = vsel %vm1115_vm4, %v1843_v37, %v2188_v56 }
 0xd63   : > { %v2192_v57 = vpop.permute.xlu0 %2191 }
 0xd64   : > { %v2199_v59 = vsel %vm1574_vm6, %v2198_v58, %v2192_v57 }
 0xd6b   : > { %v2196_v60 = vpop.permute.xlu1 %2195 }
 0xd6c   : > { %v2200_v61 = vsel %vm1576_vm7, %v2199_v59, %v2196_v60 }
 0xd6d   : > { %v2201_v62 = vpack.c.bf16 %v2200_v61, %v2200_v61 }
 0xd6f   : > { %4239 = vmatmul.mubr.msk.bf16.vlgmr.msra.gmra.mrb[44].mxu0 %vm969_vm0, %v2201_v62  ;;  %v5327_v62 = vld [vmem:[%s5655_s23] ss:$0 sm:$0xff] }
 0xd70   : > { %4266 = vmatprep.mubr.msk.bf16.mxu0 %vm4679_vm1, %v4678_v8  ;;  %4251 = vmatpush3.bf16.msra.mxu0 %v5240_v21 }
 0xd71   : > { %4252 = vmatprep.subr.bf16.mxu0 %v4678_v8 }
 0xd74   : > { %4253 = vmatpush3.bf16.msra.mxu0 %v5246_v22 }
 0xd75   : > { %4254 = vmatprep.subr.bf16.mxu0 %v4678_v8 }
 0xd78   : > { %4255 = vmatpush3.bf16.msra.mxu0 %v5253_v23 }
 0xd79   : > { %4256 = vmatprep.subr.bf16.mxu0 %v4678_v8 }
 0xd7c   : > { %4257 = vmatpush3.bf16.msra.mxu0 %v5260_v25 }
 0xd7d   : > { %4258 = vmatprep.subr.bf16.mxu0 %v4678_v8 }
 0xd80   : > { %4259 = vmatpush3.bf16.msra.mxu0 %v5267_v26 }
 0xd81   : > { %4260 = vmatprep.subr.bf16.mxu0 %v4678_v8 }
 0xd84   : > { %4261 = vmatpush3.bf16.msra.mxu0 %v5274_v27 }
 0xd85   : > { %4262 = vmatprep.subr.bf16.mxu0 %v4678_v8 }
 0xd88   : > { %4263 = vmatpush3.bf16.msra.mxu0 %v5305_v52 }
 0xd89   : > { %4264 = vmatprep.subr.bf16.mxu0 %v4678_v8 }
 0xd8c   : > { %4265 = vmatpush3.bf16.msra.mxu0 %v5312_v53 }
 0xd8d   : > { %4296 = vmatprep.subr.bf16.mxu0 %v4678_v8 }
 0xe42   : > { %v2251_v1 = vpop.f32.mrb[44].mxu0 }
 0xe43   : > { %v2257_v2 = vadd.f32 %v2251_v1, %v5064_v35  ;;  %v4240_v3 = vpop.f32.mrb[45].mxu0  ;;  %v5226_v35 = vld [vmem:[%s5652_s20] sm:$0xff]  }
 0xe44   : > { %v2254_v6 = vpop.f32.mrb[46].mxu0  ;;  %4243 = vmatpush3.bf16.msra.mxu1 %v5226_v35 }
 0xe45   : > { %v5217_v7 = vadd.f32 %v5213_v63, %v2257_v2  ;;  %v4241_v11 = vpop.f32.mrb[47].mxu0  ;;  %4244 = vmatprep.subr.bf16.mxu1 %v4678_v8 }
 0xe47   : > { %v2265_v12 = vsel %vm969_vm0, %v5217_v7, 0.0 }
 0xe48   : > { %2266 = vadd.xlane.f32.xlu0 %v2265_v12  ;;  %4245 = vmatpush3.bf16.msra.mxu1 %v5232_v20 }
 0xe49   : > { %4270 = vmatprep.subr.bf16.mxu1 %v4678_v8 }
 0xed5   : > { %v2267_v14 = vpop.xlane.xlu0 %2266 }
 0xed6   : > { %v2268_v15 = vmul.f32 0.03125, %v2267_v14 }
 0xed8   : > { %v2269_v16 = vsub.f32 %v5217_v7, %v2268_v15 }
 0xeda   : > { %v2270_v18 = vmul.f32 %v2269_v16, %v2269_v16  ;;  %v2281_v42 = vmul.f32 %v5282_v41, %v2269_v16 }
 0xedc   : > { %v2271_v19 = vsel %vm969_vm0, %v2270_v18, 0.0 }
 0xedd   : > { %2272 = vadd.xlane.f32.xlu1 %v2271_v19 }
 0xf6a   : > { %v2273_v29 = vpop.xlane.xlu1 %2272 }
 0xf6b   : > { %v2274_v31 = vmul.f32 0.032258064, %v2273_v29 }
 0xf6d   : > { %4551 = vrsqrt.f32 %v2274_v31  ;;  %vm2284_vm10 = vcmp.eq.f32.partialorder %v2274_v31, inf  ;;  %v2287_v36 = vand.u32 2147483648, %v2274_v31  ;;  %vm2286_vm11 = vcmp.eq.f32.partialorder %v2274_v31, 0.0 }
 0xf77   : > { %v4552_v33 = vpop.eup %4551 }
 0xf78   : > { %v2283_v34 = vmul.f32 %v4552_v33, %v2274_v31 }
 0xf7a   : > { %v2285_v37 = vsel %vm2284_vm10, %v2274_v31, %v2283_v34 }
 0xf7b   : > { %v2288_v39 = vsel %vm2286_vm11, %v2287_v36, %v2285_v37 }
 0xf7c   : > { %v2289_v40 = vadd.f32 1e-06, %v2288_v39 }
 0xf7e   : > { %4553 = vrcp.f32 %v2289_v40 }
 0xf88   : > { %v4554_v43 = vpop.eup %4553 }
 0xf89   : > { %v2291_v46 = vmul.f32 %v4554_v43, %v2281_v42  ;;  %v4605_v42 = vld [vmem:[%s5746_s0] ss:$0 sm:$0xff] }
 0xf8b   : > { %v2298_v48 = vadd.f32 %v5288_v45, %v2291_v46 }
 0xf8d   : > { %v2299_v49 = vpack.c.bf16 %v2298_v48, %v2298_v48 }
 0xf8f   : > { %4247 = vmatmul.mubr.msk.bf16.vlgmr.msra.gmra.mrb[36].mxu1 %vm969_vm0, %v2299_v49  ;;  %v4606_v49 = vld [vmem:[%s5747_s12] ss:$0 sm:$0xff] }
 0xf90   : > { %4271 = vmatpush3.bf16.msra.mxu1 %v4603_v50  ;;  %4274 = vmatprep.mubr.msk.bf16.mxu1 %vm4679_vm1, %v4678_v8 }
 0xf91   : > { %4272 = vmatprep.subr.bf16.mxu1 %v4678_v8 }
 0xf94   : > { %4273 = vmatpush3.bf16.msra.mxu1 %v4604_v51 }
 0xf95   : > { %4278 = vmatprep.subr.bf16.mxu1 %v4678_v8 }
0x1062   : > { %v2355_v55 = vpop.f32.mrb[36].mxu1 }
0x1063   : > { %v2356_v56 = vadd.f32 %v5319_v54, %v2355_v55  ;;  %v4248_v57 = vpop.f32.mrb[37].mxu1 }
0x1064   : > { %v2358_v58 = vpop.f32.mrb[38].mxu1 }
0x1065   : > { %v2361_v59 = vmax.f32 %v2356_v56, 0.0  ;;  %v4249_v60 = vpop.f32.mrb[39].mxu1  ;;  %v4607_v56 = vld [vmem:[%s5748_s10] ss:$0 sm:$0xff] }
0x1067   : > { %v2362_v61 = vpack.c.bf16 %v2361_v59, %v2361_v59 }
0x1069   : > { %4267 = vmatmul.mubr.bf16.vlgmr.msra.gmra.mrb[48].mxu0 %v2362_v61 }
0x106a   : > { %4298 = vmatprep.mubr.msk.bf16.mxu0 %vm4679_vm1, %v4678_v8 }
0x113c   : > { %v2445_v1 = vpop.f32.mrb[48].mxu0 }
0x113d   : > { %v2451_v2 = vadd.f32 %v2445_v1, %v5217_v7  ;;  %v4268_v3 = vpop.f32.mrb[49].mxu0 }
0x113e   : > { %v2448_v6 = vpop.f32.mrb[50].mxu0 }
0x113f   : > { %v5331_v11 = vadd.f32 %v5327_v62, %v2451_v2  ;;  %v4269_v12 = vpop.f32.mrb[51].mxu0 }
0x1141   : > { %v2459_v14 = vsel %vm969_vm0, %v5331_v11, 0.0 }
0x1142   : > { %2460 = vadd.xlane.f32.xlu0 %v2459_v14 }
0x11cf   : > { %v2461_v15 = vpop.xlane.xlu0 %2460 }
0x11d0   : > { %v2462_v16 = vmul.f32 0.03125, %v2461_v15 }
0x11d2   : > { %v2463_v18 = vsub.f32 %v5331_v11, %v2462_v16  ;;  %v5370_v16 = vld [vmem:[%s4986_s29] sm:$0xff]  ;;  %s5773_s29 = smov 56  }
0x11d4   : > { %v2464_v19 = vmul.f32 %v2463_v18, %v2463_v18  ;;  %v2469_v43 = vmul.f32 %v4605_v42, %v2463_v18 }
0x11d6   : > { %v2465_v29 = vsel %vm969_vm0, %v2464_v19, 0.0 }
0x11d7   : > { %2466 = vadd.xlane.f32.xlu0 %v2465_v29 }
0x1264   : > { %v2467_v31 = vpop.xlane.xlu0 %2466 }
0x1265   : > { %v2468_v7 = vmul.f32 0.032258064, %v2467_v31 }
0x1267   : > { %4555 = vrsqrt.f32 %v2468_v7  ;;  %vm2472_vm12 = vcmp.eq.f32.partialorder %v2468_v7, inf  ;;  %v2475_v36 = vand.u32 2147483648, %v2468_v7  ;;  %vm2474_vm13 = vcmp.eq.f32.partialorder %v2468_v7, 0.0 }
0x1271   : > { %v4556_v33 = vpop.eup %4555 }
0x1272   : > { %v2471_v34 = vmul.f32 %v4556_v33, %v2468_v7 }
0x1274   : > { %v2473_v37 = vsel %vm2472_vm12, %v2468_v7, %v2471_v34 }
0x1275   : > { %v2476_v39 = vsel %vm2474_vm13, %v2475_v36, %v2473_v37 }
0x1276   : > { %v2477_v40 = vadd.f32 1e-06, %v2476_v39 }
0x1278   : > { %4557 = vrcp.f32 %v2477_v40 }
0x1282   : > { %v4558_v46 = vpop.eup %4557 }
0x1283   : > { %v2479_v48 = vmul.f32 %v4558_v46, %v2469_v43 }
0x1285   : > { %v2480_v50 = vadd.f32 %v4606_v49, %v2479_v48 }
0x1287   : > { %v2481_v51 = vpack.c.bf16 %v2480_v50, %v2480_v50 }
0x1289   : > { %4275 = vmatmul.mubr.msk.bf16.vlgmr.msra.gmra.mrb[40].mxu1 %vm969_vm0, %v2481_v51 }
0x128a   : > { %4280 = vmatprep.mubr.msk.bf16.mxu1 %vm4679_vm1, %v4678_v8 }
0x135c   : > { %v2519_v55 = vpop.f32.mrb[40].mxu1 }
0x135d   : > { %v2520_v57 = vadd.f32 %v4607_v56, %v2519_v55  ;;  %v4276_v58 = vpop.f32.mrb[41].mxu1 }
0x135e   : > { %v2522_v59 = vpop.f32.mrb[42].mxu1 }
0x135f   : > { %v5349_v60 = vpack.c.bf16 %v2520_v57, %v2520_v57  ;;  %v4277_v61 = vpop.f32.mrb[43].mxu1 }
0x1361   : > { %2527 = vrot.lane.b32.xlu1 %v5349_v60, %s5764_s8  ;;  %s5774_s8 = smov 40  }
0x1365   : > { %2639 = vrot.lane.b32.xlu1 %v5349_v60, %s5763_s1  ;;  %s5772_s1 = smov 64  }
0x1369   : > { %2637 = vrot.lane.b32.xlu1 %v5349_v60, %s5754_s9 }
0x136d   : > { %2751 = vrot.lane.b32.xlu1 %v5349_v60, %s5766_s6 }
0x1371   : > { %2749 = vrot.lane.b32.xlu1 %v5349_v60, %s5759_s30 }
0x1375   : > { %2861 = vrot.lane.b32.xlu1 %v5349_v60, %s5760_s27 }
0x13d3   : > { %v2528_v1 = vpop.permute.xlu1 %2527 }
0x13d4   : > { %v2533_v2 = vsel %vm1115_vm4, %v2528_v1, 0 }
0x13d5   : > { %4279 = vmatpush3.bf16.xpose.msra.mxu1 %v2533_v2 }
0x13d6   : > { %4284 = vmatprep.subr.bf16.mxu1 %v4678_v8 }
0x13d7   : > { %v2640_v40 = vpop.permute.xlu1 %2639 }
0x13d8   : > { %v2645_v49 = vsel %vm1115_vm4, %v2640_v40, 0 }
0x13db   : > { %v2638_v48 = vpop.permute.xlu1 %2637 }
0x13dc   : > { %4281 = vmatmul.mubr.msk.bf16.vlgmr.msra.gmra.mrb[44].mxu1 %vm1115_vm4, %v5349_v60 }
0x13dd   : > { %4286 = vmatprep.mubr.msk.bf16.mxu1 %vm4679_vm1, %v4678_v8 }
0x13df   : > { %v2752_v50 = vpop.permute.xlu1 %2751 }
0x13e0   : > { %v2757_v51 = vsel %vm1115_vm4, %v2752_v50, 0 }
0x13e3   : > { %v2750_v56 = vpop.permute.xlu1 %2749 }
0x13e7   : > { %v2862_v58 = vpop.permute.xlu1 %2861 }
0x14af   : > { %v2569_v3 = vpop.f32.mrb[44].mxu1 }
0x14b0   : > { %v2575_v6 = vmul.f32 0.35355338, %v2569_v3  ;;  %v4282_v12 = vpop.f32.mrb[45].mxu1 }
0x14b1   : > { %v2572_v14 = vpop.f32.mrb[46].mxu1 }
0x14b2   : > { %v4283_v15 = vpop.f32.mrb[47].mxu1  ;;  %v2576_v18 = vadd.f32 %v5370_v16, %v2575_v6 }
0x14b4   : > { %v2577_v19 = vsel %vm1115_vm4, %v2576_v18, -inf }
0x14b5   : > { %2578 = vmax.xlane.f32.xlu0 %v2577_v19 }
0x1542   : > { %v2579_v29 = vpop.xlane.xlu0 %2578 }
0x1543   : > { %v2580_v31 = vsub.f32 %v2576_v18, %v2579_v29 }
0x1545   : > { %v2581_v7 = vmul.f32 1.442695, %v2580_v31 }
0x1547   : > { %4559 = vpow2.f32 %v2581_v7 }
0x1551   : > { %v4560_v33 = vpop.eup %4559 }
0x1552   : > { %v2583_v34 = vsel %vm1115_vm4, %v4560_v33, 0.0 }
0x1553   : > { %2584 = vadd.xlane.f32.xlu0 %v2583_v34 }
0x1569   : > { %2589 = vrot.lane.b32.xlu0 %v5349_v60, %s5772_s1 }
0x156d   : > { %2863 = vrot.lane.b32.xlu0 %v5349_v60, %s5765_s2  ;;  %s5775_s2 = smov 48  }
0x15e0   : > { %v2585_v36 = vpop.xlane.xlu0 %2584 }
0x15e1   : > { %4561 = vrcp.f32 %v2585_v36 }
0x15e4   : > { %v2590_v37 = vpop.permute.xlu0 %2589 }
0x15e5   : > { %v2595_v39 = vsel %vm1181_vm5, %v2590_v37, 0 }
0x15e6   : > { %4285 = vmatpush3.bf16.msra.mxu1 %v2595_v39 }
0x15e7   : > { %4290 = vmatprep.subr.bf16.mxu1 %v4678_v8 }
0x15e8   : > { %v2864_v55 = vpop.permute.xlu0 %2863 }
0x15e9   : > { %v2869_v57 = vsel %vm1115_vm4, %v2864_v55, 0 }
0x15eb   : > { %v4562_v42 = vpop.eup %4561 }
0x15ec   : > { %v2587_v43 = vmul.f32 %v4562_v42, %v4560_v33 }
0x15ee   : > { %v2588_v46 = vpack.c.bf16 %v2587_v43, %v2587_v43 }
0x15f0   : > { %4287 = vmatmul.mubr.msk.bf16.vlgmr.msra.gmra.mrb[48].mxu1 %vm1115_vm4, %v2588_v46 }
0x15f1   : > { %4291 = vmatpush3.bf16.xpose.msra.mxu1 %v2645_v49  ;;  %4292 = vmatprep.mubr.msk.bf16.mxu1 %vm4679_vm1, %v4678_v8 }
0x15f2   : > { %4302 = vmatprep.subr.bf16.mxu1 %v4678_v8 }
0x15f8   : > { %4293 = vmatmul.mubr.msk.bf16.vlgmr.msra.gmra.mrb[52].mxu1 %vm1115_vm4, %v2638_v48 }
0x15f9   : > { %4303 = vmatpush3.bf16.xpose.msra.mxu1 %v2757_v51  ;;  %4304 = vmatprep.mubr.msk.bf16.mxu1 %vm4679_vm1, %v4678_v8 }
0x15fa   : > { %4314 = vmatprep.subr.bf16.mxu1 %v4678_v8 }
0x1600   : > { %4305 = vmatmul.mubr.msk.bf16.vlgmr.msra.gmra.mrb[56].mxu1 %vm1115_vm4, %v2750_v56 }
0x1601   : > { %4315 = vmatpush3.bf16.xpose.msra.mxu1 %v2869_v57  ;;  %4316 = vmatprep.mubr.msk.bf16.mxu1 %vm4679_vm1, %v4678_v8 }
0x1602   : > { %4326 = vmatprep.subr.bf16.mxu1 %v4678_v8 }
0x1608   : > { %4317 = vmatmul.mubr.msk.bf16.vlgmr.msra.gmra.mrb[60].mxu1 %vm1115_vm4, %v2862_v58 }
0x1609   : > { %4327 = vmatpush3.bf16.msra.mxu1 %v5028_v4  ;;  %4330 = vmatprep.mubr.msk.bf16.mxu1 %vm4679_vm1, %v4678_v8 }
0x160a   : > { %4328 = vmatprep.subr.bf16.mxu1 %v4678_v8 }
0x160d   : > { %4329 = vmatpush3.bf16.msra.mxu1 %v5036_v10 }
0x160e   : > { %4342 = vmatprep.subr.bf16.mxu1 %v4678_v8 }
0x16c3   : > { %v5403_v59 = vpop.f32.mrb[48].mxu1 }
0x16c4   : > { %v4288_v61 = vpop.f32.mrb[49].mxu1 }
0x16c5   : > { %v2634_v1 = vpop.f32.mrb[50].mxu1 }
0x16c6   : > { %v4289_v2 = vpop.f32.mrb[51].mxu1 }
0x16cb   : > { %v2681_v3 = vpop.f32.mrb[52].mxu1 }
0x16cc   : > { %v2687_v6 = vmul.f32 0.35355338, %v2681_v3  ;;  %v4294_v12 = vpop.f32.mrb[53].mxu1 }
0x16cd   : > { %v2684_v14 = vpop.f32.mrb[54].mxu1 }
0x16ce   : > { %v4295_v15 = vpop.f32.mrb[55].mxu1  ;;  %v2688_v4 = vadd.f32 %v5370_v16, %v2687_v6 }
0x16d0   : > { %v2689_v18 = vsel %vm1115_vm4, %v2688_v4, -inf }
0x16d1   : > { %2690 = vmax.xlane.f32.xlu0 %v2689_v18 }
0x16d3   : > { %v2793_v19 = vpop.f32.mrb[56].mxu1 }
0x16d4   : > { %v2799_v29 = vmul.f32 0.35355338, %v2793_v19  ;;  %v4306_v10 = vpop.f32.mrb[57].mxu1 }
0x16d5   : > { %v2796_v31 = vpop.f32.mrb[58].mxu1 }
0x16d6   : > { %v4307_v7 = vpop.f32.mrb[59].mxu1  ;;  %v2800_v33 = vadd.f32 %v5370_v16, %v2799_v29 }
0x16d8   : > { %v2801_v34 = vsel %vm1115_vm4, %v2800_v33, -inf }
0x16d9   : > { %2802 = vmax.xlane.f32.xlu1 %v2801_v34 }
0x16db   : > { %v2905_v36 = vpop.f32.mrb[60].mxu1 }
0x16dc   : > { %v2911_v37 = vmul.f32 0.35355338, %v2905_v36  ;;  %v4318_v39 = vpop.f32.mrb[61].mxu1 }
0x16dd   : > { %v2908_v40 = vpop.f32.mrb[62].mxu1 }
0x16de   : > { %v4319_v42 = vpop.f32.mrb[63].mxu1  ;;  %v2912_v43 = vadd.f32 %v5370_v16, %v2911_v37 }
0x16e0   : > { %v2913_v46 = vsel %vm1115_vm4, %v2912_v43, -inf }
0x16e1   : > { %2914 = vmax.xlane.f32.xlu0 %v2913_v46 }
0x16ea   : > { %2701 = vrot.lane.b32.xlu1 %v5349_v60, %s5773_s29  ;;  %s5778_s29 = sld [smem:[#allocation6_spill]] }
0x16f0   : > { %s873_s3 = sand.u32 1, %s5778_s29  }
0x16f1   : > { %s3897_s25 = sshll.u32 %s873_s3, 3  ;;  %s3785_s29 = scalar_lea.sflag [#allocation3], %s873_s3 }
0x175e   : > { %v2691_v48 = vpop.xlane.xlu0 %2690 }
0x175f   : > { %v2692_v49 = vsub.f32 %v2688_v4, %v2691_v48 }
0x1761   : > { %v2693_v50 = vmul.f32 1.442695, %v2692_v49 }
0x1763   : > { %4563 = vpow2.f32 %v2693_v50 }
0x1766   : > { %v2803_v51 = vpop.xlane.xlu1 %2802 }
0x1767   : > { %v2804_v55 = vsub.f32 %v2800_v33, %v2803_v51 }
0x1769   : > { %v2805_v56 = vmul.f32 1.442695, %v2804_v55 }
0x176a   : > { %v2702_v57 = vpop.permute.xlu1 %2701 }
0x176b   : > { %4565 = vpow2.f32 %v2805_v56  ;;  %v2707_v58 = vsel %vm1181_vm5, %v2702_v57, 0 }
0x176c   : > { %4297 = vmatpush3.bf16.msra.mxu0 %v2707_v58 }
0x176d   : > { %v4564_v61 = vpop.eup %4563  ;;  %4308 = vmatprep.subr.bf16.mxu0 %v4678_v8 }
0x176e   : > { %v2915_v16 = vpop.xlane.xlu0 %2914  ;;  %v2695_v1 = vsel %vm1115_vm4, %v4564_v61, 0.0 }
0x176f   : > { %v2916_v2 = vsub.f32 %v2912_v43, %v2915_v16  ;;  %2696 = vadd.xlane.f32.xlu0 %v2695_v1 }
0x1771   : > { %v2917_v3 = vmul.f32 1.442695, %v2916_v2 }
0x1773   : > { %4567 = vpow2.f32 %v2917_v3 }
0x1775   : > { %v4566_v6 = vpop.eup %4565 }
0x1776   : > { %v2807_v12 = vsel %vm1115_vm4, %v4566_v6, 0.0 }
0x1777   : > { %2808 = vadd.xlane.f32.xlu1 %v2807_v12 }
0x177d   : > { %v4568_v14 = vpop.eup %4567 }
0x177e   : > { %v2919_v15 = vsel %vm1115_vm4, %v4568_v14, 0.0 }
0x177f   : > { %2920 = vadd.xlane.f32.xlu0 %v2919_v15 }
0x1788   : > { %2925 = vrot.lane.b32.xlu1 %v5349_v60, %s5774_s8  ;;  %s5779_s8 = sld [smem:[#allocation9_spill]] }
0x1795   : > { %2813 = vrot.lane.b32.xlu0 %v5349_v60, %s5775_s2 }
0x17fc   : > { %v2697_v4 = vpop.xlane.xlu0 %2696 }
0x17fd   : > { %4569 = vrcp.f32 %v2697_v4 }
0x1804   : > { %v2809_v18 = vpop.xlane.xlu1 %2808 }
0x1805   : > { %4571 = vrcp.f32 %v2809_v18 }
0x1807   : > { %v4570_v19 = vpop.eup %4569 }
0x1808   : > { %v2699_v29 = vmul.f32 %v4570_v19, %v4564_v61  ;;  %v2926_v60 = vpop.permute.xlu1 %2925  ;;  %v4609_v19 = vld [vmem:[%s5753_s14] ss:$0 sm:$0xff] }
0x1809   : > { %v2931_v39 = vsel %vm1181_vm5, %v2926_v60, 0 }
0x180a   : > { %v2700_v10 = vpack.c.bf16 %v2699_v29, %v2699_v29 }
0x180c   : > { %4299 = vmatmul.mubr.msk.bf16.vlgmr.msra.gmra.mrb[52].mxu0 %vm1115_vm4, %v2700_v10  ;;  %v2921_v31 = vpop.xlane.xlu0 %2920 }
0x180d   : > { %4573 = vrcp.f32 %v2921_v31  ;;  %4310 = vmatprep.mubr.msk.bf16.mxu0 %vm4679_vm1, %v4678_v8 }
0x180f   : > { %v4572_v7 = vpop.eup %4571 }
0x1810   : > { %v2811_v33 = vmul.f32 %v4572_v7, %v4566_v6  ;;  %v2814_v34 = vpop.permute.xlu0 %2813 }
0x1811   : > { %v2819_v36 = vsel %vm1181_vm5, %v2814_v34, 0  ;;  %vm3782_vm5 = vcmask 105472  }
0x1812   : > { %4309 = vmatpush3.bf16.msra.mxu0 %v2819_v36  ;;  %v2812_v37 = vpack.c.bf16 %v2811_v33, %v2811_v33 }
0x1813   : > { %4320 = vmatprep.subr.bf16.mxu0 %v4678_v8 }
0x1815   : > { %4311 = vmatmul.mubr.msk.bf16.vlgmr.msra.gmra.mrb[56].mxu0 %vm1115_vm4, %v2812_v37 }
0x1816   : > { %4321 = vmatpush3.bf16.msra.mxu0 %v2931_v39  ;;  %4322 = vmatprep.mubr.msk.bf16.mxu0 %vm4679_vm1, %v4678_v8 }
0x1817   : > { %v4574_v40 = vpop.eup %4573  ;;  %4334 = vmatprep.subr.bf16.mxu0 %v4678_v8 }
0x1818   : > { %v2923_v42 = vmul.f32 %v4574_v40, %v4568_v14 }
0x181a   : > { %v2924_v43 = vpack.c.bf16 %v2923_v42, %v2923_v42 }
0x181d   : > { %4323 = vmatmul.mubr.msk.bf16.vlgmr.msra.gmra.mrb[60].mxu0 %vm1115_vm4, %v2924_v43 }
0x181e   : > { %4335 = vmatpush3.bf16.msra.mxu0 %v5075_v0  ;;  %4338 = vmatprep.mubr.msk.bf16.mxu0 %vm4679_vm1, %v4678_v8 }
0x181f   : > { %4336 = vmatprep.subr.bf16.mxu0 %v4678_v8 }
0x1822   : > { %4337 = vmatpush3.bf16.msra.mxu0 %v5081_v44 }
0x1823   : > { %4348 = vmatprep.subr.bf16.mxu0 %v4678_v8 }
0x18df   : > { %v2743_v46 = vpop.f32.mrb[52].mxu0 }
0x18e0   : > { %2974 = vrot.lane.b32.xlu1 %v2743_v46, %s5767_s15  ;;  %v4300_v48 = vpop.f32.mrb[53].mxu0 }
0x18e1   : > { %v2746_v49 = vpop.f32.mrb[54].mxu0  ;;  %v4610_v48 = vld [vmem:[%s5757_s4] ss:$0 sm:$0xff] }
0x18e2   : > { %v4301_v50 = vpop.f32.mrb[55].mxu0 }
0x18e8   : > { %v2855_v51 = vpop.f32.mrb[56].mxu0 }
0x18e9   : > { %2978 = vrot.lane.b32.xlu0 %v2855_v51, %s5769_s26  ;;  %v4312_v55 = vpop.f32.mrb[57].mxu0 }
0x18ea   : > { %v2858_v0 = vpop.f32.mrb[58].mxu0  ;;  %v4611_v55 = vld [vmem:[%s5758_s28] ss:$0 sm:$0xff] }
0x18eb   : > { %v4313_v56 = vpop.f32.mrb[59].mxu0 }
0x18f0   : > { %v2967_v57 = vpop.f32.mrb[60].mxu0 }
0x18f1   : > { %2982 = vrot.lane.b32.xlu1 %v2967_v57, %s5770_s24  ;;  %v4324_v58 = vpop.f32.mrb[61].mxu0 }
0x18f2   : > { %v2970_v61 = vpop.f32.mrb[62].mxu0  ;;  %v4612_v58 = vld [vmem:[%s5645_s13] ss:$0 sm:$0xff] }
0x18f3   : > { %v4325_v44 = vpop.f32.mrb[63].mxu0 }
0x1952   : > { %v2975_v16 = vpop.permute.xlu1 %2974 }
0x1953   : > { %v2985_v2 = vsel %vm1115_vm4, %v5403_v59, %v2975_v16 }
0x195b   : > { %v2979_v1 = vpop.permute.xlu0 %2978 }
0x195c   : > { %v2986_v3 = vsel %vm1574_vm6, %v2985_v2, %v2979_v1 }
0x1963   : > { %v2983_v6 = vpop.permute.xlu1 %2982 }
0x1964   : > { %v2987_v12 = vsel %vm1576_vm7, %v2986_v3, %v2983_v6 }
0x1965   : > { %v2988_v14 = vpack.c.bf16 %v2987_v12, %v2987_v12 }
0x1967   : > { %4331 = vmatmul.mubr.msk.bf16.vlgmr.msra.gmra.mrb[64].mxu1 %vm969_vm0, %v2988_v14 }
0x1968   : > { %4343 = vmatpush3.bf16.xpose.msra.mxu1 %v5054_v30  ;;  %4344 = vmatprep.mubr.msk.bf16.mxu1 %vm4679_vm1, %v4678_v8 }
0x1969   : > { %4354 = vmatprep.subr.bf16.mxu1 %v4678_v8 }
0x1a3a   : > { %v3026_v15 = vpop.f32.mrb[64].mxu1 }
0x1a3b   : > { %v3032_v4 = vadd.f32 %v3026_v15, %v5331_v11  ;;  %v4332_v18 = vpop.f32.mrb[65].mxu1 }
0x1a3c   : > { %v3029_v59 = vpop.f32.mrb[66].mxu1 }
0x1a3d   : > { %v5455_v29 = vadd.f32 %v4609_v19, %v3032_v4  ;;  %v4333_v10 = vpop.f32.mrb[67].mxu1 }
0x1a3f   : > { %v3034_v30 = vsel %vm969_vm0, %v5455_v29, 0.0 }
0x1a40   : > { %3035 = vadd.xlane.f32.xlu0 %v3034_v30 }
0x1acd   : > { %v3036_v31 = vpop.xlane.xlu0 %3035 }
0x1ace   : > { %v3037_v7 = vmul.f32 0.03125, %v3036_v31 }
0x1ad0   : > { %v3038_v33 = vsub.f32 %v5455_v29, %v3037_v7 }
0x1ad2   : > { %v3039_v34 = vmul.f32 %v3038_v33, %v3038_v33  ;;  %v3044_v49 = vmul.f32 %v4610_v48, %v3038_v33 }
0x1ad4   : > { %v3040_v11 = vsel %vm969_vm0, %v3039_v34, 0.0 }
0x1ad5   : > { %3041 = vadd.xlane.f32.xlu1 %v3040_v11 }
0x1b62   : > { %v3042_v36 = vpop.xlane.xlu1 %3041 }
0x1b63   : > { %v3043_v60 = vmul.f32 0.032258064, %v3042_v36 }
0x1b65   : > { %4575 = vrsqrt.f32 %v3043_v60  ;;  %vm3047_vm14 = vcmp.eq.f32.partialorder %v3043_v60, inf  ;;  %v3050_v40 = vand.u32 2147483648, %v3043_v60  ;;  %vm3049_vm15 = vcmp.eq.f32.partialorder %v3043_v60, 0.0 }
0x1b6f   : > { %v4576_v37 = vpop.eup %4575 }
0x1b70   : > { %v3046_v39 = vmul.f32 %v4576_v37, %v3043_v60 }
0x1b72   : > { %v3048_v42 = vsel %vm3047_vm14, %v3043_v60, %v3046_v39 }
0x1b73   : > { %v3051_v43 = vsel %vm3049_vm15, %v3050_v40, %v3048_v42 }
0x1b74   : > { %v3052_v46 = vadd.f32 1e-06, %v3051_v43 }
0x1b76   : > { %4577 = vrcp.f32 %v3052_v46 }
0x1b80   : > { %v4578_v50 = vpop.eup %4577 }
0x1b81   : > { %v3054_v51 = vmul.f32 %v4578_v50, %v3044_v49 }
0x1b83   : > { %v3055_v0 = vadd.f32 %v4611_v55, %v3054_v51 }
0x1b85   : > { %v3056_v56 = vpack.c.bf16 %v3055_v0, %v3055_v0 }
0x1b87   : > { %4339 = vmatmul.mubr.msk.bf16.vlgmr.msra.gmra.mrb[64].mxu0 %vm969_vm0, %v3056_v56 }
0x1b88   : > { %4349 = vmatpush3.bf16.msra.mxu0 %v5156_v17  ;;  %4350 = vmatprep.mubr.msk.bf16.mxu0 %vm4679_vm1, %v4678_v8 }
0x1b89   : > { %4360 = vmatprep.subr.bf16.mxu0 %v4678_v8 }
0x1c5a   : > { %v3094_v57 = vpop.f32.mrb[64].mxu0 }
0x1c5b   : > { %v3095_v61 = vadd.f32 %v4612_v58, %v3094_v57  ;;  %v4340_v44 = vpop.f32.mrb[65].mxu0 }
0x1c5c   : > { %v3097_v16 = vpop.f32.mrb[66].mxu0 }
0x1c5d   : > { %v3100_v1 = vpack.c.bf16 %v3095_v61, %v3095_v61  ;;  %v4341_v2 = vpop.f32.mrb[67].mxu0 }
0x1c5f   : > { %3304 = vrot.lane.b32.xlu1 %v3100_v1, %s5759_s30  ;;  %3202 = vrot.lane.b32.xlu0 %v3100_v1, %s5754_s9  ;;  %s5776_s9 = sld [smem:[#allocation14_spill]] }
0x1c60   : > { %4345 = vmatmul.mubr.msk.bf16.vlgmr.msra.gmra.mrb[68].mxu1 %vm1115_vm4, %v3100_v1 }
0x1c61   : > { %4355 = vmatpush3.bf16.xpose.msra.mxu1 %v5101_v5  ;;  %4356 = vmatprep.mubr.msk.bf16.mxu1 %vm4679_vm1, %v4678_v8 }
0x1c62   : > { %4366 = vmatprep.subr.bf16.mxu1 %v4678_v8 }
0x1c63   : > { %3406 = vrot.lane.b32.xlu0 %v3100_v1, %s5760_s27  ;;  %s5777_s27 = sld [smem:[#allocation34_spill]] }
0x1c65   : > { %v4613_v15 = vld [vmem:[%s5776_s9] sm:$0xff] }
0x1cd1   : > { %v3203_v17 = vpop.permute.xlu0 %3202  ;;  %v3305_v3 = vpop.permute.xlu1 %3304 }
0x1cd2   : > { %4357 = vmatmul.mubr.msk.bf16.vlgmr.msra.gmra.mrb[72].mxu1 %vm1115_vm4, %v3203_v17 }
0x1cd3   : > { %4367 = vmatpush3.bf16.xpose.msra.mxu1 %v5117_v9  ;;  %4368 = vmatprep.mubr.msk.bf16.mxu1 %vm4679_vm1, %v4678_v8 }
0x1cd4   : > { %4378 = vmatprep.subr.bf16.mxu1 %v4678_v8 }
0x1cd5   : > { %v3407_v5 = vpop.permute.xlu0 %3406 }
0x1cda   : > { %4369 = vmatmul.mubr.msk.bf16.vlgmr.msra.gmra.mrb[76].mxu1 %vm1115_vm4, %v3305_v3 }
0x1cdb   : > { %4379 = vmatpush3.bf16.xpose.msra.mxu1 %v5122_v13  ;;  %4380 = vmatprep.mubr.msk.bf16.mxu1 %vm4679_vm1, %v4678_v8 }
0x1cdc   : > { %4390 = vmatprep.subr.bf16.mxu1 %v4678_v8 }
0x1ce2   : > { %4381 = vmatmul.mubr.msk.bf16.vlgmr.msra.gmra.mrb[80].mxu1 %vm1115_vm4, %v3407_v5 }
0x1ce3   : > { %4391 = vmatpush3.bf16.msra.mxu1 %v5191_v38  ;;  %4394 = vmatprep.mubr.msk.bf16.mxu1 %vm4679_vm1, %v4678_v8 }
0x1ce4   : > { %4392 = vmatprep.subr.bf16.mxu1 %v4678_v8 }
0x1ce7   : > { %4393 = vmatpush3.bf16.msra.mxu1 %v5198_v47 }
0x1ce8   : > { %4406 = vmatprep.subr.bf16.mxu1 %v4678_v8 }
0x1d33   : > { %v3138_v9 = vpop.f32.mrb[68].mxu1 }
0x1d34   : > { %v3144_v13 = vmul.f32 0.35355338, %v3138_v9  ;;  %v4346_v6 = vpop.f32.mrb[69].mxu1 }
0x1d35   : > { %v3141_v12 = vpop.f32.mrb[70].mxu1 }
0x1d36   : > { %v4347_v14 = vpop.f32.mrb[71].mxu1  ;;  %v3145_v4 = vadd.f32 %v4613_v15, %v3144_v13 }
0x1d38   : > { %v3146_v18 = vsel %vm1115_vm4, %v3145_v4, -inf }
0x1d39   : > { %3147 = vmax.xlane.f32.xlu1 %v3146_v18 }
0x1da5   : > { %v3241_v38 = vpop.f32.mrb[72].mxu1 }
0x1da6   : > { %v3247_v59 = vmul.f32 0.35355338, %v3241_v38  ;;  %v4358_v19 = vpop.f32.mrb[73].mxu1 }
0x1da7   : > { %v3244_v10 = vpop.f32.mrb[74].mxu1 }
0x1da8   : > { %v4359_v30 = vpop.f32.mrb[75].mxu1  ;;  %v3248_v31 = vadd.f32 %v4613_v15, %v3247_v59 }
0x1daa   : > { %v3249_v47 = vsel %vm1115_vm4, %v3248_v31, -inf }
0x1dab   : > { %3250 = vmax.xlane.f32.xlu0 %v3249_v47 }
0x1dad   : > { %v3343_v7 = vpop.f32.mrb[76].mxu1 }
0x1dae   : > { %v3349_v33 = vmul.f32 0.35355338, %v3343_v7  ;;  %v4370_v34 = vpop.f32.mrb[77].mxu1 }
0x1daf   : > { %v3346_v11 = vpop.f32.mrb[78].mxu1 }
0x1db0   : > { %v4371_v36 = vpop.f32.mrb[79].mxu1  ;;  %v3350_v60 = vadd.f32 %v4613_v15, %v3349_v33 }
0x1db2   : > { %v3351_v37 = vsel %vm1115_vm4, %v3350_v60, -inf }
0x1db3   : > { %3352 = vmax.xlane.f32.xlu0 %v3351_v37 }
0x1db5   : > { %v3445_v39 = vpop.f32.mrb[80].mxu1 }
0x1db6   : > { %v3451_v40 = vmul.f32 0.35355338, %v3445_v39  ;;  %v4382_v42 = vpop.f32.mrb[81].mxu1 }
0x1db7   : > { %v3448_v43 = vpop.f32.mrb[82].mxu1 }
0x1db8   : > { %v4383_v46 = vpop.f32.mrb[83].mxu1  ;;  %v3452_v48 = vadd.f32 %v4613_v15, %v3451_v40 }
0x1dba   : > { %v3453_v49 = vsel %vm1115_vm4, %v3452_v48, -inf }
0x1dbb   : > { %3454 = vmax.xlane.f32.xlu1 %v3453_v49 }
0x1dc6   : > { %v3148_v50 = vpop.xlane.xlu1 %3147 }
0x1dc7   : > { %v3149_v51 = vsub.f32 %v3145_v4, %v3148_v50 }
0x1dc9   : > { %v3150_v55 = vmul.f32 1.442695, %v3149_v51 }
0x1dcb   : > { %4579 = vpow2.f32 %v3150_v55 }
0x1dd5   : > { %v4580_v0 = vpop.eup %4579 }
0x1dd6   : > { %v3152_v56 = vsel %vm1115_vm4, %v4580_v0, 0.0 }
0x1dd7   : > { %3153 = vadd.xlane.f32.xlu0 %v3152_v56 }
0x1e38   : > { %v3251_v57 = vpop.xlane.xlu0 %3250 }
0x1e39   : > { %v3252_v58 = vsub.f32 %v3248_v31, %v3251_v57 }
0x1e3b   : > { %v3253_v61 = vmul.f32 1.442695, %v3252_v58 }
0x1e3d   : > { %4581 = vpow2.f32 %v3253_v61 }
0x1e40   : > { %v3353_v44 = vpop.xlane.xlu0 %3352 }
0x1e41   : > { %v3354_v16 = vsub.f32 %v3350_v60, %v3353_v44 }
0x1e43   : > { %v3355_v1 = vmul.f32 1.442695, %v3354_v16 }
0x1e45   : > { %4583 = vpow2.f32 %v3355_v1 }
0x1e47   : > { %v4582_v2 = vpop.eup %4581 }
0x1e48   : > { %v3455_v17 = vpop.xlane.xlu1 %3454  ;;  %v3255_v3 = vsel %vm1115_vm4, %v4582_v2, 0.0 }
0x1e49   : > { %v3456_v5 = vsub.f32 %v3452_v48, %v3455_v17  ;;  %3256 = vadd.xlane.f32.xlu1 %v3255_v3 }
0x1e4b   : > { %v3457_v9 = vmul.f32 1.442695, %v3456_v5 }
0x1e4d   : > { %4585 = vpow2.f32 %v3457_v9 }
0x1e4f   : > { %v4584_v13 = vpop.eup %4583 }
0x1e50   : > { %v3357_v6 = vsel %vm1115_vm4, %v4584_v13, 0.0 }
0x1e51   : > { %3358 = vadd.xlane.f32.xlu0 %v3357_v6 }
0x1e57   : > { %v4586_v12 = vpop.eup %4585 }
0x1e58   : > { %v3459_v14 = vsel %vm1115_vm4, %v4586_v12, 0.0 }
0x1e59   : > { %3460 = vadd.xlane.f32.xlu1 %v3459_v14 }
0x1e64   : > { %v3154_v15 = vpop.xlane.xlu0 %3153 }
0x1e65   : > { %4587 = vrcp.f32 %v3154_v15 }
0x1e6f   : > { %v4588_v4 = vpop.eup %4587 }
0x1e70   : > { %v3156_v18 = vmul.f32 %v4588_v4, %v4580_v0 }
0x1e72   : > { %v3157_v38 = vpack.c.bf16 %v3156_v18, %v3156_v18 }
0x1e74   : > { %4351 = vmatmul.mubr.msk.bf16.vlgmr.msra.gmra.mrb[68].mxu0 %vm1115_vm4, %v3157_v38 }
0x1e75   : > { %4361 = vmatpush3.bf16.msra.mxu0 %v5161_v24  ;;  %4362 = vmatprep.mubr.msk.bf16.mxu0 %vm4679_vm1, %v4678_v8 }
0x1e76   : > { %4372 = vmatprep.subr.bf16.mxu0 %v4678_v8 }
0x1ed6   : > { %v3257_v59 = vpop.xlane.xlu1 %3256 }
0x1ed7   : > { %4589 = vrcp.f32 %v3257_v59 }
0x1ede   : > { %v3359_v19 = vpop.xlane.xlu0 %3358 }
0x1edf   : > { %4591 = vrcp.f32 %v3359_v19 }
0x1ee1   : > { %v4590_v10 = vpop.eup %4589 }
0x1ee2   : > { %v3259_v30 = vmul.f32 %v4590_v10, %v4582_v2 }
0x1ee4   : > { %v3260_v31 = vpack.c.bf16 %v3259_v30, %v3259_v30 }
0x1ee6   : > { %4363 = vmatmul.mubr.msk.bf16.vlgmr.msra.gmra.mrb[72].mxu0 %vm1115_vm4, %v3260_v31  ;;  %v3461_v47 = vpop.xlane.xlu1 %3460 }
0x1ee7   : > { %4373 = vmatpush3.bf16.msra.mxu0 %v5172_v28  ;;  %4593 = vrcp.f32 %v3461_v47  ;;  %4374 = vmatprep.mubr.msk.bf16.mxu0 %vm4679_vm1, %v4678_v8 }
0x1ee8   : > { %4384 = vmatprep.subr.bf16.mxu0 %v4678_v8 }
0x1ee9   : > { %v4592_v24 = vpop.eup %4591 }
0x1eea   : > { %v3361_v7 = vmul.f32 %v4592_v24, %v4584_v13 }
0x1eec   : > { %v3362_v33 = vpack.c.bf16 %v3361_v7, %v3361_v7 }
0x1eee   : > { %4375 = vmatmul.mubr.msk.bf16.vlgmr.msra.gmra.mrb[76].mxu0 %vm1115_vm4, %v3362_v33 }
0x1eef   : > { %4385 = vmatpush3.bf16.msra.mxu0 %v5177_v32  ;;  %4386 = vmatprep.mubr.msk.bf16.mxu0 %vm4679_vm1, %v4678_v8 }
0x1ef0   : > { %4398 = vmatprep.subr.bf16.mxu0 %v4678_v8 }
0x1ef1   : > { %v4594_v34 = vpop.eup %4593 }
0x1ef2   : > { %v3463_v28 = vmul.f32 %v4594_v34, %v4586_v12 }
0x1ef4   : > { %v3464_v11 = vpack.c.bf16 %v3463_v28, %v3463_v28 }
0x1ef6   : > { %4387 = vmatmul.mubr.msk.bf16.vlgmr.msra.gmra.mrb[80].mxu0 %vm1115_vm4, %v3464_v11 }
0x1ef7   : > { %4399 = vmatpush3.bf16.msra.mxu0 %v5226_v35  ;;  %4402 = vmatprep.mubr.msk.bf16.mxu0 %vm4679_vm1, %v4678_v8 }
0x1ef8   : > { %4400 = vmatprep.subr.bf16.mxu0 %v4678_v8 }
0x1efb   : > { %4401 = vmatpush3.bf16.msra.mxu0 %v5232_v20 }
0x1efc   : > { %4426 = vmatprep.subr.bf16.mxu0 %v4678_v8 }
0x1f47   : > { %v3195_v32 = vpop.f32.mrb[68].mxu0 }
0x1f48   : > { %v4352_v36 = vpop.f32.mrb[69].mxu0 }
0x1f49   : > { %v3198_v60 = vpop.f32.mrb[70].mxu0 }
0x1f4a   : > { %v4353_v37 = vpop.f32.mrb[71].mxu0 }
0x1fb9   : > { %v3298_v39 = vpop.f32.mrb[72].mxu0 }
0x1fba   : > { %3509 = vrot.lane.b32.xlu0 %v3298_v39, %s5767_s15  ;;  %v4364_v40 = vpop.f32.mrb[73].mxu0  ;;  %s3985_s15 = sshll.u32 %s5779_s8, 7 }
0x1fbb   : > { %v3301_v42 = vpop.f32.mrb[74].mxu0  ;;  %v4509_v40 = vld [vmem:[%s5777_s27] sm:$0xff]  }
0x1fbc   : > { %v4365_v43 = vpop.f32.mrb[75].mxu0  ;;  %v4510_v42 = vld [vmem:[%s5777_s27 + $0x8] sm:$0xff]  }
0x1fc1   : > { %v3400_v35 = vpop.f32.mrb[76].mxu0 }
0x1fc2   : > { %3513 = vrot.lane.b32.xlu1 %v3400_v35, %s5769_s26  ;;  %v4376_v46 = vpop.f32.mrb[77].mxu0  ;;  %s5782_s26 = sld [smem:[#allocation35_spill]] }
0x1fc3   : > { %v3403_v48 = vpop.f32.mrb[78].mxu0 }
0x1fc4   : > { %v4377_v49 = vpop.f32.mrb[79].mxu0 }
0x1fc9   : > { %v3502_v50 = vpop.f32.mrb[80].mxu0 }
0x1fca   : > { %3517 = vrot.lane.b32.xlu1 %v3502_v50, %s5770_s24  ;;  %v4388_v20 = vpop.f32.mrb[81].mxu0  ;;  %s875_s24 = scalar_lea.vmem [#allocation2], %s3897_s25  ;;  %s4694_s25 = smov [#allocation2]  }
0x1fcb   : > { %v3505_v51 = vpop.f32.mrb[82].mxu0  ;;  %s3798_s2 = sshll.u32 %s875_s24, 4  ;;  %s4618_s1 = sshll.u32 %s4694_s25, 4  ;;  %s5592_s2 = int_to_ptr.vmem [resolvable:$true] %s3798_s2  ;;  %s4619_s1 = int_to_ptr.vmem [resolvable:$false] %s4618_s1 }
0x1fcc   : > { %v4389_v55 = vpop.f32.mrb[83].mxu0  ;;  %v3978_v51 = vld [vmem:[%s5780_s16] ss:$0 sm:$0xff]  ;;  %s4614_s8 = scalar_lea.vmem %s5592_s2, 128  ;;  %s4620_s9 = scalar_lea.vmem %s4619_s1, 256 }
0x1fcd   : > { %p4615_p11 = scmp.ne.s32.totalorder %s5592_s2, %s4614_s8  ;;  %p4621_p0 = scmp.lt.s32.totalorder %s5592_s2, %s4619_s1 }
0x1fce   : > { %p4622_p1 = scmp.lt.s32.totalorder %s4620_s9, %s4614_s8 }
0x1fcf   : > { %p4616_p12 = pnand %p4615_p11, %p4878_p5 }
0x1fd0   : > { %p4623_p2 = por %p4622_p1, %p4621_p0 }
0x1fd1   : > { %p4617_p13 = pneg %p4616_p12 }
0x1fd3   : > { %p4624_p3 = pnand %p4623_p2, %p4617_p13 }
0x202c   : > { %v3510_v0 = vpop.permute.xlu0 %3509 }
0x202d   : > { %v3520_v57 = vsel %vm1115_vm4, %v3195_v32, %v3510_v0  ;;  %v3979_v0 = vld [vmem:[%s5781_s11] ss:$0 sm:$0xff]  ;;  %s5590_s11 = scalar_lea.hbm %s5784_s5, %s3985_s15 }
0x2034   : > { %v3514_v56 = vpop.permute.xlu1 %3513 }
0x2035   : > { %v3521_v58 = vsel %vm1574_vm6, %v3520_v57, %v3514_v56 }
0x203c   : > { %v3518_v61 = vpop.permute.xlu1 %3517 }
0x203d   : > { %v3522_v44 = vsel %vm1576_vm7, %v3521_v58, %v3518_v61  ;;  %v3980_v61 = vld [vmem:[%s5782_s26] ss:$0 sm:$0xff] }
0x203e   : > { %v3523_v16 = vpack.c.bf16 %v3522_v44, %v3522_v44 }
0x2040   : > { %4395 = vmatmul.mubr.msk.bf16.vlgmr.msra.gmra.mrb[84].mxu1 %vm969_vm0, %v3523_v16 }
0x2041   : > { %4407 = vmatpush3.bf16.msra.mxu1 %v5240_v21  ;;  %4422 = vmatprep.mubr.msk.bf16.mxu1 %vm4679_vm1, %v4678_v8 }
0x2042   : > { %4408 = vmatprep.subr.bf16.mxu1 %v4678_v8 }
0x2045   : > { %4409 = vmatpush3.bf16.msra.mxu1 %v5246_v22 }
0x2046   : > { %4410 = vmatprep.subr.bf16.mxu1 %v4678_v8 }
0x2049   : > { %4411 = vmatpush3.bf16.msra.mxu1 %v5253_v23 }
0x204a   : > { %4412 = vmatprep.subr.bf16.mxu1 %v4678_v8 }
0x204d   : > { %4413 = vmatpush3.bf16.msra.mxu1 %v5260_v25 }
0x204e   : > { %4414 = vmatprep.subr.bf16.mxu1 %v4678_v8 }
0x2051   : > { %4415 = vmatpush3.bf16.msra.mxu1 %v5267_v26 }
0x2052   : > { %4416 = vmatprep.subr.bf16.mxu1 %v4678_v8 }
0x2055   : > { %4417 = vmatpush3.bf16.msra.mxu1 %v5274_v27 }
0x2056   : > { %4418 = vmatprep.subr.bf16.mxu1 %v4678_v8 }
0x2059   : > { %4419 = vmatpush3.bf16.msra.mxu1 %v5305_v52 }
0x205a   : > { %4420 = vmatprep.subr.bf16.mxu1 %v4678_v8 }
0x205d   : > { %4421 = vmatpush3.bf16.msra.mxu1 %v5312_v53 }
0x2113   : > { %v3561_v21 = vpop.f32.mrb[84].mxu1 }
0x2114   : > { %v3567_v22 = vadd.f32 %v3561_v21, %v5455_v29  ;;  %v4396_v23 = vpop.f32.mrb[85].mxu1 }
0x2115   : > { %v3564_v25 = vpop.f32.mrb[86].mxu1 }
0x2116   : > { %v3568_v1 = vadd.f32 %v5213_v63, %v3567_v22  ;;  %v4397_v26 = vpop.f32.mrb[87].mxu1 }
0x2118   : > { %v3569_v2 = vsel %vm969_vm0, %v3568_v1, 0.0 }
0x2119   : > { %3570 = vadd.xlane.f32.xlu0 %v3569_v2 }
0x21a6   : > { %v3571_v27 = vpop.xlane.xlu0 %3570 }
0x21a7   : > { %v3572_v17 = vmul.f32 0.03125, %v3571_v27 }
0x21a9   : > { %v3573_v3 = vsub.f32 %v3568_v1, %v3572_v17 }
0x21ab   : > { %v3574_v5 = vmul.f32 %v3573_v3, %v3573_v3  ;;  %v3579_v15 = vmul.f32 %v5282_v41, %v3573_v3 }
0x21ad   : > { %v3575_v52 = vsel %vm969_vm0, %v3574_v5, 0.0 }
0x21ae   : > { %3576 = vadd.xlane.f32.xlu1 %v3575_v52 }
0x223b   : > { %v3577_v9 = vpop.xlane.xlu1 %3576 }
0x223c   : > { %v3578_v53 = vmul.f32 0.032258064, %v3577_v9 }
0x223e   : > { %4595 = vrsqrt.f32 %v3578_v53  ;;  %vm3582_vm2 = vcmp.eq.f32.partialorder %v3578_v53, inf  ;;  %v3585_v6 = vand.u32 2147483648, %v3578_v53  ;;  %vm3584_vm3 = vcmp.eq.f32.partialorder %v3578_v53, 0.0 }
0x2248   : > { %v4596_v13 = vpop.eup %4595 }
0x2249   : > { %v3581_v29 = vmul.f32 %v4596_v13, %v3578_v53 }
0x224b   : > { %v3583_v12 = vsel %vm3582_vm2, %v3578_v53, %v3581_v29 }
0x224c   : > { %v3586_v63 = vsel %vm3584_vm3, %v3585_v6, %v3583_v12 }
0x224d   : > { %v3587_v14 = vadd.f32 1e-06, %v3586_v63 }
0x224f   : > { %4597 = vrcp.f32 %v3587_v14 }
0x2259   : > { %v4598_v4 = vpop.eup %4597 }
0x225a   : > { %v3589_v18 = vmul.f32 %v4598_v4, %v3579_v15 }
0x225c   : > { %v3590_v38 = vadd.f32 %v5288_v45, %v3589_v18 }
0x225e   : > { %v3591_v59 = vpack.c.bf16 %v3590_v38, %v3590_v38 }
0x2260   : > { %4403 = vmatmul.mubr.msk.bf16.vlgmr.msra.gmra.mrb[84].mxu0 %vm969_vm0, %v3591_v59 }
0x2261   : > { %4430 = vmatprep.mubr.msk.bf16.mxu0 %vm4679_vm1, %v4678_v8  ;;  %4427 = vmatpush3.bf16.msra.mxu0 %v4509_v40 }
0x2262   : > { %4428 = vmatprep.subr.bf16.mxu0 %v4678_v8 }
0x2265   : > { %4429 = vmatpush3.bf16.msra.mxu0 %v4510_v42 }
0x2333   : > { %v3629_v19 = vpop.f32.mrb[84].mxu0 }
0x2334   : > { %v3630_v10 = vadd.f32 %v5319_v54, %v3629_v19  ;;  %v4404_v30 = vpop.f32.mrb[85].mxu0 }
0x2335   : > { %v3632_v31 = vpop.f32.mrb[86].mxu0 }
0x2336   : > { %v3635_v47 = vmax.f32 %v3630_v10, 0.0  ;;  %v4405_v24 = vpop.f32.mrb[87].mxu0 }
0x2338   : > { %v3636_v7 = vpack.c.bf16 %v3635_v47, %v3635_v47 }
0x233a   : > { %4423 = vmatmul.mubr.bf16.vlgmr.msra.gmra.mrb[88].mxu1 %v3636_v7 }
0x240d   : > { %v3671_v41 = vpop.f32.mrb[88].mxu1 }
0x240e   : > { %v3677_v33 = vadd.f32 %v3671_v41, %v3568_v1  ;;  %v4424_v34 = vpop.f32.mrb[89].mxu1 }
0x240f   : > { %v3674_v28 = vpop.f32.mrb[90].mxu1 }
0x2410   : > { %v4425_v45 = vpop.f32.mrb[91].mxu1  ;;  %v3678_v11 = vadd.f32 %v5327_v62, %v3677_v33 }
0x2412   : > { %v3681_v32 = vsel %vm969_vm0, %v3678_v11, 0.0 }
0x2413   : > { %3682 = vadd.xlane.f32.xlu0 %v3681_v32 }
0x24a0   : > { %v3683_v36 = vpop.xlane.xlu0 %3682 }
0x24a1   : > { %v3684_v60 = vmul.f32 0.03125, %v3683_v36 }
0x24a3   : > { %v3685_v37 = vsub.f32 %v3678_v11, %v3684_v60 }
0x24a5   : > { %v3686_v54 = vmul.f32 %v3685_v37, %v3685_v37  ;;  %v3697_v8 = vmul.f32 %v3978_v51, %v3685_v37 }
0x24a7   : > { %v3687_v39 = vsel %vm969_vm0, %v3686_v54, 0.0 }
0x24a8   : > { %3688 = vadd.xlane.f32.xlu0 %v3687_v39 }
0x2535   : > { %v3689_v62 = vpop.xlane.xlu0 %3688 }
0x2536   : > { %v3690_v43 = vmul.f32 0.032258064, %v3689_v62 }
0x2538   : > { %4599 = vrsqrt.f32 %v3690_v43  ;;  %vm3700_vm1 = vcmp.eq.f32.partialorder %v3690_v43, inf  ;;  %v3703_v48 = vand.u32 2147483648, %v3690_v43  ;;  %vm3702_vm4 = vcmp.eq.f32.partialorder %v3690_v43, 0.0 }
0x2542   : > { %v4600_v35 = vpop.eup %4599 }
0x2543   : > { %v3699_v46 = vmul.f32 %v4600_v35, %v3690_v43 }
0x2545   : > { %v3701_v49 = vsel %vm3700_vm1, %v3690_v43, %v3699_v46 }
0x2546   : > { %v3704_v50 = vsel %vm3702_vm4, %v3703_v48, %v3701_v49 }
0x2547   : > { %v3705_v20 = vadd.f32 1e-06, %v3704_v50 }
0x2549   : > { %4601 = vrcp.f32 %v3705_v20 }
0x2553   : > { %v4602_v55 = vpop.eup %4601 }
0x2554   : > { %v3707_v56 = vmul.f32 %v4602_v55, %v3697_v8 }
0x2556   : > { %v3714_v57 = vadd.f32 %v3979_v0, %v3707_v56 }
0x2558   : > { %v3719_v58 = vpack.c.bf16 %v3714_v57, %v3714_v57 }
0x255a   : > { %4431 = vmatmul.mubr.msk.bf16.vlgmr.msra.gmra.mrb[88].mxu0 %vm969_vm0, %v3719_v58 }
0x262d   : > { %v3776_v44 = vpop.f32.mrb[88].mxu0 }
0x262e   : > { %v3777_v16 = vadd.f32 %v3980_v61, %v3776_v44  ;;  %v4432_v21 = vpop.f32.mrb[89].mxu0 }
0x262f   : > { %v3779_v22 = vpop.f32.mrb[90].mxu0 }
0x2630   : > { %v4433_v23 = vpop.f32.mrb[91].mxu0  ;;  %3783 = vst.msk [vmem:[%s875_s24] sm:$0xff] %vm3782_vm5, %v3777_v16 }
0x2631   : > { %4627 = shalt.err (!%p4624_p3)
}
0x2632   : > { %s4628_s3 = scalar_lea.hbm %s5590_s11, 128  ;;  %s4632_s24 = scalar_lea.hbm %s5785_s17, 256 }
0x2633   : > { %p4629_p4 = scmp.ne.s32.totalorder %s5590_s11, %s4628_s3  ;;  %p4633_p9 = scmp.lt.u32.totalorder %s5590_s11, %s5785_s17 }
0x2634   : > { %p4634_p10 = scmp.lt.u32.totalorder %s4632_s24, %s4628_s3  ;;  %p4636_p12 = scmp.lt.u32.totalorder %s4628_s3, %s5590_s11 }
0x2635   : > { %p4630_p7 = pnand %p4629_p4, %p4878_p5 }
0x2636   : > { %p4635_p11 = por %p4634_p10, %p4633_p9 }
0x2637   : > { %p4631_p8 = pneg %p4630_p7 }
0x2638   : > { %p4637_p13 = por %p4636_p12, %p4635_p11 }
0x263a   : > { %p4638_p0 = pnand %p4637_p13, %p4631_p8 }
0x263c   : > { %4641 = shalt.err (!%p4638_p0)
}
0x263d   : > { %4434 = dma.vmem_to_hbm [thread:$0]  (%p4878_p5), %s5592_s2, 128, %s5590_s11, %s3785_s29  }
0x263e PF: > { %s5786_s5 = sld [smem:[#allocation8_spill]]  ;;  %s5787_s8 = sld [smem:[#allocation5_spill]] }
0x2644   : > { %p4440_p1 = scmp.ge.s32.totalorder %s5786_s5, 2  ;;  %s3810_s1 = sand.u32 1, %s5787_s8  }
0x2645   : > { %s3811_s9 = scalar_lea.sflag [#allocation3], %s3810_s1 }
0x2646   : > { %p4437_p2 = pnand %p4440_p1, %p4882_p6 }
0x2648   : > { %4659 = dma.done.wait (!%p4437_p2), %s3811_s9, 128  }
0x2649   : > { %4661 = vsyncadd (!%p4437_p2), %s3811_s9, 4294967168  ;;  %s5789_s30 = sld [smem:[#allocation10_spill]]  ;;  %s5790_s8 = sld [smem:[#allocation6_spill]] }
0x264a   : > { %s5791_s5 = sld [smem:[#allocation7_spill]]  ;;  %s5792_s9 = sld [smem:[#allocation11_spill]] }
0x264f   : > { %p38_p3 = scmp.ge.s32.totalorder %s5789_s30, 4  }
0x2651   :  { %40 = sbr.rel (!%p38_p3) target bundleno = 26 (0x1a), region = 176 }
0x2658   :  { %3816 = vsyncpa [#allocation3], 1 }
0x2659   :  { %3818 = vsyncpa [#allocation3 + $0x1], 1 }

</bundles_post_ra>
